<compile_context>
chip_gen: v7x
topology: tpu7x:2x2x1
jax: 0.10.0
libtpu: 0.0.40
codegen_flags: <defaults>
</compile_context>

<pallas_src>
import functools

import jax
import jax.numpy as jnp
from jax import lax
from jax.experimental import pallas as pl
from jax.experimental.pallas import tpu as pltpu


# ----------------------------------------------------------------- Pallas kernel

def _denas_layer2_kernel(x_ref, w_ref, pv_ref, *rest, k, H, W, num_skips,
                         neg_slope, eps):
    """Fused Conv2d(k, pad=(k-1)//2)+bias -> InstanceNorm -> LeakyReLU
       -> skip adds -> InstanceNorm, for one sample (one grid step).

    x_ref : (1, H+k-1, W+k-1, C_in)  f32   halo-padded NHWC sample
    w_ref : (k*k, C_in, C_out)       bf16  per-tap conv weights (tap = ki*k + kj)
    pv_ref: (5, C_out)               f32   rows = [conv bias, g1, b1, g2, b2]
    rest  : num_skips refs of (1, H*W, C_out) f32, then the output ref (1, H*W, C_out).
    """
    skip_refs = rest[:num_skips]
    out_ref = rest[num_skips]

    c_in = x_ref.shape[-1]
    c_out = out_ref.shape[-1]
    m = H * W

    # Whole padded sample stays on-chip for all k*k taps (no HBM im2col).
    x = x_ref[0]                                              # (Hp, Wp, C_in) f32

    # ---- implicit im2col: k*k shifted bf16 matmuls, f32 accumulation on the MXU.
    acc = jnp.zeros((m, c_out), jnp.float32)
    for ki in range(k):
        for kj in range(k):
            patch = x[ki:ki + H, kj:kj + W, :]                # (H, W, C_in)
            patch2d = patch.reshape(m, c_in).astype(jnp.bfloat16)
            acc = acc + jnp.dot(patch2d, w_ref[ki * k + kj],
                                preferred_element_type=jnp.float32)

    pv = pv_ref[...]                                          # (5, C_out)
    acc = acc + pv[0:1, :]                                    # conv bias

    # ---- InstanceNorm2d(affine) over spatial rows (biased var), then LeakyReLU(0.2).
    mean1 = jnp.sum(acc, axis=0, keepdims=True) * (1.0 / m)
    cen1 = acc - mean1
    var1 = jnp.sum(cen1 * cen1, axis=0, keepdims=True) * (1.0 / m)
    y = cen1 * lax.rsqrt(var1 + eps) * pv[1:2, :] + pv[2:3, :]
    y = jnp.where(y >= 0.0, y, neg_slope * y)

    # ---- statically-selected skip connections (out += prev_layers[i]).
    for s_ref in skip_refs:
        y = y + s_ref[0]

    # ---- final InstanceNorm2d(affine).
    mean2 = jnp.sum(y, axis=0, keepdims=True) * (1.0 / m)
    cen2 = y - mean2
    var2 = jnp.sum(cen2 * cen2, axis=0, keepdims=True) * (1.0 / m)
    out_ref[0] = cen2 * lax.rsqrt(var2 + eps) * pv[3:4, :] + pv[4:5, :]


# ----------------------------------------------------------------- wrapper

def denas_layer2_forward(params, x_nchw, prev_layers, sample_arc, *, layer_id,
                         neg_slope=0.2, eps=1e-5):
    """DENASLayer2.forward.  `sample_arc` / `layer_id` are static Python data."""
    layer_type = int(sample_arc[0])
    skip_indices = tuple(sample_arc[1]) if layer_id > 0 else ()
    if layer_type == 0:
        branch, k = params["branch_0"], 3
    elif layer_type == 1:
        branch, k = params["branch_1"], 5
    else:
        raise ValueError(f"Unknown layer_type {layer_type}")
    pad = (k - 1) // 2

    N, C_in, H, W = x_nchw.shape
    C_out = branch["w"].shape[0]
    Hp, Wp = H + 2 * pad, W + 2 * pad

    # NCHW -> NHWC + semantic halo pad (only boundary layout plumbing is done in XLA).
    x = jnp.transpose(x_nchw.astype(jnp.float32), (0, 2, 3, 1))
    xpad = jnp.pad(x, ((0, 0), (pad, pad), (pad, pad), (0, 0)))

    # Conv weight (C_out, C_in, k, k) -> per-tap (k*k, C_in, C_out), bf16 for the MXU.
    w_taps = jnp.transpose(branch["w"], (2, 3, 1, 0)).reshape(k * k, C_in, C_out)
    w_taps = w_taps.astype(jnp.bfloat16)

    # All per-channel vectors packed into one tiny slab: [bias, in_g, in_b, bn_g, bn_b].
    pvec = jnp.stack([branch["b"], branch["in_g"], branch["in_b"],
                      params["bn_g"], params["bn_b"]], axis=0).astype(jnp.float32)

    # Statically selected skip inputs, channels-last (N, H*W, C_out).
    skips = [jnp.transpose(prev_layers[i].astype(jnp.float32),
                           (0, 2, 3, 1)).reshape(N, H * W, C_out)
             for i, s in enumerate(skip_indices) if int(s) == 1]
    num_skips = len(skips)

    kernel = functools.partial(_denas_layer2_kernel, k=k, H=H, W=W,
                               num_skips=num_skips, neg_slope=neg_slope, eps=eps)

    in_specs = [
        pl.BlockSpec((1, Hp, Wp, C_in), lambda n: (n, 0, 0, 0)),
        pl.BlockSpec((k * k, C_in, C_out), lambda n: (0, 0, 0)),
        pl.BlockSpec((5, C_out), lambda n: (0, 0)),
    ] + [pl.BlockSpec((1, H * W, C_out), lambda n: (n, 0, 0))
         for _ in range(num_skips)]

    out = pl.pallas_call(
        kernel,
        out_shape=jax.ShapeDtypeStruct((N, H * W, C_out), jnp.float32),
        grid=(N,),
        in_specs=in_specs,
        out_specs=pl.BlockSpec((1, H * W, C_out), lambda n: (n, 0, 0)),
        compiler_params=pltpu.CompilerParams(dimension_semantics=("parallel",)),
    )(xpad, w_taps, pvec, *skips)

    return jnp.transpose(out.reshape(N, H, W, C_out), (0, 3, 1, 2))


# ----------------------------------------------------------------- params / reference

def init_params(key, in_planes, out_planes):
    """PyTorch-style init: Conv2d kaiming-uniform-ish, InstanceNorm affine = (1, 0)."""
    def conv(kk, ksz):
        kw, kb = jax.random.split(kk)
        bound = 1.0 / (in_planes * ksz * ksz) ** 0.5
        return {
            "w": jax.random.uniform(kw, (out_planes, in_planes, ksz, ksz),
                                    jnp.float32, -bound, bound),
            "b": jax.random.uniform(kb, (out_planes,), jnp.float32, -bound, bound),
            "in_g": jnp.ones((out_planes,), jnp.float32),
            "in_b": jnp.zeros((out_planes,), jnp.float32),
        }
    k0, k1 = jax.random.split(key)
    return {
        "branch_0": conv(k0, 3),
        "branch_1": conv(k1, 5),
        "bn_g": jnp.ones((out_planes,), jnp.float32),
        "bn_b": jnp.zeros((out_planes,), jnp.float32),
    }


def reference_forward(params, x, prev_layers, sample_arc, *, layer_id,
                      neg_slope=0.2, eps=1e-5):
    """Pure-JAX (XLA, f32) reference for a numeric sanity check."""
    layer_type = int(sample_arc[0])
    branch = params["branch_0"] if layer_type == 0 else params["branch_1"]
    k = 3 if layer_type == 0 else 5
    pad = (k - 1) // 2

    out = lax.conv_general_dilated(
        x, branch["w"], window_strides=(1, 1),
        padding=[(pad, pad), (pad, pad)],
        dimension_numbers=("NCHW", "OIHW", "NCHW"),
        precision=lax.Precision.HIGHEST)
    out = out + branch["b"][None, :, None, None]

    def inorm(t, g, b):
        mu = jnp.mean(t, axis=(2, 3), keepdims=True)
        var = jnp.mean((t - mu) ** 2, axis=(2, 3), keepdims=True)
        return (t - mu) * lax.rsqrt(var + eps) * g[None, :, None, None] \
               + b[None, :, None, None]

    out = inorm(out, branch["in_g"], branch["in_b"])
    out = jnp.where(out >= 0.0, out, neg_slope * out)
    if layer_id > 0:
        for i, s in enumerate(sample_arc[1]):
            if int(s) == 1:
                out = out + prev_layers[i]
    return inorm(out, params["bn_g"], params["bn_b"])


# ----------------------------------------------------------------- main

if __name__ == "__main__":
    # Small, module-consistent shapes: batch=2, planes=32, spatial 16x16,
    # layer_id=2 with two previous layers; arc picks the k=5 branch, both skips on.
    N, C, H, W = 2, 32, 16, 16
    layer_id = 2
    sample_arc = (1, (1, 1))   # (layer_type, skip_indices) — static, like ENAS arcs

    key = jax.random.PRNGKey(0)
    kp, kx, ks0, ks1 = jax.random.split(key, 4)
    params = init_params(kp, C, C)
    x = jax.random.normal(kx, (N, C, H, W), jnp.float32)
    prev_layers = [jax.random.normal(ks0, (N, C, H, W), jnp.float32),
                   jax.random.normal(ks1, (N, C, H, W), jnp.float32)]

    fwd = jax.jit(lambda p, xx, pls: denas_layer2_forward(
        p, xx, pls, sample_arc, layer_id=layer_id))
    out = jax.block_until_ready(fwd(params, x, prev_layers))

    assert out.shape == (N, C, H, W), out.shape
    assert bool(jnp.all(jnp.isfinite(out)))

    # Numeric check against the f32 XLA reference (kernel uses bf16 MXU operands).
    ref = reference_forward(params, x, prev_layers, sample_arc, layer_id=layer_id)
    max_err = float(jnp.max(jnp.abs(out - ref)))
    assert max_err < 5e-2, f"max |pallas - reference| = {max_err}"

    print("KERNEL_OK")
</pallas_src>

<mosaic_0001>
module attributes {stable_mosaic.version = 11 : i64} {
  func.func @_denas_layer2_kernel(%arg0: i32, %arg1: memref<1x20x20x32xf32, #tpu.memory_space<vmem>>, %arg2: memref<25x32x32xbf16, #tpu.memory_space<vmem>>, %arg3: memref<5x32xf32, #tpu.memory_space<vmem>>, %arg4: memref<1x256x32xf32, #tpu.memory_space<vmem>>, %arg5: memref<1x256x32xf32, #tpu.memory_space<vmem>>, %arg6: memref<1x256x32xf32, #tpu.memory_space<vmem>>) attributes {dimension_semantics = [#tpu.dimension_semantics<parallel>], iteration_bounds = array<i64: 2>, scalar_prefetch = 0 : i64, scratch_operands = 0 : i64, tpu.core_type = #tpu.core_type<tc>, window_params = [{transform_indices = @transform_0, window_bounds = array<i64: 1, 20, 20, 32>}, {pipeline_mode = #tpu.pipeline_mode<synchronous>, transform_indices = @transform_1, window_bounds = array<i64: 25, 32, 32>}, {pipeline_mode = #tpu.pipeline_mode<synchronous>, transform_indices = @transform_2, window_bounds = array<i64: 5, 32>}, {transform_indices = @transform_3, window_bounds = array<i64: 1, 256, 32>}, {transform_indices = @transform_4, window_bounds = array<i64: 1, 256, 32>}, {transform_indices = @transform_5, window_bounds = array<i64: 1, 256, 32>}]} {
    %c0 = arith.constant 0 : index
    %c0_0 = arith.constant 0 : index
    %c0_1 = arith.constant 0 : index
    %c0_2 = arith.constant 0 : index
    %0 = vector.load %arg1[%c0, %c0_0, %c0_1, %c0_2] : memref<1x20x20x32xf32, #tpu.memory_space<vmem>>, vector<1x20x20x32xf32>
    %1 = vector.shape_cast %0 : vector<1x20x20x32xf32> to vector<20x20x32xf32>
    %cst = arith.constant 0.000000e+00 : f32
    %2 = vector.broadcast %cst : f32 to vector<256x32xf32>
    %3 = vector.extract_strided_slice %1 {offsets = [0, 0, 0], sizes = [16, 16, 32], strides = [1, 1, 1]} : vector<20x20x32xf32> to vector<16x16x32xf32>
    %4 = vector.shape_cast %3 : vector<16x16x32xf32> to vector<256x32xf32>
    %5 = arith.truncf %4 : vector<256x32xf32> to vector<256x32xbf16>
    %c0_3 = arith.constant 0 : index
    %c0_4 = arith.constant 0 : index
    %c0_5 = arith.constant 0 : index
    %6 = vector.load %arg2[%c0_3, %c0_4, %c0_5] : memref<25x32x32xbf16, #tpu.memory_space<vmem>>, vector<1x32x32xbf16>
    %7 = vector.shape_cast %6 : vector<1x32x32xbf16> to vector<32x32xbf16>
    %cst_6 = arith.constant dense<0.000000e+00> : vector<256x32xf32>
    %8 = tpu.matmul %5, %7, %cst_6 {dimension_numbers = #tpu.dot_dimension_numbers<[1], [0], [0], [1], [0, 0, 1, 1], [], []>} : vector<256x32xbf16>, vector<32x32xbf16>, vector<256x32xf32> -> vector<256x32xf32>
    %9 = arith.addf %2, %8 : vector<256x32xf32>
    %10 = vector.extract_strided_slice %1 {offsets = [0, 1, 0], sizes = [16, 16, 32], strides = [1, 1, 1]} : vector<20x20x32xf32> to vector<16x16x32xf32>
    %11 = vector.shape_cast %10 : vector<16x16x32xf32> to vector<256x32xf32>
    %12 = arith.truncf %11 : vector<256x32xf32> to vector<256x32xbf16>
    %c1 = arith.constant 1 : index
    %c0_7 = arith.constant 0 : index
    %c0_8 = arith.constant 0 : index
    %13 = vector.load %arg2[%c1, %c0_7, %c0_8] : memref<25x32x32xbf16, #tpu.memory_space<vmem>>, vector<1x32x32xbf16>
    %14 = vector.shape_cast %13 : vector<1x32x32xbf16> to vector<32x32xbf16>
    %cst_9 = arith.constant dense<0.000000e+00> : vector<256x32xf32>
    %15 = tpu.matmul %12, %14, %cst_9 {dimension_numbers = #tpu.dot_dimension_numbers<[1], [0], [0], [1], [0, 0, 1, 1], [], []>} : vector<256x32xbf16>, vector<32x32xbf16>, vector<256x32xf32> -> vector<256x32xf32>
    %16 = arith.addf %9, %15 : vector<256x32xf32>
    %17 = vector.extract_strided_slice %1 {offsets = [0, 2, 0], sizes = [16, 16, 32], strides = [1, 1, 1]} : vector<20x20x32xf32> to vector<16x16x32xf32>
    %18 = vector.shape_cast %17 : vector<16x16x32xf32> to vector<256x32xf32>
    %19 = arith.truncf %18 : vector<256x32xf32> to vector<256x32xbf16>
    %c2 = arith.constant 2 : index
    %c0_10 = arith.constant 0 : index
    %c0_11 = arith.constant 0 : index
    %20 = vector.load %arg2[%c2, %c0_10, %c0_11] : memref<25x32x32xbf16, #tpu.memory_space<vmem>>, vector<1x32x32xbf16>
    %21 = vector.shape_cast %20 : vector<1x32x32xbf16> to vector<32x32xbf16>
    %cst_12 = arith.constant dense<0.000000e+00> : vector<256x32xf32>
    %22 = tpu.matmul %19, %21, %cst_12 {dimension_numbers = #tpu.dot_dimension_numbers<[1], [0], [0], [1], [0, 0, 1, 1], [], []>} : vector<256x32xbf16>, vector<32x32xbf16>, vector<256x32xf32> -> vector<256x32xf32>
    %23 = arith.addf %16, %22 : vector<256x32xf32>
    %24 = vector.extract_strided_slice %1 {offsets = [0, 3, 0], sizes = [16, 16, 32], strides = [1, 1, 1]} : vector<20x20x32xf32> to vector<16x16x32xf32>
    %25 = vector.shape_cast %24 : vector<16x16x32xf32> to vector<256x32xf32>
    %26 = arith.truncf %25 : vector<256x32xf32> to vector<256x32xbf16>
    %c3 = arith.constant 3 : index
    %c0_13 = arith.constant 0 : index
    %c0_14 = arith.constant 0 : index
    %27 = vector.load %arg2[%c3, %c0_13, %c0_14] : memref<25x32x32xbf16, #tpu.memory_space<vmem>>, vector<1x32x32xbf16>
    %28 = vector.shape_cast %27 : vector<1x32x32xbf16> to vector<32x32xbf16>
    %cst_15 = arith.constant dense<0.000000e+00> : vector<256x32xf32>
    %29 = tpu.matmul %26, %28, %cst_15 {dimension_numbers = #tpu.dot_dimension_numbers<[1], [0], [0], [1], [0, 0, 1, 1], [], []>} : vector<256x32xbf16>, vector<32x32xbf16>, vector<256x32xf32> -> vector<256x32xf32>
    %30 = arith.addf %23, %29 : vector<256x32xf32>
    %31 = vector.extract_strided_slice %1 {offsets = [0, 4, 0], sizes = [16, 16, 32], strides = [1, 1, 1]} : vector<20x20x32xf32> to vector<16x16x32xf32>
    %32 = vector.shape_cast %31 : vector<16x16x32xf32> to vector<256x32xf32>
    %33 = arith.truncf %32 : vector<256x32xf32> to vector<256x32xbf16>
    %c4 = arith.constant 4 : index
    %c0_16 = arith.constant 0 : index
    %c0_17 = arith.constant 0 : index
    %34 = vector.load %arg2[%c4, %c0_16, %c0_17] : memref<25x32x32xbf16, #tpu.memory_space<vmem>>, vector<1x32x32xbf16>
    %35 = vector.shape_cast %34 : vector<1x32x32xbf16> to vector<32x32xbf16>
    %cst_18 = arith.constant dense<0.000000e+00> : vector<256x32xf32>
    %36 = tpu.matmul %33, %35, %cst_18 {dimension_numbers = #tpu.dot_dimension_numbers<[1], [0], [0], [1], [0, 0, 1, 1], [], []>} : vector<256x32xbf16>, vector<32x32xbf16>, vector<256x32xf32> -> vector<256x32xf32>
    %37 = arith.addf %30, %36 : vector<256x32xf32>
    %38 = vector.extract_strided_slice %1 {offsets = [1, 0, 0], sizes = [16, 16, 32], strides = [1, 1, 1]} : vector<20x20x32xf32> to vector<16x16x32xf32>
    %39 = vector.shape_cast %38 : vector<16x16x32xf32> to vector<256x32xf32>
    %40 = arith.truncf %39 : vector<256x32xf32> to vector<256x32xbf16>
    %c5 = arith.constant 5 : index
    %c0_19 = arith.constant 0 : index
    %c0_20 = arith.constant 0 : index
    %41 = vector.load %arg2[%c5, %c0_19, %c0_20] : memref<25x32x32xbf16, #tpu.memory_space<vmem>>, vector<1x32x32xbf16>
    %42 = vector.shape_cast %41 : vector<1x32x32xbf16> to vector<32x32xbf16>
    %cst_21 = arith.constant dense<0.000000e+00> : vector<256x32xf32>
    %43 = tpu.matmul %40, %42, %cst_21 {dimension_numbers = #tpu.dot_dimension_numbers<[1], [0], [0], [1], [0, 0, 1, 1], [], []>} : vector<256x32xbf16>, vector<32x32xbf16>, vector<256x32xf32> -> vector<256x32xf32>
    %44 = arith.addf %37, %43 : vector<256x32xf32>
    %45 = vector.extract_strided_slice %1 {offsets = [1, 1, 0], sizes = [16, 16, 32], strides = [1, 1, 1]} : vector<20x20x32xf32> to vector<16x16x32xf32>
    %46 = vector.shape_cast %45 : vector<16x16x32xf32> to vector<256x32xf32>
    %47 = arith.truncf %46 : vector<256x32xf32> to vector<256x32xbf16>
    %c6 = arith.constant 6 : index
    %c0_22 = arith.constant 0 : index
    %c0_23 = arith.constant 0 : index
    %48 = vector.load %arg2[%c6, %c0_22, %c0_23] : memref<25x32x32xbf16, #tpu.memory_space<vmem>>, vector<1x32x32xbf16>
    %49 = vector.shape_cast %48 : vector<1x32x32xbf16> to vector<32x32xbf16>
    %cst_24 = arith.constant dense<0.000000e+00> : vector<256x32xf32>
    %50 = tpu.matmul %47, %49, %cst_24 {dimension_numbers = #tpu.dot_dimension_numbers<[1], [0], [0], [1], [0, 0, 1, 1], [], []>} : vector<256x32xbf16>, vector<32x32xbf16>, vector<256x32xf32> -> vector<256x32xf32>
    %51 = arith.addf %44, %50 : vector<256x32xf32>
    %52 = vector.extract_strided_slice %1 {offsets = [1, 2, 0], sizes = [16, 16, 32], strides = [1, 1, 1]} : vector<20x20x32xf32> to vector<16x16x32xf32>
    %53 = vector.shape_cast %52 : vector<16x16x32xf32> to vector<256x32xf32>
    %54 = arith.truncf %53 : vector<256x32xf32> to vector<256x32xbf16>
    %c7 = arith.constant 7 : index
    %c0_25 = arith.constant 0 : index
    %c0_26 = arith.constant 0 : index
    %55 = vector.load %arg2[%c7, %c0_25, %c0_26] : memref<25x32x32xbf16, #tpu.memory_space<vmem>>, vector<1x32x32xbf16>
    %56 = vector.shape_cast %55 : vector<1x32x32xbf16> to vector<32x32xbf16>
    %cst_27 = arith.constant dense<0.000000e+00> : vector<256x32xf32>
    %57 = tpu.matmul %54, %56, %cst_27 {dimension_numbers = #tpu.dot_dimension_numbers<[1], [0], [0], [1], [0, 0, 1, 1], [], []>} : vector<256x32xbf16>, vector<32x32xbf16>, vector<256x32xf32> -> vector<256x32xf32>
    %58 = arith.addf %51, %57 : vector<256x32xf32>
    %59 = vector.extract_strided_slice %1 {offsets = [1, 3, 0], sizes = [16, 16, 32], strides = [1, 1, 1]} : vector<20x20x32xf32> to vector<16x16x32xf32>
    %60 = vector.shape_cast %59 : vector<16x16x32xf32> to vector<256x32xf32>
    %61 = arith.truncf %60 : vector<256x32xf32> to vector<256x32xbf16>
    %c8 = arith.constant 8 : index
    %c0_28 = arith.constant 0 : index
    %c0_29 = arith.constant 0 : index
    %62 = vector.load %arg2[%c8, %c0_28, %c0_29] : memref<25x32x32xbf16, #tpu.memory_space<vmem>>, vector<1x32x32xbf16>
    %63 = vector.shape_cast %62 : vector<1x32x32xbf16> to vector<32x32xbf16>
    %cst_30 = arith.constant dense<0.000000e+00> : vector<256x32xf32>
    %64 = tpu.matmul %61, %63, %cst_30 {dimension_numbers = #tpu.dot_dimension_numbers<[1], [0], [0], [1], [0, 0, 1, 1], [], []>} : vector<256x32xbf16>, vector<32x32xbf16>, vector<256x32xf32> -> vector<256x32xf32>
    %65 = arith.addf %58, %64 : vector<256x32xf32>
    %66 = vector.extract_strided_slice %1 {offsets = [1, 4, 0], sizes = [16, 16, 32], strides = [1, 1, 1]} : vector<20x20x32xf32> to vector<16x16x32xf32>
    %67 = vector.shape_cast %66 : vector<16x16x32xf32> to vector<256x32xf32>
    %68 = arith.truncf %67 : vector<256x32xf32> to vector<256x32xbf16>
    %c9 = arith.constant 9 : index
    %c0_31 = arith.constant 0 : index
    %c0_32 = arith.constant 0 : index
    %69 = vector.load %arg2[%c9, %c0_31, %c0_32] : memref<25x32x32xbf16, #tpu.memory_space<vmem>>, vector<1x32x32xbf16>
    %70 = vector.shape_cast %69 : vector<1x32x32xbf16> to vector<32x32xbf16>
    %cst_33 = arith.constant dense<0.000000e+00> : vector<256x32xf32>
    %71 = tpu.matmul %68, %70, %cst_33 {dimension_numbers = #tpu.dot_dimension_numbers<[1], [0], [0], [1], [0, 0, 1, 1], [], []>} : vector<256x32xbf16>, vector<32x32xbf16>, vector<256x32xf32> -> vector<256x32xf32>
    %72 = arith.addf %65, %71 : vector<256x32xf32>
    %73 = vector.extract_strided_slice %1 {offsets = [2, 0, 0], sizes = [16, 16, 32], strides = [1, 1, 1]} : vector<20x20x32xf32> to vector<16x16x32xf32>
    %74 = vector.shape_cast %73 : vector<16x16x32xf32> to vector<256x32xf32>
    %75 = arith.truncf %74 : vector<256x32xf32> to vector<256x32xbf16>
    %c10 = arith.constant 10 : index
    %c0_34 = arith.constant 0 : index
    %c0_35 = arith.constant 0 : index
    %76 = vector.load %arg2[%c10, %c0_34, %c0_35] : memref<25x32x32xbf16, #tpu.memory_space<vmem>>, vector<1x32x32xbf16>
    %77 = vector.shape_cast %76 : vector<1x32x32xbf16> to vector<32x32xbf16>
    %cst_36 = arith.constant dense<0.000000e+00> : vector<256x32xf32>
    %78 = tpu.matmul %75, %77, %cst_36 {dimension_numbers = #tpu.dot_dimension_numbers<[1], [0], [0], [1], [0, 0, 1, 1], [], []>} : vector<256x32xbf16>, vector<32x32xbf16>, vector<256x32xf32> -> vector<256x32xf32>
    %79 = arith.addf %72, %78 : vector<256x32xf32>
    %80 = vector.extract_strided_slice %1 {offsets = [2, 1, 0], sizes = [16, 16, 32], strides = [1, 1, 1]} : vector<20x20x32xf32> to vector<16x16x32xf32>
    %81 = vector.shape_cast %80 : vector<16x16x32xf32> to vector<256x32xf32>
    %82 = arith.truncf %81 : vector<256x32xf32> to vector<256x32xbf16>
    %c11 = arith.constant 11 : index
    %c0_37 = arith.constant 0 : index
    %c0_38 = arith.constant 0 : index
    %83 = vector.load %arg2[%c11, %c0_37, %c0_38] : memref<25x32x32xbf16, #tpu.memory_space<vmem>>, vector<1x32x32xbf16>
    %84 = vector.shape_cast %83 : vector<1x32x32xbf16> to vector<32x32xbf16>
    %cst_39 = arith.constant dense<0.000000e+00> : vector<256x32xf32>
    %85 = tpu.matmul %82, %84, %cst_39 {dimension_numbers = #tpu.dot_dimension_numbers<[1], [0], [0], [1], [0, 0, 1, 1], [], []>} : vector<256x32xbf16>, vector<32x32xbf16>, vector<256x32xf32> -> vector<256x32xf32>
    %86 = arith.addf %79, %85 : vector<256x32xf32>
    %87 = vector.extract_strided_slice %1 {offsets = [2, 2, 0], sizes = [16, 16, 32], strides = [1, 1, 1]} : vector<20x20x32xf32> to vector<16x16x32xf32>
    %88 = vector.shape_cast %87 : vector<16x16x32xf32> to vector<256x32xf32>
    %89 = arith.truncf %88 : vector<256x32xf32> to vector<256x32xbf16>
    %c12 = arith.constant 12 : index
    %c0_40 = arith.constant 0 : index
    %c0_41 = arith.constant 0 : index
    %90 = vector.load %arg2[%c12, %c0_40, %c0_41] : memref<25x32x32xbf16, #tpu.memory_space<vmem>>, vector<1x32x32xbf16>
    %91 = vector.shape_cast %90 : vector<1x32x32xbf16> to vector<32x32xbf16>
    %cst_42 = arith.constant dense<0.000000e+00> : vector<256x32xf32>
    %92 = tpu.matmul %89, %91, %cst_42 {dimension_numbers = #tpu.dot_dimension_numbers<[1], [0], [0], [1], [0, 0, 1, 1], [], []>} : vector<256x32xbf16>, vector<32x32xbf16>, vector<256x32xf32> -> vector<256x32xf32>
    %93 = arith.addf %86, %92 : vector<256x32xf32>
    %94 = vector.extract_strided_slice %1 {offsets = [2, 3, 0], sizes = [16, 16, 32], strides = [1, 1, 1]} : vector<20x20x32xf32> to vector<16x16x32xf32>
    %95 = vector.shape_cast %94 : vector<16x16x32xf32> to vector<256x32xf32>
    %96 = arith.truncf %95 : vector<256x32xf32> to vector<256x32xbf16>
    %c13 = arith.constant 13 : index
    %c0_43 = arith.constant 0 : index
    %c0_44 = arith.constant 0 : index
    %97 = vector.load %arg2[%c13, %c0_43, %c0_44] : memref<25x32x32xbf16, #tpu.memory_space<vmem>>, vector<1x32x32xbf16>
    %98 = vector.shape_cast %97 : vector<1x32x32xbf16> to vector<32x32xbf16>
    %cst_45 = arith.constant dense<0.000000e+00> : vector<256x32xf32>
    %99 = tpu.matmul %96, %98, %cst_45 {dimension_numbers = #tpu.dot_dimension_numbers<[1], [0], [0], [1], [0, 0, 1, 1], [], []>} : vector<256x32xbf16>, vector<32x32xbf16>, vector<256x32xf32> -> vector<256x32xf32>
    %100 = arith.addf %93, %99 : vector<256x32xf32>
    %101 = vector.extract_strided_slice %1 {offsets = [2, 4, 0], sizes = [16, 16, 32], strides = [1, 1, 1]} : vector<20x20x32xf32> to vector<16x16x32xf32>
    %102 = vector.shape_cast %101 : vector<16x16x32xf32> to vector<256x32xf32>
    %103 = arith.truncf %102 : vector<256x32xf32> to vector<256x32xbf16>
    %c14 = arith.constant 14 : index
    %c0_46 = arith.constant 0 : index
    %c0_47 = arith.constant 0 : index
    %104 = vector.load %arg2[%c14, %c0_46, %c0_47] : memref<25x32x32xbf16, #tpu.memory_space<vmem>>, vector<1x32x32xbf16>
    %105 = vector.shape_cast %104 : vector<1x32x32xbf16> to vector<32x32xbf16>
    %cst_48 = arith.constant dense<0.000000e+00> : vector<256x32xf32>
    %106 = tpu.matmul %103, %105, %cst_48 {dimension_numbers = #tpu.dot_dimension_numbers<[1], [0], [0], [1], [0, 0, 1, 1], [], []>} : vector<256x32xbf16>, vector<32x32xbf16>, vector<256x32xf32> -> vector<256x32xf32>
    %107 = arith.addf %100, %106 : vector<256x32xf32>
    %108 = vector.extract_strided_slice %1 {offsets = [3, 0, 0], sizes = [16, 16, 32], strides = [1, 1, 1]} : vector<20x20x32xf32> to vector<16x16x32xf32>
    %109 = vector.shape_cast %108 : vector<16x16x32xf32> to vector<256x32xf32>
    %110 = arith.truncf %109 : vector<256x32xf32> to vector<256x32xbf16>
    %c15 = arith.constant 15 : index
    %c0_49 = arith.constant 0 : index
    %c0_50 = arith.constant 0 : index
    %111 = vector.load %arg2[%c15, %c0_49, %c0_50] : memref<25x32x32xbf16, #tpu.memory_space<vmem>>, vector<1x32x32xbf16>
    %112 = vector.shape_cast %111 : vector<1x32x32xbf16> to vector<32x32xbf16>
    %cst_51 = arith.constant dense<0.000000e+00> : vector<256x32xf32>
    %113 = tpu.matmul %110, %112, %cst_51 {dimension_numbers = #tpu.dot_dimension_numbers<[1], [0], [0], [1], [0, 0, 1, 1], [], []>} : vector<256x32xbf16>, vector<32x32xbf16>, vector<256x32xf32> -> vector<256x32xf32>
    %114 = arith.addf %107, %113 : vector<256x32xf32>
    %115 = vector.extract_strided_slice %1 {offsets = [3, 1, 0], sizes = [16, 16, 32], strides = [1, 1, 1]} : vector<20x20x32xf32> to vector<16x16x32xf32>
    %116 = vector.shape_cast %115 : vector<16x16x32xf32> to vector<256x32xf32>
    %117 = arith.truncf %116 : vector<256x32xf32> to vector<256x32xbf16>
    %c16 = arith.constant 16 : index
    %c0_52 = arith.constant 0 : index
    %c0_53 = arith.constant 0 : index
    %118 = vector.load %arg2[%c16, %c0_52, %c0_53] : memref<25x32x32xbf16, #tpu.memory_space<vmem>>, vector<1x32x32xbf16>
    %119 = vector.shape_cast %118 : vector<1x32x32xbf16> to vector<32x32xbf16>
    %cst_54 = arith.constant dense<0.000000e+00> : vector<256x32xf32>
    %120 = tpu.matmul %117, %119, %cst_54 {dimension_numbers = #tpu.dot_dimension_numbers<[1], [0], [0], [1], [0, 0, 1, 1], [], []>} : vector<256x32xbf16>, vector<32x32xbf16>, vector<256x32xf32> -> vector<256x32xf32>
    %121 = arith.addf %114, %120 : vector<256x32xf32>
    %122 = vector.extract_strided_slice %1 {offsets = [3, 2, 0], sizes = [16, 16, 32], strides = [1, 1, 1]} : vector<20x20x32xf32> to vector<16x16x32xf32>
    %123 = vector.shape_cast %122 : vector<16x16x32xf32> to vector<256x32xf32>
    %124 = arith.truncf %123 : vector<256x32xf32> to vector<256x32xbf16>
    %c17 = arith.constant 17 : index
    %c0_55 = arith.constant 0 : index
    %c0_56 = arith.constant 0 : index
    %125 = vector.load %arg2[%c17, %c0_55, %c0_56] : memref<25x32x32xbf16, #tpu.memory_space<vmem>>, vector<1x32x32xbf16>
    %126 = vector.shape_cast %125 : vector<1x32x32xbf16> to vector<32x32xbf16>
    %cst_57 = arith.constant dense<0.000000e+00> : vector<256x32xf32>
    %127 = tpu.matmul %124, %126, %cst_57 {dimension_numbers = #tpu.dot_dimension_numbers<[1], [0], [0], [1], [0, 0, 1, 1], [], []>} : vector<256x32xbf16>, vector<32x32xbf16>, vector<256x32xf32> -> vector<256x32xf32>
    %128 = arith.addf %121, %127 : vector<256x32xf32>
    %129 = vector.extract_strided_slice %1 {offsets = [3, 3, 0], sizes = [16, 16, 32], strides = [1, 1, 1]} : vector<20x20x32xf32> to vector<16x16x32xf32>
    %130 = vector.shape_cast %129 : vector<16x16x32xf32> to vector<256x32xf32>
    %131 = arith.truncf %130 : vector<256x32xf32> to vector<256x32xbf16>
    %c18 = arith.constant 18 : index
    %c0_58 = arith.constant 0 : index
    %c0_59 = arith.constant 0 : index
    %132 = vector.load %arg2[%c18, %c0_58, %c0_59] : memref<25x32x32xbf16, #tpu.memory_space<vmem>>, vector<1x32x32xbf16>
    %133 = vector.shape_cast %132 : vector<1x32x32xbf16> to vector<32x32xbf16>
    %cst_60 = arith.constant dense<0.000000e+00> : vector<256x32xf32>
    %134 = tpu.matmul %131, %133, %cst_60 {dimension_numbers = #tpu.dot_dimension_numbers<[1], [0], [0], [1], [0, 0, 1, 1], [], []>} : vector<256x32xbf16>, vector<32x32xbf16>, vector<256x32xf32> -> vector<256x32xf32>
    %135 = arith.addf %128, %134 : vector<256x32xf32>
    %136 = vector.extract_strided_slice %1 {offsets = [3, 4, 0], sizes = [16, 16, 32], strides = [1, 1, 1]} : vector<20x20x32xf32> to vector<16x16x32xf32>
    %137 = vector.shape_cast %136 : vector<16x16x32xf32> to vector<256x32xf32>
    %138 = arith.truncf %137 : vector<256x32xf32> to vector<256x32xbf16>
    %c19 = arith.constant 19 : index
    %c0_61 = arith.constant 0 : index
    %c0_62 = arith.constant 0 : index
    %139 = vector.load %arg2[%c19, %c0_61, %c0_62] : memref<25x32x32xbf16, #tpu.memory_space<vmem>>, vector<1x32x32xbf16>
    %140 = vector.shape_cast %139 : vector<1x32x32xbf16> to vector<32x32xbf16>
    %cst_63 = arith.constant dense<0.000000e+00> : vector<256x32xf32>
    %141 = tpu.matmul %138, %140, %cst_63 {dimension_numbers = #tpu.dot_dimension_numbers<[1], [0], [0], [1], [0, 0, 1, 1], [], []>} : vector<256x32xbf16>, vector<32x32xbf16>, vector<256x32xf32> -> vector<256x32xf32>
    %142 = arith.addf %135, %141 : vector<256x32xf32>
    %143 = vector.extract_strided_slice %1 {offsets = [4, 0, 0], sizes = [16, 16, 32], strides = [1, 1, 1]} : vector<20x20x32xf32> to vector<16x16x32xf32>
    %144 = vector.shape_cast %143 : vector<16x16x32xf32> to vector<256x32xf32>
    %145 = arith.truncf %144 : vector<256x32xf32> to vector<256x32xbf16>
    %c20 = arith.constant 20 : index
    %c0_64 = arith.constant 0 : index
    %c0_65 = arith.constant 0 : index
    %146 = vector.load %arg2[%c20, %c0_64, %c0_65] : memref<25x32x32xbf16, #tpu.memory_space<vmem>>, vector<1x32x32xbf16>
    %147 = vector.shape_cast %146 : vector<1x32x32xbf16> to vector<32x32xbf16>
    %cst_66 = arith.constant dense<0.000000e+00> : vector<256x32xf32>
    %148 = tpu.matmul %145, %147, %cst_66 {dimension_numbers = #tpu.dot_dimension_numbers<[1], [0], [0], [1], [0, 0, 1, 1], [], []>} : vector<256x32xbf16>, vector<32x32xbf16>, vector<256x32xf32> -> vector<256x32xf32>
    %149 = arith.addf %142, %148 : vector<256x32xf32>
    %150 = vector.extract_strided_slice %1 {offsets = [4, 1, 0], sizes = [16, 16, 32], strides = [1, 1, 1]} : vector<20x20x32xf32> to vector<16x16x32xf32>
    %151 = vector.shape_cast %150 : vector<16x16x32xf32> to vector<256x32xf32>
    %152 = arith.truncf %151 : vector<256x32xf32> to vector<256x32xbf16>
    %c21 = arith.constant 21 : index
    %c0_67 = arith.constant 0 : index
    %c0_68 = arith.constant 0 : index
    %153 = vector.load %arg2[%c21, %c0_67, %c0_68] : memref<25x32x32xbf16, #tpu.memory_space<vmem>>, vector<1x32x32xbf16>
    %154 = vector.shape_cast %153 : vector<1x32x32xbf16> to vector<32x32xbf16>
    %cst_69 = arith.constant dense<0.000000e+00> : vector<256x32xf32>
    %155 = tpu.matmul %152, %154, %cst_69 {dimension_numbers = #tpu.dot_dimension_numbers<[1], [0], [0], [1], [0, 0, 1, 1], [], []>} : vector<256x32xbf16>, vector<32x32xbf16>, vector<256x32xf32> -> vector<256x32xf32>
    %156 = arith.addf %149, %155 : vector<256x32xf32>
    %157 = vector.extract_strided_slice %1 {offsets = [4, 2, 0], sizes = [16, 16, 32], strides = [1, 1, 1]} : vector<20x20x32xf32> to vector<16x16x32xf32>
    %158 = vector.shape_cast %157 : vector<16x16x32xf32> to vector<256x32xf32>
    %159 = arith.truncf %158 : vector<256x32xf32> to vector<256x32xbf16>
    %c22 = arith.constant 22 : index
    %c0_70 = arith.constant 0 : index
    %c0_71 = arith.constant 0 : index
    %160 = vector.load %arg2[%c22, %c0_70, %c0_71] : memref<25x32x32xbf16, #tpu.memory_space<vmem>>, vector<1x32x32xbf16>
    %161 = vector.shape_cast %160 : vector<1x32x32xbf16> to vector<32x32xbf16>
    %cst_72 = arith.constant dense<0.000000e+00> : vector<256x32xf32>
    %162 = tpu.matmul %159, %161, %cst_72 {dimension_numbers = #tpu.dot_dimension_numbers<[1], [0], [0], [1], [0, 0, 1, 1], [], []>} : vector<256x32xbf16>, vector<32x32xbf16>, vector<256x32xf32> -> vector<256x32xf32>
    %163 = arith.addf %156, %162 : vector<256x32xf32>
    %164 = vector.extract_strided_slice %1 {offsets = [4, 3, 0], sizes = [16, 16, 32], strides = [1, 1, 1]} : vector<20x20x32xf32> to vector<16x16x32xf32>
    %165 = vector.shape_cast %164 : vector<16x16x32xf32> to vector<256x32xf32>
    %166 = arith.truncf %165 : vector<256x32xf32> to vector<256x32xbf16>
    %c23 = arith.constant 23 : index
    %c0_73 = arith.constant 0 : index
    %c0_74 = arith.constant 0 : index
    %167 = vector.load %arg2[%c23, %c0_73, %c0_74] : memref<25x32x32xbf16, #tpu.memory_space<vmem>>, vector<1x32x32xbf16>
    %168 = vector.shape_cast %167 : vector<1x32x32xbf16> to vector<32x32xbf16>
    %cst_75 = arith.constant dense<0.000000e+00> : vector<256x32xf32>
    %169 = tpu.matmul %166, %168, %cst_75 {dimension_numbers = #tpu.dot_dimension_numbers<[1], [0], [0], [1], [0, 0, 1, 1], [], []>} : vector<256x32xbf16>, vector<32x32xbf16>, vector<256x32xf32> -> vector<256x32xf32>
    %170 = arith.addf %163, %169 : vector<256x32xf32>
    %171 = vector.extract_strided_slice %1 {offsets = [4, 4, 0], sizes = [16, 16, 32], strides = [1, 1, 1]} : vector<20x20x32xf32> to vector<16x16x32xf32>
    %172 = vector.shape_cast %171 : vector<16x16x32xf32> to vector<256x32xf32>
    %173 = arith.truncf %172 : vector<256x32xf32> to vector<256x32xbf16>
    %c24 = arith.constant 24 : index
    %c0_76 = arith.constant 0 : index
    %c0_77 = arith.constant 0 : index
    %174 = vector.load %arg2[%c24, %c0_76, %c0_77] : memref<25x32x32xbf16, #tpu.memory_space<vmem>>, vector<1x32x32xbf16>
    %175 = vector.shape_cast %174 : vector<1x32x32xbf16> to vector<32x32xbf16>
    %cst_78 = arith.constant dense<0.000000e+00> : vector<256x32xf32>
    %176 = tpu.matmul %173, %175, %cst_78 {dimension_numbers = #tpu.dot_dimension_numbers<[1], [0], [0], [1], [0, 0, 1, 1], [], []>} : vector<256x32xbf16>, vector<32x32xbf16>, vector<256x32xf32> -> vector<256x32xf32>
    %177 = arith.addf %170, %176 : vector<256x32xf32>
    %c0_79 = arith.constant 0 : index
    %c0_80 = arith.constant 0 : index
    %178 = vector.load %arg3[%c0_79, %c0_80] : memref<5x32xf32, #tpu.memory_space<vmem>>, vector<5x32xf32>
    %179 = vector.extract_strided_slice %178 {offsets = [0, 0], sizes = [1, 32], strides = [1, 1]} : vector<5x32xf32> to vector<1x32xf32>
    %180 = vector.broadcast %179 : vector<1x32xf32> to vector<256x32xf32>
    %181 = arith.addf %177, %180 : vector<256x32xf32>
    %cst_81 = arith.constant dense<0.000000e+00> : vector<32xf32>
    %182 = vector.multi_reduction <add>, %181, %cst_81 [0] : vector<256x32xf32> to vector<32xf32>
    %183 = vector.shape_cast %182 : vector<32xf32> to vector<1x32xf32>
    %cst_82 = arith.constant 3.906250e-03 : f32
    %184 = vector.broadcast %cst_82 : f32 to vector<1x32xf32>
    %185 = arith.mulf %183, %184 : vector<1x32xf32>
    %186 = vector.broadcast %185 : vector<1x32xf32> to vector<256x32xf32>
    %187 = arith.subf %181, %186 : vector<256x32xf32>
    %188 = arith.mulf %187, %187 : vector<256x32xf32>
    %cst_83 = arith.constant dense<0.000000e+00> : vector<32xf32>
    %189 = vector.multi_reduction <add>, %188, %cst_83 [0] : vector<256x32xf32> to vector<32xf32>
    %190 = vector.shape_cast %189 : vector<32xf32> to vector<1x32xf32>
    %cst_84 = arith.constant 3.906250e-03 : f32
    %191 = vector.broadcast %cst_84 : f32 to vector<1x32xf32>
    %192 = arith.mulf %190, %191 : vector<1x32xf32>
    %cst_85 = arith.constant 9.99999974E-6 : f32
    %193 = vector.broadcast %cst_85 : f32 to vector<1x32xf32>
    %194 = arith.addf %192, %193 : vector<1x32xf32>
    %195 = math.rsqrt %194 : vector<1x32xf32>
    %196 = vector.broadcast %195 : vector<1x32xf32> to vector<256x32xf32>
    %197 = arith.mulf %187, %196 : vector<256x32xf32>
    %198 = vector.extract_strided_slice %178 {offsets = [1, 0], sizes = [1, 32], strides = [1, 1]} : vector<5x32xf32> to vector<1x32xf32>
    %199 = vector.broadcast %198 : vector<1x32xf32> to vector<256x32xf32>
    %200 = arith.mulf %197, %199 : vector<256x32xf32>
    %201 = vector.extract_strided_slice %178 {offsets = [2, 0], sizes = [1, 32], strides = [1, 1]} : vector<5x32xf32> to vector<1x32xf32>
    %202 = vector.broadcast %201 : vector<1x32xf32> to vector<256x32xf32>
    %203 = arith.addf %200, %202 : vector<256x32xf32>
    %cst_86 = arith.constant 0.000000e+00 : f32
    %204 = vector.broadcast %cst_86 : f32 to vector<256x32xf32>
    %205 = arith.cmpf oge, %203, %204 : vector<256x32xf32>
    %cst_87 = arith.constant 2.000000e-01 : f32
    %206 = vector.broadcast %cst_87 : f32 to vector<256x32xf32>
    %207 = arith.mulf %206, %203 : vector<256x32xf32>
    %208 = arith.select %205, %203, %207 : vector<256x32xi1>, vector<256x32xf32>
    %c0_88 = arith.constant 0 : index
    %c0_89 = arith.constant 0 : index
    %c0_90 = arith.constant 0 : index
    %209 = vector.load %arg4[%c0_88, %c0_89, %c0_90] : memref<1x256x32xf32, #tpu.memory_space<vmem>>, vector<1x256x32xf32>
    %210 = vector.shape_cast %209 : vector<1x256x32xf32> to vector<256x32xf32>
    %211 = arith.addf %208, %210 : vector<256x32xf32>
    %c0_91 = arith.constant 0 : index
    %c0_92 = arith.constant 0 : index
    %c0_93 = arith.constant 0 : index
    %212 = vector.load %arg5[%c0_91, %c0_92, %c0_93] : memref<1x256x32xf32, #tpu.memory_space<vmem>>, vector<1x256x32xf32>
    %213 = vector.shape_cast %212 : vector<1x256x32xf32> to vector<256x32xf32>
    %214 = arith.addf %211, %213 : vector<256x32xf32>
    %cst_94 = arith.constant dense<0.000000e+00> : vector<32xf32>
    %215 = vector.multi_reduction <add>, %214, %cst_94 [0] : vector<256x32xf32> to vector<32xf32>
    %216 = vector.shape_cast %215 : vector<32xf32> to vector<1x32xf32>
    %cst_95 = arith.constant 3.906250e-03 : f32
    %217 = vector.broadcast %cst_95 : f32 to vector<1x32xf32>
    %218 = arith.mulf %216, %217 : vector<1x32xf32>
    %219 = vector.broadcast %218 : vector<1x32xf32> to vector<256x32xf32>
    %220 = arith.subf %214, %219 : vector<256x32xf32>
    %221 = arith.mulf %220, %220 : vector<256x32xf32>
    %cst_96 = arith.constant dense<0.000000e+00> : vector<32xf32>
    %222 = vector.multi_reduction <add>, %221, %cst_96 [0] : vector<256x32xf32> to vector<32xf32>
    %223 = vector.shape_cast %222 : vector<32xf32> to vector<1x32xf32>
    %cst_97 = arith.constant 3.906250e-03 : f32
    %224 = vector.broadcast %cst_97 : f32 to vector<1x32xf32>
    %225 = arith.mulf %223, %224 : vector<1x32xf32>
    %cst_98 = arith.constant 9.99999974E-6 : f32
    %226 = vector.broadcast %cst_98 : f32 to vector<1x32xf32>
    %227 = arith.addf %225, %226 : vector<1x32xf32>
    %228 = math.rsqrt %227 : vector<1x32xf32>
    %229 = vector.broadcast %228 : vector<1x32xf32> to vector<256x32xf32>
    %230 = arith.mulf %220, %229 : vector<256x32xf32>
    %231 = vector.extract_strided_slice %178 {offsets = [3, 0], sizes = [1, 32], strides = [1, 1]} : vector<5x32xf32> to vector<1x32xf32>
    %232 = vector.broadcast %231 : vector<1x32xf32> to vector<256x32xf32>
    %233 = arith.mulf %230, %232 : vector<256x32xf32>
    %234 = vector.extract_strided_slice %178 {offsets = [4, 0], sizes = [1, 32], strides = [1, 1]} : vector<5x32xf32> to vector<1x32xf32>
    %235 = vector.broadcast %234 : vector<1x32xf32> to vector<256x32xf32>
    %236 = arith.addf %233, %235 : vector<256x32xf32>
    %c0_99 = arith.constant 0 : index
    %c0_100 = arith.constant 0 : index
    %c0_101 = arith.constant 0 : index
    %237 = vector.load %arg6[%c0_99, %c0_100, %c0_101] : memref<1x256x32xf32, #tpu.memory_space<vmem>>, vector<1x256x32xf32>
    %238 = vector.shape_cast %237 : vector<1x256x32xf32> to vector<256x32xf32>
    %239 = vector.shape_cast %236 : vector<256x32xf32> to vector<1x256x32xf32>
    tpu.vector_store %arg6[%c0_99, %c0_100, %c0_101], %239 {strides = array<i32>} : memref<1x256x32xf32, #tpu.memory_space<vmem>>, vector<1x256x32xf32>,
    return
  }
  func.func @transform_0(%arg0: i32) -> (i32, i32, i32, i32) {
    %c0_i32 = arith.constant 0 : i32
    %c0_i32_0 = arith.constant 0 : i32
    %c0_i32_1 = arith.constant 0 : i32
    %c0_i32_2 = arith.constant 0 : i32
    return %arg0, %c0_i32, %c0_i32_0, %c0_i32_1 : i32, i32, i32, i32
  }
  func.func @transform_1(%arg0: i32) -> (i32, i32, i32) {
    %c0_i32 = arith.constant 0 : i32
    %c0_i32_0 = arith.constant 0 : i32
    %c0_i32_1 = arith.constant 0 : i32
    %c0_i32_2 = arith.constant 0 : i32
    return %c0_i32, %c0_i32_0, %c0_i32_1 : i32, i32, i32
  }
  func.func @transform_2(%arg0: i32) -> (i32, i32) {
    %c0_i32 = arith.constant 0 : i32
    %c0_i32_0 = arith.constant 0 : i32
    %c0_i32_1 = arith.constant 0 : i32
    return %c0_i32, %c0_i32_0 : i32, i32
  }
  func.func @transform_3(%arg0: i32) -> (i32, i32, i32) {
    %c0_i32 = arith.constant 0 : i32
    %c0_i32_0 = arith.constant 0 : i32
    %c0_i32_1 = arith.constant 0 : i32
    return %arg0, %c0_i32, %c0_i32_0 : i32, i32, i32
  }
  func.func @transform_4(%arg0: i32) -> (i32, i32, i32) {
    %c0_i32 = arith.constant 0 : i32
    %c0_i32_0 = arith.constant 0 : i32
    %c0_i32_1 = arith.constant 0 : i32
    return %arg0, %c0_i32, %c0_i32_0 : i32, i32, i32
  }
  func.func @transform_5(%arg0: i32) -> (i32, i32, i32) {
    %c0_i32 = arith.constant 0 : i32
    %c0_i32_0 = arith.constant 0 : i32
    %c0_i32_1 = arith.constant 0 : i32
    return %arg0, %c0_i32, %c0_i32_0 : i32, i32, i32
  }
}

</mosaic_0001>

<bundles_post_ra>
// kernel: _lambda_.1
= control target key start
LH: loop header
LB: loop body
LE: loop exit
PB: predicated region body
PF: predicated region fallthrough
CT: control target
= control target key end

     0   :  { %10 = vsyncpa [#allocation3], 0  ;;  %s13559_s0 = inlined_call_operand.vmem [shape: f32[2,20,20,32], index: 0, kind: input, shape index: {}]   ;;  %s13560_s1 = inlined_call_operand.vmem [shape: bf16[25,32,32], index: 1, kind: input, shape index: {}]   ;;  %s13561_s2 = inlined_call_operand.vmem [shape: f32[5,32], index: 2, kind: input, shape index: {}]   ;;  %s13562_s3 = inlined_call_operand.vmem [shape: f32[2,256,32], index: 3, kind: input, shape index: {}]   ;;  %s13563_s4 = inlined_call_operand.vmem [shape: f32[2,256,32], index: 4, kind: input, shape index: {}]   ;;  %s13564_s5 = inlined_call_operand.hbm [shape: f32[2,256,32], index: 5, kind: output, shape index: {}]  }
   0x1   :  { %12 = vsyncpa [#allocation3 + $0x1], 0  ;;  %s10434_s18 = smov 0   ;;  %s10436_s19 = smov 0  }
   0x2   :  { %s10438_s20 = smov 0   ;;  %s10440_s21 = smov 0  }
   0x3 LB: > { %s10455_s22 = sadd.s32 4294967295, %s10399_s21   ;;  %s7547_s23 = sadd.s32 4294967294, %s10399_s21   ;;  %s10399_s21 = sphi %s10440_s21, %s13969_s21   ;;  %s10395_s20 = sphi %s10438_s20, %s13968_s20   ;;  %s10391_s19 = sphi %s10436_s19, %s13967_s19   ;;  %s10387_s18 = sphi %s10434_s18, %s13966_s18  }
   0x4   : > { %s10459_s24 = sadd.s32 1, %s10399_s21   ;;  %s145_s25 = sadd.s32 1, %s10395_s20 }
   0x5   : > { %s142_s26 = ssub.s32 %s10399_s21, %s10459_s24  ;;  %p155_p0 = scmp.ne.s32.totalorder %s10395_s20, %s10391_s19 }
   0x6   : > { %p143_p1 = scmp.eq.s32.totalorder %s142_s26, 0  ;;  %p156_p2 = scmp.eq.s32.totalorder %s10455_s22, 1 }
   0x7   : > { %p161_p3 = scmp.ne.s32.totalorder %s10391_s19, %s10387_s18  ;;  %p162_p4 = scmp.eq.s32.totalorder %s7547_s23, 1 }
   0x8   : > { %s10470_s27 = scalar_select %p143_p1, %s10395_s20, %s145_s25  }
   0x9   : > { %p10472_p5 = por %p156_p2, %p155_p0  ;;  %p10476_p6 = por %p162_p4, %p161_p3 }
   0xa   : > { %p7550_p7 = scmp.ge.s32.totalorder %s10399_s21, 1  ;;  %p210_p8 = scmp.lt.s32.totalorder %s10399_s21, 3 }
   0xc   : > { %p211_p9 = pnand %p7550_p7, %p210_p8 }
   0xe   : > { %214 = sbr.rel (%p211_p9) target bundleno = 1422 (0x58e), region = 40 }
  0x15   : > { %v10275_v0 = vld [vmem:[%s13560_s1 + $0x10] sm:$0xff]   ;;  %p248_p10 = scmp.lt.s32.totalorder %s10455_s22, 1  ;;  %v10276_v1 = vld [vmem:[%s13560_s1 + $0xc0] sm:$0xff]   ;;  %v10277_v2 = vld [vmem:[%s13560_s1 + $0x18] sm:$0xff]   ;;  %vm392_vm0 = vcmask 1046528   ;;  %vm538_vm1 = vcmask 261120  }
  0x16   : > { %8561 = vmatprep.subr.bf16.mxu1 %v10275_v0  ;;  %8993 = vmatprep.subr.bf16.mxu0 %v10276_v1  ;;  %v10278_v3 = vld [vmem:[%s13560_s1 + $0xc8] sm:$0xff]   ;;  %v10279_v4 = vld [vmem:[%s13560_s1] sm:$0xff]   ;;  %v10505_v5 = vld [vmem:[%s13560_s1 + $0xd0] sm:$0xff]   ;;  %vm969_vm2 = vcmask 1045504   ;;  %vm1356_vm3 = vcmask 1044480   ;;  %vm1743_vm4 = vcmask 1043456  }
  0x17   : > { %s10493_s11 = scalar_select %p248_p10, %s10455_s22, 1  ;;  %8562 = vmatpush3.bf16.msra.mxu1 %v10275_v0  ;;  %8994 = vmatpush3.bf16.msra.mxu0 %v10276_v1  ;;  %v10281_v60 = vld [vmem:[%s13560_s1 + $0xd8] sm:$0xff]  }
  0x18   : > { %8563 = vmatprep.subr.bf16.mxu1 %v10277_v2  ;;  %8995 = vmatprep.subr.bf16.mxu0 %v10278_v3  ;;  %s245_s6 = sand.u32 1, %s10391_s19   ;;  %s8110_s9 = sshll.u32 %s10455_s22, 12 }
  0x19   : > { %s10233_s14 = smul.u32 480, %s10493_s11  ;;  %s8108_s16 = sshll.u32 %s10493_s11, 8 }
  0x1a   : > { %s12804_s23 = scalar_lea.vmem %s13562_s3, %s8108_s16  ;;  %s12811_s26 = scalar_lea.vmem %s13563_s4, %s8108_s16 }
  0x1b   : > { %s10510_s30 = scalar_lea.vmem %s13559_s0, %s10233_s14  ;;  %8564 = vmatpush3.bf16.msra.mxu1 %v10277_v2  ;;  %8996 = vmatpush3.bf16.msra.mxu0 %v10278_v3  ;;  %v10282_v2 = vld [vmem:[%s13560_s1 + $0x8] sm:$0xff]   ;;  %s7551_s7 = sshll.u32 %s245_s6, 8 }
  0x1c   : > { %v10513_v6 = vld [vmem:[%s10510_s30] sm:$0xff]  ;;  %v10516_v7 = vld [vmem:[%s10510_s30 + $0x8] sm:$0xff]  ;;  %v266_v8 = vld [vmem:[%s10510_s30 + $0x10] sm:$0xf]  ;;  %8597 = vmatprep.subr.bf16.mxu1 %v10279_v4  ;;  %9029 = vmatprep.subr.bf16.mxu0 %v10505_v5  ;;  %s13370_s8 = scalar_lea.vmem [#allocation2], %s7551_s7  ;;  %s13484_s13 = scalar_lea.hbm %s13564_s5, %s8110_s9 }
  0x1d   : > { %v393_v9 = vrot.slane %v10513_v6, 1  ;;  %v394_v10 = vrot.slane %v10516_v7, 1  ;;  %v396_v11 = vrot.slane %v266_v8, 1  ;;  %v10522_v12 = vld [vmem:[%s10510_s30 + $0x30] sm:$0xff]  ;;  %v10525_v13 = vld [vmem:[%s10510_s30 + $0x38] sm:$0xff]  ;;  %v10537_v18 = vld [vmem:[%s10510_s30 + $0x20] sm:$0xff] }
  0x1e   : > { %13731 = vst [vmem:[#allocation5_spill] sm:$0xff] %v10522_v12  ;;  %13732 = vst [vmem:[#allocation6_spill] sm:$0xff] %v10525_v13  ;;  %v10528_v14 = vld [vmem:[%s10510_s30 + $0x18] sm:$0xff]  ;;  %v10531_v15 = vld [vmem:[%s10510_s30 + $0x40] sm:$0xf]  ;;  %v980_v16 = vrot.slane %v10522_v12, 2  ;;  %v10542_v20 = vpack.c.bf16 %v10525_v13, %v10522_v12 }
  0x1f   : > { %13733 = vst [vmem:[#allocation7_spill] sm:$0xff] %v10531_v15  ;;  %v981_v17 = vrot.slane %v10525_v13, 2  ;;  %v398_v19 = vrot.slane %v10528_v14, 1  ;;  %v395_v21 = vsel %vm392_vm0, %v393_v9, %v394_v10  ;;  %v397_v22 = vsel %vm392_vm0, %v394_v10, %v396_v11  ;;  %v269_v24 = vld [vmem:[%s10510_s30 + $0x28] sm:$0xf]  ;;  %v10553_v27 = vld [vmem:[%s10510_s30 + $0x50] sm:$0xff] }
  0x20   : > { %13734 = vst [vmem:[#allocation8_spill] sm:$0xff] %v10542_v20  ;;  %v983_v23 = vrot.slane %v10531_v15, 2  ;;  %v399_v25 = vrot.slane %v10537_v18, 1  ;;  %v10550_v26 = vld [vmem:[%s10510_s30 + $0x48] sm:$0xff]  ;;  %v505_v28 = vpack.c.bf16 %v397_v22, %v395_v21  ;;  %v401_v30 = vrot.slane %v269_v24, 1  ;;  %v10568_v38 = vld [vmem:[%s10510_s30 + $0x60] sm:$0xff] }
  0x21   : > { %v982_v29 = vsel %vm969_vm2, %v980_v16, %v981_v17  ;;  %v10557_v31 = vld [vmem:[%s10510_s30 + $0x58] sm:$0xf]  ;;  %v985_v36 = vrot.slane %v10550_v26, 2  ;;  %v986_v37 = vrot.slane %v10553_v27, 2  ;;  %v10571_v39 = vld [vmem:[%s10510_s30 + $0x68] sm:$0xff]  ;;  %v403_v45 = vrot.slane %v10522_v12, 1 }
  0x22   : > { %13735 = vst [vmem:[#allocation9_spill] sm:$0xff] %v10557_v31  ;;  %v984_v32 = vsel %vm969_vm2, %v981_v17, %v983_v23  ;;  %v400_v33 = vsel %vm392_vm0, %v398_v19, %v399_v25  ;;  %8565 = vmatprep.mubr.msk.bf16.mxu1 %vm538_vm1, %v505_v28  ;;  %v402_v35 = vsel %vm392_vm0, %v399_v25, %v401_v30  ;;  %v10574_v40 = vld [vmem:[%s10510_s30 + $0x70] sm:$0xf]  ;;  %v988_v42 = vrot.slane %v10557_v31, 2  ;;  %v10593_v52 = vld [vmem:[%s10510_s30 + $0x78] sm:$0xff]  ;;  %v10596_v53 = vld [vmem:[%s10510_s30 + $0x80] sm:$0xff] }
  0x23   : > { %v10562_v34 = vpack.c.bf16 %v984_v32, %v982_v29  ;;  %13737 = vst [vmem:[#allocation11_spill] sm:$0xff] %v10574_v40  ;;  %v10576_v41 = vpack.c.bf16 %v402_v35, %v400_v33  ;;  %v987_v44 = vsel %vm969_vm2, %v985_v36, %v986_v37  ;;  %v404_v46 = vrot.slane %v10525_v13, 1  ;;  %v10604_v58 = vld [vmem:[%s10510_s30 + $0x88] sm:$0xf]  ;;  %v10607_v59 = vld [vmem:[%s10510_s30 + $0x90] sm:$0xff]  ;;  %v10631_v10 = vld [vmem:[%s10510_s30 + $0x98] sm:$0xff] }
  0x24   : > { %v406_v47 = vrot.slane %v10531_v15, 1  ;;  %v989_v48 = vsel %vm969_vm2, %v986_v37, %v988_v42  ;;  %v990_v49 = vrot.slane %v10568_v38, 2  ;;  %v991_v50 = vrot.slane %v10571_v39, 2  ;;  %13740 = vst [vmem:[#allocation14_spill] sm:$0xff] %v10604_v58  ;;  %v10618_v1 = vld [vmem:[%s10510_s30 + $0xa0] sm:$0xf] }
  0x25   : > { %13736 = vst [vmem:[#allocation10_spill] sm:$0xff] %v10562_v34  ;;  %13738 = vst [vmem:[#allocation12_spill] sm:$0xff] %v10576_v41  ;;  %8997 = vmatprep.mubr.msk.bf16.mxu0 %vm538_vm1, %v10562_v34  ;;  %8566 = vmatmul.mubr.msk.bf16.vlgmr.msra.gmra.mrb[0].mxu1 %vm538_vm1, %v10576_v41  ;;  %v993_v51 = vrot.slane %v10574_v40, 2  ;;  %v10598_v54 = vpack.c.bf16 %v989_v48, %v987_v44  ;;  %v405_v55 = vsel %vm392_vm0, %v403_v45, %v404_v46  ;;  %v10649_v24 = vld [vmem:[%s13560_s1 + $0xe0] sm:$0xff]   ;;  %v10657_v32 = vld [vmem:[%s10510_s30 + $0xa8] sm:$0xff]  ;;  %s7461_s10 = sshll.u32 %s13370_s8, 4  ;;  %s13486_s10 = int_to_ptr.vmem [resolvable:$true] %s7461_s10 }
  0x26   : > { %8598 = vmatpush3.bf16.msra.mxu1 %v10279_v4  ;;  %v407_v56 = vsel %vm392_vm0, %v404_v46, %v406_v47  ;;  %v408_v57 = vrot.slane %v10550_v26, 1  ;;  %v992_v62 = vsel %vm969_vm2, %v990_v49, %v991_v50  ;;  %v409_v0 = vrot.slane %v10553_v27, 1  ;;  %13742 = vst [vmem:[#allocation16_spill] sm:$0xff] %v10618_v1  ;;  %v10660_v33 = vld [vmem:[%s10510_s30 + $0xb0] sm:$0xff]  ;;  %v10663_v35 = vld [vmem:[%s10510_s30 + $0xb8] sm:$0xf] }
  0x27   : > { %13739 = vst [vmem:[#allocation13_spill] sm:$0xff] %v10598_v54  ;;  %v10612_v61 = vpack.c.bf16 %v407_v56, %v405_v55  ;;  %v994_v63 = vsel %vm969_vm2, %v991_v50, %v993_v51  ;;  %8998 = vmatmul.mubr.msk.bf16.vlgmr.msra.gmra.mrb[0].mxu0 %vm538_vm1, %v10598_v54  ;;  %v411_v4 = vrot.slane %v10557_v31, 1  ;;  %v995_v8 = vrot.slane %v10593_v52, 2  ;;  %13745 = vst [vmem:[#allocation19_spill] sm:$0xff] %v10663_v35  ;;  %v10682_v56 = vld [vmem:[%s10510_s30 + $0xc0] sm:$0xff]  ;;  %s13518_s14 = scalar_lea.sflag [#allocation3], %s245_s6 }
  0x28   : > { %v10625_v3 = vpack.c.bf16 %v994_v63, %v992_v62  ;;  %v996_v9 = vrot.slane %v10596_v53, 2  ;;  %9030 = vmatpush3.bf16.msra.mxu0 %v10505_v5  ;;  %v410_v11 = vsel %vm392_vm0, %v408_v57, %v409_v0  ;;  %v998_v16 = vrot.slane %v10604_v58, 2  ;;  %8599 = vmatprep.subr.bf16.mxu1 %v10282_v2  ;;  %v10685_v57 = vld [vmem:[%s10510_s30 + $0xc8] sm:$0xff]  ;;  %s10337_s15 = scalar_lea.vmem %s13486_s10, 4096  ;;  %s10401_s16 = smov [#allocation2]  }
  0x29   : > { %13741 = vst [vmem:[#allocation15_spill] sm:$0xff] %v10612_v61  ;;  %8569 = vmatprep.mubr.msk.bf16.mxu1 %vm538_vm1, %v10612_v61  ;;  %v413_v17 = vrot.slane %v10568_v38, 1  ;;  %v414_v19 = vrot.slane %v10571_v39, 1  ;;  %v412_v21 = vsel %vm392_vm0, %v409_v0, %v411_v4  ;;  %v416_v22 = vrot.slane %v10574_v40, 1  ;;  %9031 = vmatprep.subr.bf16.mxu0 %v10281_v60  ;;  %v10699_v4 = vld [vmem:[%s10510_s30 + $0xd8] sm:$0xff]  ;;  %p10338_p11 = scmp.ne.s32.totalorder %s13486_s10, %s10337_s15 }
  0x2a   : > { %13743 = vst [vmem:[#allocation17_spill] sm:$0xff] %v10625_v3  ;;  %9001 = vmatprep.mubr.msk.bf16.mxu0 %vm538_vm1, %v10625_v3  ;;  %v997_v5 = vsel %vm969_vm2, %v995_v8, %v996_v9  ;;  %v1000_v23 = vrot.slane %v10607_v59, 2  ;;  %v10651_v25 = vpack.c.bf16 %v412_v21, %v410_v11  ;;  %v999_v28 = vsel %vm969_vm2, %v996_v9, %v998_v16 }
  0x2b   : > { %v415_v29 = vsel %vm392_vm0, %v413_v17, %v414_v19  ;;  %v1001_v30 = vrot.slane %v10631_v10, 2  ;;  %v10665_v36 = vpack.c.bf16 %v999_v28, %v997_v5  ;;  %v417_v37 = vsel %vm392_vm0, %v414_v19, %v416_v22  ;;  %8600 = vmatpush3.bf16.msra.mxu1 %v10282_v2  ;;  %v10696_v2 = vld [vmem:[%s10510_s30 + $0xd0] sm:$0xf]  ;;  %v10709_v17 = vld [vmem:[%s10510_s30 + $0xe8] sm:$0xf]  ;;  %v10714_v19 = vld [vmem:[%s13560_s1 + $0x20] sm:$0xff]   ;;  %p10339_p12 = pnand %p10338_p11, %p10472_p5 }
  0x2c   : > { %13744 = vst [vmem:[#allocation18_spill] sm:$0xff] %v10651_v25  ;;  %v1003_v42 = vrot.slane %v10618_v1, 2  ;;  %v418_v44 = vrot.slane %v10593_v52, 1  ;;  %v10672_v45 = vpack.c.bf16 %v417_v37, %v415_v29  ;;  %v419_v47 = vrot.slane %v10596_v53, 1  ;;  %9032 = vmatpush3.bf16.msra.mxu0 %v10281_v60  ;;  %13749 = vst [vmem:[#allocation23_spill] sm:$0xff] %v10696_v2  ;;  %v10724_v28 = vld [vmem:[%s10510_s30 + $0xe0] sm:$0xff]  ;;  %8633 = vmatprep.subr.bf16.mxu1 %v10714_v19 }
  0x2d   : > { %13746 = vst [vmem:[#allocation20_spill] sm:$0xff] %v10665_v36  ;;  %8570 = vmatmul.mubr.msk.bf16.gmra.mrb[4].mxu1 %vm538_vm1, %v10651_v25  ;;  %v1002_v46 = vsel %vm969_vm2, %v1000_v23, %v1001_v30  ;;  %v421_v48 = vrot.slane %v10604_v58, 1  ;;  %v1005_v50 = vrot.slane %v10657_v32, 2  ;;  %v1006_v51 = vrot.slane %v10660_v33, 2  ;;  %9065 = vmatprep.subr.bf16.mxu0 %v10649_v24  ;;  %13751 = vst [vmem:[#allocation25_spill] sm:$0xff] %v10714_v19  ;;  %v10865_v19 = vld [vmem:[%s10510_s30 + $0x158] sm:$0xff]  ;;  %p10340_p13 = pneg %p10339_p12 }
  0x2e   : > { %13747 = vst [vmem:[#allocation21_spill] sm:$0xff] %v10672_v45  ;;  %v1004_v49 = vsel %vm969_vm2, %v1001_v30, %v1003_v42  ;;  %v1008_v55 = vrot.slane %v10663_v35, 2  ;;  %8573 = vmatprep.mubr.msk.bf16.mxu1 %vm538_vm1, %v10672_v45  ;;  %v420_v60 = vsel %vm392_vm0, %v418_v44, %v419_v47  ;;  %v423_v0 = vrot.slane %v10607_v59, 1  ;;  %13753 = vst [vmem:[#allocation27_spill] sm:$0xff] %v10724_v28 }
  0x2f   : > { %v10690_v62 = vpack.c.bf16 %v1004_v49, %v1002_v46  ;;  %v422_v63 = vsel %vm392_vm0, %v419_v47, %v421_v48  ;;  %9002 = vmatmul.mubr.msk.bf16.gmra.mrb[4].mxu0 %vm538_vm1, %v10665_v36  ;;  %v1007_v9 = vsel %vm969_vm2, %v1005_v50, %v1006_v51  ;;  %v424_v16 = vrot.slane %v10631_v10, 1 }
  0x30   : > { %v10703_v8 = vpack.c.bf16 %v422_v63, %v420_v60  ;;  %v1009_v11 = vsel %vm969_vm2, %v1006_v51, %v1008_v55  ;;  %v426_v5 = vrot.slane %v10618_v1, 1  ;;  %v1010_v22 = vrot.slane %v10682_v56, 2 }
  0x31   : > { %13748 = vst [vmem:[#allocation22_spill] sm:$0xff] %v10690_v62  ;;  %9005 = vmatprep.mubr.msk.bf16.mxu0 %vm538_vm1, %v10690_v62  ;;  %v10718_v21 = vpack.c.bf16 %v1009_v11, %v1007_v9  ;;  %v1011_v23 = vrot.slane %v10685_v57, 2  ;;  %v425_v29 = vsel %vm392_vm0, %v423_v0, %v424_v16  ;;  %v1013_v30 = vrot.slane %v10696_v2, 2 }
  0x32   : > { %13750 = vst [vmem:[#allocation24_spill] sm:$0xff] %v10703_v8  ;;  %v428_v37 = vrot.slane %v10657_v32, 1  ;;  %v429_v42 = vrot.slane %v10660_v33, 1  ;;  %v427_v44 = vsel %vm392_vm0, %v424_v16, %v426_v5  ;;  %v431_v47 = vrot.slane %v10663_v35, 1  ;;  %v10752_v5 = vld [vmem:[%s10510_s30 + $0xf0] sm:$0xff] }
  0x33   : > { %13752 = vst [vmem:[#allocation26_spill] sm:$0xff] %v10718_v21  ;;  %v1012_v46 = vsel %vm969_vm2, %v1010_v22, %v1011_v23  ;;  %v1015_v48 = vrot.slane %v10699_v4, 2  ;;  %v10735_v49 = vpack.c.bf16 %v427_v44, %v425_v29  ;;  %v1014_v50 = vsel %vm969_vm2, %v1011_v23, %v1013_v30  ;;  %v10758_v30 = vld [vmem:[%s10510_s30 + $0xf8] sm:$0xff] }
  0x34   : > { %v430_v51 = vsel %vm392_vm0, %v428_v37, %v429_v42  ;;  %v1016_v55 = vrot.slane %v10724_v28, 2  ;;  %v10742_v60 = vpack.c.bf16 %v1014_v50, %v1012_v46  ;;  %v432_v63 = vsel %vm392_vm0, %v429_v42, %v431_v47  ;;  %v10768_v47 = vld [vmem:[%s10510_s30 + $0x100] sm:$0xf] }
  0x35   : > { %13754 = vst [vmem:[#allocation28_spill] sm:$0xff] %v10735_v49  ;;  %8574 = vmatmul.mubr.msk.bf16.gmra.mrb[8].mxu1 %vm538_vm1, %v10703_v8  ;;  %v1018_v0 = vrot.slane %v10709_v17, 2  ;;  %v433_v9 = vrot.slane %v10682_v56, 1  ;;  %v434_v11 = vrot.slane %v10685_v57, 1  ;;  %v436_v16 = vrot.slane %v10696_v2, 1 }
  0x36   : > { %13755 = vst [vmem:[#allocation29_spill] sm:$0xff] %v10742_v60  ;;  %8577 = vmatprep.mubr.msk.bf16.mxu1 %vm538_vm1, %v10735_v49  ;;  %v1367_v22 = vrot.slane %v10522_v12, 3  ;;  %v1368_v23 = vrot.slane %v10525_v13, 3  ;;  %v1370_v29 = vrot.slane %v10531_v15, 3  ;;  %v10762_v37 = vpack.c.bf16 %v432_v63, %v430_v51 }
  0x37   : > { %9006 = vmatmul.mubr.msk.bf16.gmra.mrb[8].mxu0 %vm538_vm1, %v10718_v21  ;;  %v1017_v42 = vsel %vm969_vm2, %v1015_v48, %v1016_v55  ;;  %v435_v44 = vsel %vm392_vm0, %v433_v9, %v434_v11  ;;  %v437_v46 = vsel %vm392_vm0, %v434_v11, %v436_v16  ;;  %v1019_v50 = vsel %vm969_vm2, %v1016_v55, %v1018_v0  ;;  %v10810_v21 = vld [vmem:[%s10510_s30 + $0x120] sm:$0xff] }
  0x38   : > { %13756 = vst [vmem:[#allocation30_spill] sm:$0xff] %v10762_v37  ;;  %9009 = vmatprep.mubr.msk.bf16.mxu0 %vm538_vm1, %v10742_v60  ;;  %v10773_v43 = vpack.c.bf16 %v437_v46, %v435_v44  ;;  %v438_v51 = vrot.slane %v10699_v4, 1  ;;  %v439_v48 = vrot.slane %v10724_v28, 1  ;;  %v1369_v63 = vsel %vm1356_vm3, %v1367_v22, %v1368_v23  ;;  %v10786_v44 = vld [vmem:[%s10510_s30 + $0x108] sm:$0xff]  ;;  %v10789_v46 = vld [vmem:[%s10510_s30 + $0x118] sm:$0xf] }
  0x39   : > { %v1371_v9 = vsel %vm1356_vm3, %v1368_v23, %v1370_v29  ;;  %v441_v11 = vrot.slane %v10709_v17, 1  ;;  %v1372_v16 = vrot.slane %v10550_v26, 3  ;;  %v1373_v61 = vrot.slane %v10553_v27, 3  ;;  %v10795_v29 = vld [vmem:[%s10510_s30 + $0x110] sm:$0xff] }
  0x3a   : > { %13757 = vst [vmem:[#allocation31_spill] sm:$0xff] %v10773_v43  ;;  %v443_v41 = vrot.slane %v10752_v5, 1  ;;  %v444_v55 = vrot.slane %v10758_v30, 1  ;;  %v446_v0 = vrot.slane %v10768_v47, 1  ;;  %v10791_v22 = vpack.c.bf16 %v1019_v50, %v1017_v42 }
  0x3b   : > { %v1377_v23 = vrot.slane %v10568_v38, 3  ;;  %v10799_v49 = vpack.c.bf16 %v1371_v9, %v1369_v63  ;;  %v440_v8 = vsel %vm392_vm0, %v438_v51, %v439_v48  ;;  %v442_v45 = vsel %vm392_vm0, %v439_v48, %v441_v11  ;;  %v10818_v11 = vld [vmem:[%s10510_s30 + $0x128] sm:$0xff] }
  0x3c   : > { %13758 = vst [vmem:[#allocation32_spill] sm:$0xff] %v10791_v22  ;;  %v445_v42 = vsel %vm392_vm0, %v443_v41, %v444_v55  ;;  %v447_v50 = vsel %vm392_vm0, %v444_v55, %v446_v0  ;;  %v1378_v25 = vrot.slane %v10571_v39, 3  ;;  %v1380_v60 = vrot.slane %v10574_v40, 3  ;;  %v10821_v41 = vld [vmem:[%s10510_s30 + $0x130] sm:$0xf] }
  0x3d   : > { %8578 = vmatmul.mubr.msk.bf16.gmra.mrb[12].mxu1 %vm538_vm1, %v10762_v37  ;;  %13759 = vst [vmem:[#allocation33_spill] sm:$0xff] %v10799_v49  ;;  %v1374_v9 = vsel %vm1356_vm3, %v1372_v16, %v1373_v61  ;;  %v13760_v51 = vrot.slane %v10557_v31, 3  ;;  %13761 = vst [vmem:[#allocation34_spill] sm:$0xff] %v10821_v41  ;;  %v448_v55 = vrot.slane %v10786_v44, 1  ;;  %v449_v0 = vrot.slane %v10795_v29, 1 }
  0x3e   : > { %8581 = vmatprep.mubr.msk.bf16.mxu1 %vm538_vm1, %v10773_v43  ;;  %v451_v16 = vrot.slane %v10789_v46, 1  ;;  %v1382_v63 = vrot.slane %v10593_v52, 3  ;;  %v1383_v43 = vrot.slane %v10596_v53, 3  ;;  %v1385_v37 = vrot.slane %v10604_v58, 3  ;;  %v10868_v58 = vld [vmem:[%s10510_s30 + $0x160] sm:$0xf] }
  0x3f   : > { %v1376_v48 = vsel %vm1356_vm3, %v1373_v61, %v13760_v51  ;;  %9010 = vmatmul.mubr.msk.bf16.gmra.mrb[12].mxu0 %vm538_vm1, %v10791_v22  ;;  %v10831_v61 = vpack.c.bf16 %v442_v45, %v440_v8  ;;  %v10833_v51 = vpack.c.bf16 %v447_v50, %v445_v42  ;;  %v1379_v22 = vsel %vm1356_vm3, %v1377_v23, %v1378_v25  ;;  %v10845_v45 = vld [vmem:[%s10510_s30 + $0x140] sm:$0xff]  ;;  %v10850_v50 = vld [vmem:[%s10510_s30 + $0x148] sm:$0xf] }
  0x40   : > { %9033 = vmatprep.mubr.msk.bf16.mxu0 %vm538_vm1, %v10799_v49  ;;  %v1381_v62 = vsel %vm1356_vm3, %v1378_v25, %v1380_v60  ;;  %v453_v36 = vrot.slane %v10810_v21, 1  ;;  %v454_v3 = vrot.slane %v10818_v11, 1  ;;  %v10842_v49 = vld [vmem:[%s10510_s30 + $0x138] sm:$0xff]  ;;  %v456_v8 = vrot.slane %v10821_v41, 1  ;;  %v10857_v60 = vld [vmem:[%s10510_s30 + $0x150] sm:$0xff] }
  0x41   : > { %13762 = vst [vmem:[#allocation35_spill] sm:$0xff] %v10831_v61  ;;  %13763 = vst [vmem:[#allocation36_spill] sm:$0xff] %v10833_v51  ;;  %v1387_v42 = vrot.slane %v10607_v59, 3  ;;  %v10852_v54 = vpack.c.bf16 %v1376_v48, %v1374_v9  ;;  %v1388_v23 = vrot.slane %v10631_v10, 3  ;;  %v1390_v25 = vrot.slane %v10618_v1, 3 }
  0x42   : > { %v10861_v34 = vpack.c.bf16 %v1381_v62, %v1379_v22  ;;  %v450_v20 = vsel %vm392_vm0, %v448_v55, %v449_v0  ;;  %v452_v9 = vsel %vm392_vm0, %v449_v0, %v451_v16  ;;  %v1384_v48 = vsel %vm1356_vm3, %v1382_v63, %v1383_v43  ;;  %v10285_v22 = vld [vmem:[%s13560_s1 + $0xe8] sm:$0xff]   ;;  %v10896_v16 = vld [vmem:[%s10510_s30 + $0x178] sm:$0xf] }
  0x43   : > { %13764 = vst [vmem:[#allocation37_spill] sm:$0xff] %v10852_v54  ;;  %v1386_v1 = vsel %vm1356_vm3, %v1383_v43, %v1385_v37  ;;  %v455_v62 = vsel %vm392_vm0, %v453_v36, %v454_v3  ;;  %v457_v55 = vsel %vm392_vm0, %v454_v3, %v456_v8  ;;  %v461_v31 = vrot.slane %v10850_v50, 1  ;;  %v10884_v0 = vld [vmem:[%s10510_s30 + $0x168] sm:$0xff]  ;;  %v10893_v3 = vld [vmem:[%s10510_s30 + $0x170] sm:$0xff] }
  0x44   : > { %13765 = vst [vmem:[#allocation38_spill] sm:$0xff] %v10861_v34  ;;  %v1389_v43 = vsel %vm1356_vm3, %v1387_v42, %v1388_v23  ;;  %v1391_v36 = vsel %vm1356_vm3, %v1388_v23, %v1390_v25  ;;  %v1392_v37 = vrot.slane %v10657_v32, 3  ;;  %v1393_v63 = vrot.slane %v10660_v33, 3  ;;  %v10901_v8 = vld [vmem:[%s13560_s1 + $0xf0] sm:$0xff]  }
  0x45   : > { %8582 = vmatmul.mubr.msk.bf16.gmra.mrb[16].mxu1 %vm538_vm1, %v10831_v61  ;;  %v458_v61 = vrot.slane %v10842_v49, 1  ;;  %13766 = vst [vmem:[#allocation39_spill] sm:$0xff] %v10901_v8  ;;  %v10906_v42 = vpack.c.bf16 %v452_v9, %v450_v20  ;;  %v1395_v23 = vrot.slane %v10663_v35, 3  ;;  %v463_v25 = vrot.slane %v10857_v60, 1 }
  0x46   : > { %8585 = vmatprep.mubr.msk.bf16.mxu1 %vm538_vm1, %v10833_v51  ;;  %v459_v51 = vrot.slane %v10845_v45, 1  ;;  %v464_v40 = vrot.slane %v10865_v19, 1  ;;  %v466_v15 = vrot.slane %v10868_v58, 1  ;;  %v10914_v13 = vpack.c.bf16 %v1386_v1, %v1384_v48 }
  0x47   : > { %9034 = vmatmul.mubr.msk.bf16.vlgmr.msra.gmra.mrb[0].mxu0 %vm538_vm1, %v10852_v54  ;;  %13767 = vst [vmem:[#allocation40_spill] sm:$0xff] %v10906_v42  ;;  %v10910_v54 = vpack.c.bf16 %v457_v55, %v455_v62  ;;  %v10916_v12 = vpack.c.bf16 %v1391_v36, %v1389_v43  ;;  %v1398_v20 = vrot.slane %v10685_v57, 3  ;;  %v1400_v62 = vrot.slane %v10696_v2, 3 }
  0x48   : > { %9066 = vmatpush3.bf16.msra.mxu0 %v10649_v24  ;;  %9037 = vmatprep.mubr.msk.bf16.mxu0 %vm538_vm1, %v10861_v34  ;;  %13769 = vst [vmem:[#allocation42_spill] sm:$0xff] %v10914_v13  ;;  %v1397_v24 = vrot.slane %v10682_v56, 3  ;;  %v460_v9 = vsel %vm392_vm0, %v458_v61, %v459_v51  ;;  %v462_v34 = vsel %vm392_vm0, %v459_v51, %v461_v31  ;;  %v468_v55 = vrot.slane %v10884_v0, 1 }
  0x49   : > { %13768 = vst [vmem:[#allocation41_spill] sm:$0xff] %v10910_v54  ;;  %9067 = vmatprep.subr.bf16.mxu0 %v10285_v22  ;;  %13770 = vst [vmem:[#allocation43_spill] sm:$0xff] %v10916_v12  ;;  %v469_v1 = vrot.slane %v10893_v3, 1  ;;  %v471_v48 = vrot.slane %v10896_v16, 1  ;;  %v1402_v43 = vrot.slane %v10699_v4, 3  ;;  %v1403_v36 = vrot.slane %v10724_v28, 3 }
  0x4a   : > { %v1394_v31 = vsel %vm1356_vm3, %v1392_v37, %v1393_v63  ;;  %v1396_v61 = vsel %vm1356_vm3, %v1393_v63, %v1395_v23  ;;  %v1405_v51 = vrot.slane %v10709_v17, 3  ;;  %v465_v2 = vsel %vm392_vm0, %v463_v25, %v464_v40 }
  0x4b   : > { %v467_v35 = vsel %vm392_vm0, %v464_v40, %v466_v15  ;;  %v1408_v28 = vrot.slane %v10758_v30, 3  ;;  %v1399_v37 = vsel %vm1356_vm3, %v1397_v24, %v1398_v20  ;;  %v1401_v63 = vsel %vm1356_vm3, %v1398_v20, %v1400_v62 }
  0x4c   : > { %9068 = vmatpush3.bf16.msra.mxu0 %v10285_v22  ;;  %v1410_v22 = vrot.slane %v10768_v47, 3  ;;  %v1412_v23 = vrot.slane %v10786_v44, 3  ;;  %v10949_v25 = vpack.c.bf16 %v462_v34, %v460_v9  ;;  %v324_v15 = vpack.c.bf16 %v10516_v7, %v10513_v6 }
  0x4d   : > { %8586 = vmatmul.mubr.msk.bf16.gmra.mrb[20].mxu1 %vm538_vm1, %v10906_v42  ;;  %v1407_v42 = vrot.slane %v10752_v5, 3  ;;  %9101 = vmatprep.subr.bf16.mxu0 %v10901_v8  ;;  %v1415_v40 = vrot.slane %v10789_v46, 3  ;;  %v10955_v8 = vpack.c.bf16 %v467_v35, %v465_v2  ;;  %v1418_v24 = vrot.slane %v10818_v11, 3 }
  0x4e   : > { %8589 = vmatprep.mubr.msk.bf16.mxu1 %vm538_vm1, %v10910_v54  ;;  %v1413_v54 = vrot.slane %v10795_v29, 3  ;;  %13771 = vst [vmem:[#allocation44_spill] sm:$0xff] %v10949_v25  ;;  %v1420_v20 = vrot.slane %v10821_v41, 3  ;;  %v10961_v62 = vpack.c.bf16 %v10553_v27, %v10550_v26  ;;  %v10963_v34 = vpack.c.bf16 %v1396_v61, %v1394_v31 }
  0x4f   : > { %9038 = vmatmul.mubr.msk.bf16.gmra.mrb[4].mxu0 %vm538_vm1, %v10914_v13  ;;  %v1417_v13 = vrot.slane %v10810_v21, 3  ;;  %13772 = vst [vmem:[#allocation45_spill] sm:$0xff] %v10955_v8  ;;  %v10965_v9 = vpack.c.bf16 %v1401_v63, %v1399_v37  ;;  %v470_v6 = vsel %vm392_vm0, %v468_v55, %v469_v1  ;;  %v472_v7 = vsel %vm392_vm0, %v469_v1, %v471_v48 }
  0x50   : > { %9041 = vmatprep.mubr.msk.bf16.mxu0 %vm538_vm1, %v10916_v12  ;;  %13773 = vst [vmem:[#allocation46_spill] sm:$0xff] %v10961_v62  ;;  %13774 = vst [vmem:[#allocation47_spill] sm:$0xff] %v10963_v34  ;;  %v1404_v35 = vsel %vm1356_vm3, %v1402_v43, %v1403_v36  ;;  %v1406_v2 = vsel %vm1356_vm3, %v1403_v36, %v1405_v51  ;;  %v1409_v12 = vsel %vm1356_vm3, %v1407_v42, %v1408_v28 }
  0x51   : > { %13775 = vst [vmem:[#allocation48_spill] sm:$0xff] %v10965_v9  ;;  %v10974_v41 = vpack.c.bf16 %v10571_v39, %v10568_v38  ;;  %v1411_v31 = vsel %vm1356_vm3, %v1408_v28, %v1410_v22  ;;  %v1414_v61 = vsel %vm1356_vm3, %v1412_v23, %v1413_v54  ;;  %v1416_v55 = vsel %vm1356_vm3, %v1413_v54, %v1415_v40 }
  0x52   : > { %v10983_v1 = vpack.c.bf16 %v10596_v53, %v10593_v52  ;;  %v1419_v42 = vsel %vm1356_vm3, %v1417_v13, %v1418_v24  ;;  %v1421_v48 = vsel %vm1356_vm3, %v1418_v24, %v1420_v20  ;;  %v1422_v43 = vrot.slane %v10842_v49, 3 }
  0x53   : > { %13776 = vst [vmem:[#allocation49_spill] sm:$0xff] %v10974_v41  ;;  %v1423_v28 = vrot.slane %v10845_v45, 3  ;;  %v10991_v36 = vpack.c.bf16 %v472_v7, %v470_v6  ;;  %v1425_v54 = vrot.slane %v10850_v50, 3  ;;  %v1427_v51 = vrot.slane %v10857_v60, 3  ;;  %v11018_v6 = vld [vmem:[%s10510_s30 + $0x180] sm:$0xff] }
  0x54   : > { %v10997_v22 = vpack.c.bf16 %v10631_v10, %v10607_v59  ;;  %v11001_v13 = vpack.c.bf16 %v1406_v2, %v1404_v35  ;;  %v11005_v37 = vpack.c.bf16 %v10537_v18, %v10528_v14  ;;  %v1428_v63 = vrot.slane %v10865_v19, 3  ;;  %13783 = vst [vmem:[#allocation56_spill] sm:$0xff] %v11018_v6  ;;  %v13787_v35 = vld [vmem:[#allocation27_spill] sm:$0xff] }
  0x55   : > { %8590 = vmatmul.mubr.msk.bf16.gmra.mrb[24].mxu1 %vm538_vm1, %v10949_v25  ;;  %13777 = vst [vmem:[#allocation50_spill] sm:$0xff] %v10991_v36  ;;  %v1430_v23 = vrot.slane %v10868_v58, 3  ;;  %v11011_v40 = vpack.c.bf16 %v1411_v31, %v1409_v12  ;;  %v11013_v24 = vpack.c.bf16 %v1416_v55, %v1414_v61  ;;  %v11015_v20 = vpack.c.bf16 %v1421_v48, %v1419_v42  ;;  %v13784_v31 = vld [vmem:[#allocation5_spill] sm:$0xff]  ;;  %v13785_v55 = vld [vmem:[#allocation6_spill] sm:$0xff]  ;;  %v13786_v48 = vld [vmem:[#allocation7_spill] sm:$0xff] }
  0x56   : > { %8593 = vmatprep.mubr.msk.bf16.mxu1 %vm538_vm1, %v10955_v8  ;;  %13778 = vst [vmem:[#allocation51_spill] sm:$0xff] %v11001_v13  ;;  %13779 = vst [vmem:[#allocation52_spill] sm:$0xff] %v11005_v37  ;;  %v11022_v7 = vpack.c.bf16 %v10660_v33, %v10657_v32  ;;  %v11025_v14 = vsel %vm1356_vm3, %v1422_v43, %v1423_v28  ;;  %v11031_v12 = vpack.c.bf16 %v10685_v57, %v10682_v56  ;;  %v13789_v2 = vld [vmem:[#allocation11_spill] sm:$0xff] }
  0x57   : > { %9042 = vmatmul.mubr.msk.bf16.gmra.mrb[8].mxu0 %vm538_vm1, %v10963_v34  ;;  %13780 = vst [vmem:[#allocation53_spill] sm:$0xff] %v11011_v40  ;;  %13781 = vst [vmem:[#allocation54_spill] sm:$0xff] %v11013_v24  ;;  %v1754_v61 = vrot.slane %v13784_v31, 4  ;;  %v1755_v42 = vrot.slane %v13785_v55, 4  ;;  %v1757_v8 = vrot.slane %v13786_v48, 4  ;;  %v11038_v25 = vsel %vm1356_vm3, %v1423_v28, %v1425_v54 }
  0x58   : > { %9045 = vmatprep.mubr.msk.bf16.mxu0 %vm538_vm1, %v10965_v9  ;;  %13782 = vst [vmem:[#allocation55_spill] sm:$0xff] %v11015_v20  ;;  %v11041_v43 = vsel %vm1356_vm3, %v1427_v51, %v1428_v63  ;;  %v11044_v18 = vsel %vm1356_vm3, %v1428_v63, %v1430_v23  ;;  %v11048_v9 = vpack.c.bf16 %v13787_v35, %v10699_v4  ;;  %v1759_v54 = vrot.slane %v10550_v26, 4 }
  0x59   : > { %v1756_v55 = vsel %vm1743_vm4, %v1754_v61, %v1755_v42  ;;  %v1758_v28 = vsel %vm1743_vm4, %v1755_v42, %v1757_v8  ;;  %v1760_v63 = vrot.slane %v10553_v27, 4  ;;  %v11062_v23 = vpack.c.bf16 %v10758_v30, %v10752_v5 }
  0x5a   : > { %v11057_v51 = vpack.c.bf16 %v1758_v28, %v1756_v55  ;;  %v1764_v48 = vrot.slane %v10568_v38, 4  ;;  %v1765_v31 = vrot.slane %v10571_v39, 4  ;;  %v1767_v61 = vrot.slane %v13789_v2, 4  ;;  %v13792_v39 = vld [vmem:[#allocation14_spill] sm:$0xff] }
  0x5b   : > { %v11069_v8 = vpack.c.bf16 %v10795_v29, %v10786_v44  ;;  %v1769_v26 = vrot.slane %v10593_v52, 4  ;;  %v1761_v27 = vsel %vm1743_vm4, %v1759_v54, %v1760_v63  ;;  %v1770_v38 = vrot.slane %v10596_v53, 4 }
  0x5c   : > { %13788 = vst [vmem:[#allocation5_spill] sm:$0xff] %v11057_v51  ;;  %v1772_v28 = vrot.slane %v13792_v39, 4  ;;  %v1766_v52 = vsel %vm1743_vm4, %v1764_v48, %v1765_v31  ;;  %v11088_v54 = vpack.c.bf16 %v10818_v11, %v10810_v21  ;;  %v13798_v39 = vld [vmem:[#allocation19_spill] sm:$0xff] }
  0x5d   : > { %8594 = vmatmul.mubr.msk.bf16.gmra.mrb[28].mxu1 %vm538_vm1, %v10991_v36  ;;  %v1768_v36 = vsel %vm1743_vm4, %v1765_v31, %v1767_v61  ;;  %v1771_v53 = vsel %vm1743_vm4, %v1769_v26, %v1770_v38  ;;  %v1775_v31 = vrot.slane %v10631_v10, 4  ;;  %v13796_v61 = vld [vmem:[#allocation16_spill] sm:$0xff]  ;;  %v1779_v26 = vrot.slane %v10657_v32, 4  ;;  %v11116_v10 = vld [vmem:[%s10510_s30 + $0x188] sm:$0xff] }
  0x5e   : > { %8601 = vmatprep.mubr.msk.bf16.mxu1 %vm538_vm1, %v324_v15  ;;  %v13790_v15 = vld [vmem:[#allocation9_spill] sm:$0xff]  ;;  %13793 = vst [vmem:[#allocation6_spill] sm:$0xff] %v11088_v54  ;;  %13800 = vst [vmem:[#allocation14_spill] sm:$0xff] %v11116_v10  ;;  %v1784_v32 = vrot.slane %v10682_v56, 4 }
  0x5f   : > { %9046 = vmatmul.mubr.msk.bf16.gmra.mrb[12].mxu0 %vm538_vm1, %v11001_v13  ;;  %v13791_v42 = vrot.slane %v13790_v15, 4  ;;  %v11090_v15 = vpack.c.bf16 %v1768_v36, %v1766_v52  ;;  %v11104_v36 = vpack.c.bf16 %v10845_v45, %v10842_v49  ;;  %v13804_v13 = vld [vmem:[#allocation23_spill] sm:$0xff] }
  0x60   : > { %9049 = vmatprep.mubr.msk.bf16.mxu0 %vm538_vm1, %v11011_v40 }
  0x61   : > { %v1763_v55 = vsel %vm1743_vm4, %v1760_v63, %v13791_v42  ;;  %13794 = vst [vmem:[#allocation7_spill] sm:$0xff] %v11090_v15  ;;  %v1773_v63 = vsel %vm1743_vm4, %v1770_v38, %v1772_v28  ;;  %v1774_v42 = vrot.slane %v10607_v59, 4  ;;  %13797 = vst [vmem:[#allocation11_spill] sm:$0xff] %v11104_v36  ;;  %v1780_v38 = vrot.slane %v10660_v33, 4 }
  0x62   : > { %v11082_v2 = vpack.c.bf16 %v1763_v55, %v1761_v27  ;;  %v10286_v27 = vld [vmem:[%s13560_s1 + $0x28] sm:$0xff]   ;;  %v11098_v48 = vpack.c.bf16 %v1773_v63, %v1771_v53  ;;  %v1777_v55 = vrot.slane %v13796_v61, 4  ;;  %v1782_v59 = vrot.slane %v13798_v39, 4  ;;  %v13801_v63 = vld [vmem:[#allocation25_spill] sm:$0xff]  ;;  %v13802_v61 = vld [vmem:[#allocation8_spill] sm:$0xff] }
  0x63   : > { %v11111_v28 = vpack.c.bf16 %v10865_v19, %v10857_v60  ;;  %v1776_v52 = vsel %vm1743_vm4, %v1774_v42, %v1775_v31  ;;  %v1785_v33 = vrot.slane %v10685_v57, 4  ;;  %v1787_v42 = vrot.slane %v13804_v13, 4  ;;  %v11146_v13 = vld [vmem:[%s10510_s30 + $0x190] sm:$0xf] }
  0x64   : > { %13795 = vst [vmem:[#allocation27_spill] sm:$0xff] %v11098_v48  ;;  %v1778_v53 = vsel %vm1743_vm4, %v1775_v31, %v1777_v55  ;;  %v1783_v40 = vsel %vm1743_vm4, %v1780_v38, %v1782_v59  ;;  %v11135_v57 = vpack.c.bf16 %v10893_v3, %v10884_v0  ;;  %v1789_v55 = vrot.slane %v10699_v4, 4  ;;  %13807 = vst [vmem:[#allocation23_spill] sm:$0xff] %v11146_v13 }
  0x65   : > { %13799 = vst [vmem:[#allocation9_spill] sm:$0xff] %v11111_v28  ;;  %8602 = vmatmul.mubr.msk.bf16.vlgmr.msra.gmra.mrb[0].mxu1 %vm538_vm1, %v11005_v37  ;;  %v11125_v39 = vpack.c.bf16 %v1778_v53, %v1776_v52  ;;  %v1781_v37 = vsel %vm1743_vm4, %v1779_v26, %v1780_v38  ;;  %v1786_v56 = vsel %vm1743_vm4, %v1784_v32, %v1785_v33  ;;  %v11141_v26 = vld [vmem:[%s13560_s1 + $0x30] sm:$0xff]   ;;  %v1790_v38 = vrot.slane %v13787_v35, 4  ;;  %v11163_v53 = vld [vmem:[%s10510_s30 + $0x198] sm:$0xff] }
  0x66   : > { %8634 = vmatpush3.bf16.msra.mxu1 %v13801_v63  ;;  %8605 = vmatprep.mubr.msk.bf16.mxu1 %vm538_vm1, %v13802_v61  ;;  %v11130_v31 = vpack.c.bf16 %v1783_v40, %v1781_v37  ;;  %13806 = vst [vmem:[#allocation25_spill] sm:$0xff] %v11135_v57  ;;  %v2790_v37 = vrot.slane %v11116_v10, 3  ;;  %v1788_v40 = vsel %vm1743_vm4, %v1785_v33, %v1787_v42  ;;  %v1792_v59 = vrot.slane %v10709_v17, 4 }
  0x67   : > { %13803 = vst [vmem:[#allocation16_spill] sm:$0xff] %v11125_v39  ;;  %8635 = vmatprep.subr.bf16.mxu1 %v10286_v27  ;;  %9050 = vmatmul.mubr.msk.bf16.gmra.mrb[16].mxu0 %vm538_vm1, %v11013_v24  ;;  %v11156_v4 = vpack.c.bf16 %v11038_v25, %v11025_v14  ;;  %v11160_v52 = vpack.c.bf16 %v11044_v18, %v11041_v43  ;;  %13810 = vst [vmem:[#allocation59_spill] sm:$0xff] %v11163_v53  ;;  %v1794_v35 = vrot.slane %v10752_v5, 4 }
  0x68   : > { %13805 = vst [vmem:[#allocation19_spill] sm:$0xff] %v11130_v31  ;;  %9053 = vmatprep.mubr.msk.bf16.mxu0 %vm538_vm1, %v11015_v20  ;;  %v11165_v32 = vpack.c.bf16 %v1788_v40, %v1786_v56  ;;  %v1791_v17 = vsel %vm1743_vm4, %v1789_v55, %v1790_v38  ;;  %v1793_v33 = vsel %vm1743_vm4, %v1790_v38, %v1792_v59  ;;  %v1795_v63 = vrot.slane %v10758_v30, 4  ;;  %v11184_v40 = vld [vmem:[%s10510_s30 + $0x1a0] sm:$0xff]  ;;  %v11187_v38 = vld [vmem:[%s10510_s30 + $0x1a8] sm:$0xf] }
  0x69   : > { %13808 = vst [vmem:[#allocation57_spill] sm:$0xff] %v11156_v4  ;;  %13809 = vst [vmem:[#allocation58_spill] sm:$0xff] %v11160_v52  ;;  %v1797_v25 = vrot.slane %v10768_v47, 4  ;;  %v13812_v14 = vrot.slane %v10893_v3, 3  ;;  %v13813_v18 = vrot.slane %v10884_v0, 3  ;;  %v13814_v42 = vrot.slane %v10896_v16, 3 }
  0x6a   : > { %13811 = vst [vmem:[#allocation60_spill] sm:$0xff] %v11165_v32  ;;  %8636 = vmatpush3.bf16.msra.mxu1 %v10286_v27  ;;  %v2792_v55 = vrot.slane %v11146_v13, 3  ;;  %13816 = vst [vmem:[#allocation61_spill] sm:$0xff] %v11184_v40  ;;  %v11189_v59 = vpack.c.bf16 %v1793_v33, %v1791_v17  ;;  %v13818_v61 = vrot.slane %v11018_v6, 3  ;;  %v1796_v20 = vsel %vm1743_vm4, %v1794_v35, %v1795_v63 }
  0x6b   : > { %v1434_v43 = vsel %vm1356_vm3, %v13813_v18, %v13812_v14  ;;  %v13815_v56 = vmov %v13812_v14  ;;  %13817 = vst [vmem:[#allocation62_spill] sm:$0xff] %v11187_v38  ;;  %8669 = vmatprep.subr.bf16.mxu1 %v11141_v26  ;;  %v3890_v18 = vrot.slane %v11163_v53, 3  ;;  %v1799_v17 = vrot.slane %v10786_v44, 4 }
  0x6c   : > { %v1436_v27 = vsel %vm1356_vm3, %v13815_v56, %v13814_v42  ;;  %v2791_v14 = vsel %vm1356_vm3, %v13818_v61, %v2790_v37  ;;  %v1798_v42 = vsel %vm1743_vm4, %v1795_v63, %v1797_v25  ;;  %v1800_v33 = vrot.slane %v10795_v29, 4 }
  0x6d   : > { %8606 = vmatmul.mubr.msk.bf16.gmra.mrb[4].mxu1 %vm538_vm1, %v10961_v62  ;;  %v11200_v56 = vpack.c.bf16 %v1798_v42, %v1796_v20  ;;  %v1802_v24 = vrot.slane %v10789_v46, 4  ;;  %v3891_v61 = vrot.slane %v11184_v40, 3  ;;  %v3893_v35 = vrot.slane %v11187_v38, 3  ;;  %v13819_v62 = vld [vmem:[#allocation34_spill] sm:$0xff] }
  0x6e   : > { %8609 = vmatprep.mubr.msk.bf16.mxu1 %vm538_vm1, %v10974_v41  ;;  %v1804_v63 = vrot.slane %v10810_v21, 4  ;;  %v1805_v25 = vrot.slane %v10818_v11, 4  ;;  %v2793_v20 = vsel %vm1356_vm3, %v2790_v37, %v2792_v55  ;;  %v1801_v42 = vsel %vm1743_vm4, %v1799_v17, %v1800_v33 }
  0x6f   : > { %v1803_v34 = vsel %vm1743_vm4, %v1800_v33, %v1802_v24  ;;  %v1807_v53 = vrot.slane %v13819_v62, 4  ;;  %9054 = vmatmul.mubr.msk.bf16.gmra.mrb[20].mxu0 %vm538_vm1, %v11156_v4  ;;  %v1809_v38 = vrot.slane %v10842_v49, 4  ;;  %v1810_v13 = vrot.slane %v10845_v45, 4 }
  0x70   : > { %v11217_v41 = vpack.c.bf16 %v1803_v34, %v1801_v42  ;;  %v1806_v40 = vsel %vm1743_vm4, %v1804_v63, %v1805_v25  ;;  %9057 = vmatprep.mubr.msk.bf16.mxu0 %vm538_vm1, %v11160_v52  ;;  %v1812_v24 = vrot.slane %v10850_v50, 4  ;;  %v1814_v55 = vrot.slane %v10857_v60, 4 }
  0x71   : > { %v1808_v37 = vsel %vm1743_vm4, %v1805_v25, %v1807_v53  ;;  %v1815_v17 = vrot.slane %v10865_v19, 4  ;;  %v1811_v34 = vsel %vm1743_vm4, %v1809_v38, %v1810_v13  ;;  %v1817_v63 = vrot.slane %v10868_v58, 4 }
  0x72   : > { %v11228_v33 = vpack.c.bf16 %v1808_v37, %v1806_v40  ;;  %v1819_v42 = vrot.slane %v10884_v0, 4  ;;  %v1813_v4 = vsel %vm1743_vm4, %v1810_v13, %v1812_v24  ;;  %v1820_v53 = vrot.slane %v10893_v3, 4 }
  0x73   : > { %v1816_v52 = vsel %vm1743_vm4, %v1814_v55, %v1815_v17  ;;  %v1822_v25 = vrot.slane %v10896_v16, 4  ;;  %v11237_v10 = vpack.c.bf16 %v1436_v27, %v1434_v43  ;;  %v11239_v6 = vpack.c.bf16 %v1813_v4, %v1811_v34 }
  0x74   : > { %13820 = vst [vmem:[#allocation34_spill] sm:$0xff] %v11228_v33  ;;  %v1818_v40 = vsel %vm1743_vm4, %v1815_v17, %v1817_v63  ;;  %v11244_v38 = vpack.c.bf16 %v2793_v20, %v2791_v14  ;;  %v1821_v13 = vsel %vm1743_vm4, %v1819_v42, %v1820_v53  ;;  %v3892_v4 = vsel %vm1356_vm3, %v3890_v18, %v3891_v61 }
  0x75   : > { %13821 = vst [vmem:[#allocation63_spill] sm:$0xff] %v11237_v10  ;;  %13822 = vst [vmem:[#allocation64_spill] sm:$0xff] %v11239_v6  ;;  %8610 = vmatmul.mubr.msk.bf16.gmra.mrb[8].mxu1 %vm538_vm1, %v10983_v1  ;;  %v11246_v37 = vpack.c.bf16 %v1818_v40, %v1816_v52  ;;  %v1823_v24 = vsel %vm1743_vm4, %v1820_v53, %v1822_v25  ;;  %v3894_v27 = vsel %vm1356_vm3, %v3891_v61, %v3893_v35 }
  0x76   : > { %13823 = vst [vmem:[#allocation65_spill] sm:$0xff] %v11244_v38  ;;  %8613 = vmatprep.mubr.msk.bf16.mxu1 %vm538_vm1, %v10997_v22  ;;  %v11252_v43 = vpack.c.bf16 %v1823_v24, %v1821_v13  ;;  %v1020_v55 = vrot.slane %v10752_v5, 2  ;;  %v1021_v14 = vrot.slane %v10758_v30, 2  ;;  %v1023_v52 = vrot.slane %v10768_v47, 2 }
  0x77   : > { %13824 = vst [vmem:[#allocation66_spill] sm:$0xff] %v11246_v37  ;;  %9058 = vmatmul.mubr.msk.bf16.gmra.mrb[24].mxu0 %vm538_vm1, %v11237_v10  ;;  %v1025_v20 = vrot.slane %v10786_v44, 2  ;;  %v1026_v18 = vrot.slane %v10795_v29, 2  ;;  %v1028_v61 = vrot.slane %v10789_v46, 2  ;;  %v11267_v35 = vpack.c.bf16 %v3894_v27, %v3892_v4 }
  0x78   : > { %13825 = vst [vmem:[#allocation67_spill] sm:$0xff] %v11252_v43  ;;  %9061 = vmatprep.mubr.msk.bf16.mxu0 %vm538_vm1, %v11244_v38  ;;  %v1022_v17 = vsel %vm969_vm2, %v1020_v55, %v1021_v14  ;;  %v1024_v5 = vsel %vm969_vm2, %v1021_v14, %v1023_v52  ;;  %v1030_v30 = vrot.slane %v10810_v21, 2  ;;  %v1031_v34 = vrot.slane %v10818_v11, 2  ;;  %v13827_v52 = vld [vmem:[#allocation39_spill] sm:$0xff] }
  0x79   : > { %13826 = vst [vmem:[#allocation68_spill] sm:$0xff] %v11267_v35  ;;  %v11272_v47 = vpack.c.bf16 %v1024_v5, %v1022_v17  ;;  %v1027_v44 = vsel %vm969_vm2, %v1025_v20, %v1026_v18  ;;  %v1029_v63 = vsel %vm969_vm2, %v1026_v18, %v1028_v61  ;;  %v1033_v42 = vrot.slane %v13819_v62, 2  ;;  %v11327_v20 = vld [vmem:[%s13560_s1 + $0x100] sm:$0xff]   ;;  %v11343_v61 = vld [vmem:[%s10510_s30 + $0x8] sm:$0xff] }
  0x7a   : > { %v11277_v53 = vpack.c.bf16 %v1029_v63, %v1027_v44  ;;  %v1032_v46 = vsel %vm969_vm2, %v1030_v30, %v1031_v34  ;;  %v1035_v29 = vrot.slane %v10842_v49, 2  ;;  %v1036_v25 = vrot.slane %v10845_v45, 2  ;;  %v11339_v17 = vld [vmem:[%s10510_s30] sm:$0xff]  ;;  %v11347_v30 = vld [vmem:[%s10510_s30 + $0x10] sm:$0xf] }
  0x7b   : > { %v1034_v21 = vsel %vm969_vm2, %v1031_v34, %v1033_v42  ;;  %v1038_v11 = vrot.slane %v10850_v50, 2  ;;  %v1040_v40 = vrot.slane %v10857_v60, 2  ;;  %v1041_v13 = vrot.slane %v10865_v19, 2  ;;  %v11361_v42 = vld [vmem:[%s10510_s30 + $0x28] sm:$0xf] }
  0x7c   : > { %v11290_v62 = vpack.c.bf16 %v1034_v21, %v1032_v46  ;;  %v1037_v49 = vsel %vm969_vm2, %v1035_v29, %v1036_v25  ;;  %v1043_v45 = vrot.slane %v10868_v58, 2  ;;  %v1045_v24 = vrot.slane %v10884_v0, 2 }
  0x7d   : > { %8614 = vmatmul.mubr.msk.bf16.gmra.mrb[12].mxu1 %vm538_vm1, %v11022_v7  ;;  %v1039_v4 = vsel %vm969_vm2, %v1036_v25, %v1038_v11  ;;  %v1042_v27 = vsel %vm969_vm2, %v1040_v40, %v1041_v13  ;;  %v1046_v50 = vrot.slane %v10893_v3, 2  ;;  %v1048_v60 = vrot.slane %v10896_v16, 2  ;;  %v10289_v16 = vld [vmem:[%s13560_s1 + $0xf8] sm:$0xff]   ;;  %v11369_v11 = vld [vmem:[%s10510_s30 + $0x20] sm:$0xff] }
  0x7e   : > { %8617 = vmatprep.mubr.msk.bf16.mxu1 %vm538_vm1, %v11031_v12  ;;  %v11301_v19 = vpack.c.bf16 %v1039_v4, %v1037_v49  ;;  %v1044_v55 = vsel %vm969_vm2, %v1041_v13, %v1043_v45  ;;  %v970_v18 = vrot.slane %v11339_v17, 2  ;;  %v971_v5 = vrot.slane %v11343_v61, 2  ;;  %v11365_v25 = vld [vmem:[%s10510_s30 + $0x18] sm:$0xff]  ;;  %v13829_v4 = vld [vmem:[#allocation10_spill] sm:$0xff] }
  0x7f   : > { %9062 = vmatmul.mubr.msk.bf16.gmra.mrb[28].mxu0 %vm538_vm1, %v11267_v35  ;;  %v11306_v58 = vpack.c.bf16 %v1044_v55, %v1042_v27  ;;  %v1047_v0 = vsel %vm969_vm2, %v1045_v24, %v1046_v50  ;;  %v1049_v14 = vsel %vm969_vm2, %v1046_v50, %v1048_v60  ;;  %v973_v34 = vrot.slane %v11347_v30, 2  ;;  %v10290_v24 = vld [vmem:[%s13560_s1 + $0x38] sm:$0xff]   ;;  %v11394_v27 = vld [vmem:[%s13560_s1 + $0x40] sm:$0xff]  }
  0x80   : > { %9069 = vmatprep.mubr.msk.bf16.mxu0 %vm538_vm1, %v11057_v51  ;;  %v11310_v3 = vpack.c.bf16 %v1049_v14, %v1047_v0  ;;  %v972_v44 = vsel %vm969_vm2, %v970_v18, %v971_v5  ;;  %v978_v46 = vrot.slane %v11361_v42, 2  ;;  %v975_v21 = vrot.slane %v11365_v25, 2  ;;  %v13830_v50 = vld [vmem:[#allocation13_spill] sm:$0xff]  ;;  %v13832_v60 = vld [vmem:[#allocation56_spill] sm:$0xff]  ;;  %v13833_v0 = vld [vmem:[#allocation14_spill] sm:$0xff] }
  0x81   : > { %v974_v63 = vsel %vm969_vm2, %v971_v5, %v973_v34  ;;  %v976_v40 = vrot.slane %v11369_v11, 2  ;;  %v3010_v55 = vrot.slane %v13832_v60, 4  ;;  %v3011_v14 = vrot.slane %v13833_v0, 4  ;;  %v13835_v34 = vld [vmem:[#allocation20_spill] sm:$0xff] }
  0x82   : > { %v1082_v29 = vpack.c.bf16 %v974_v63, %v972_v44  ;;  %v13837_v63 = vld [vmem:[#allocation59_spill] sm:$0xff]  ;;  %v1362_v35 = vrot.slane %v11365_v25, 3  ;;  %v1363_v38 = vrot.slane %v11369_v11, 3 }
  0x83   : > { %v977_v13 = vsel %vm969_vm2, %v975_v21, %v976_v40  ;;  %v979_v49 = vsel %vm969_vm2, %v976_v40, %v978_v46  ;;  %v3012_v18 = vsel %vm1743_vm4, %v3010_v55, %v3011_v14  ;;  %v4111_v46 = vrot.slane %v13837_v63, 4  ;;  %v13839_v40 = vld [vmem:[#allocation62_spill] sm:$0xff] }
  0x84   : > { %v11381_v45 = vpack.c.bf16 %v979_v49, %v977_v13  ;;  %v4114_v13 = vrot.slane %v13839_v40, 4  ;;  %v13840_v49 = vld [vmem:[#allocation22_spill] sm:$0xff] }
  0x85   : > { %8618 = vmatmul.mubr.msk.bf16.gmra.mrb[16].mxu1 %vm538_vm1, %v11048_v9 }
  0x86   : > { %8621 = vmatprep.mubr.msk.bf16.mxu1 %vm538_vm1, %v11062_v23  ;;  %13828 = vst [vmem:[#allocation39_spill] sm:$0xff] %v11381_v45 }
  0x87   : > { %9070 = vmatmul.mubr.msk.bf16.vlgmr.msra.gmra.mrb[0].mxu0 %vm538_vm1, %v11082_v2 }
  0x88   : > { %9102 = vmatpush3.bf16.msra.mxu0 %v13827_v52  ;;  %9073 = vmatprep.mubr.msk.bf16.mxu0 %vm538_vm1, %v11090_v15 }
  0x89   : > { %9103 = vmatprep.subr.bf16.mxu0 %v10289_v16 }
  0x8c   : > { %9104 = vmatpush3.bf16.msra.mxu0 %v10289_v16  ;;  %v13834_v16 = vld [vmem:[#allocation23_spill] sm:$0xff] }
  0x8d   : > { %8622 = vmatmul.mubr.msk.bf16.gmra.mrb[20].mxu1 %vm538_vm1, %v11069_v8  ;;  %9137 = vmatprep.subr.bf16.mxu0 %v11327_v20  ;;  %v3013_v52 = vrot.slane %v13834_v16, 4 }
  0x8e   : > { %8625 = vmatprep.mubr.msk.bf16.mxu1 %vm538_vm1, %v11088_v54 }
  0x8f   : > { %9074 = vmatmul.mubr.msk.bf16.gmra.mrb[4].mxu0 %vm538_vm1, %v11098_v48  ;;  %v3014_v5 = vsel %vm1743_vm4, %v3011_v14, %v3013_v52  ;;  %v13842_v52 = vld [vmem:[#allocation26_spill] sm:$0xff] }
  0x90   : > { %9077 = vmatprep.mubr.msk.bf16.mxu0 %vm538_vm1, %v11125_v39  ;;  %v11416_v44 = vpack.c.bf16 %v3014_v5, %v3012_v18  ;;  %v13843_v18 = vld [vmem:[#allocation29_spill] sm:$0xff]  ;;  %v13844_v5 = vld [vmem:[#allocation46_spill] sm:$0xff] }
  0x92   : > { %13836 = vst [vmem:[#allocation13_spill] sm:$0xff] %v11416_v44 }
  0x95   : > { %8626 = vmatmul.mubr.msk.bf16.gmra.mrb[24].mxu1 %vm538_vm1, %v11104_v36 }
  0x96   : > { %8629 = vmatprep.mubr.msk.bf16.mxu1 %vm538_vm1, %v11111_v28 }
  0x97   : > { %9078 = vmatmul.mubr.msk.bf16.gmra.mrb[8].mxu0 %vm538_vm1, %v11130_v31 }
  0x98   : > { %9081 = vmatprep.mubr.msk.bf16.mxu0 %vm538_vm1, %v11165_v32 }
  0x9d   : > { %8630 = vmatmul.mubr.msk.bf16.gmra.mrb[28].mxu1 %vm538_vm1, %v11135_v57 }
  0x9e   : > { %8637 = vmatprep.mubr.msk.bf16.mxu1 %vm538_vm1, %v1082_v29  ;;  %v13838_v29 = vld [vmem:[#allocation61_spill] sm:$0xff] }
  0x9f   : > { %9082 = vmatmul.mubr.msk.bf16.gmra.mrb[12].mxu0 %vm538_vm1, %v11189_v59  ;;  %v4112_v21 = vrot.slane %v13838_v29, 4 }
  0xa0   : > { %9085 = vmatprep.mubr.msk.bf16.mxu0 %vm538_vm1, %v11200_v56 }
  0xa1   : > { %v4115_v55 = vsel %vm1743_vm4, %v4112_v21, %v4114_v13  ;;  %v10295_v13 = vld [vmem:[%s13560_s1 + $0x110] sm:$0xff]  }
  0xa5   : > { %8638 = vmatmul.mubr.msk.bf16.vlgmr.msra.gmra.mrb[0].mxu1 %vm538_vm1, %v11381_v45 }
  0xa6   : > { %8670 = vmatpush3.bf16.msra.mxu1 %v11141_v26  ;;  %8641 = vmatprep.mubr.msk.bf16.mxu1 %vm538_vm1, %v13829_v4  ;;  %v13831_v26 = vld [vmem:[#allocation17_spill] sm:$0xff]  ;;  %v13845_v4 = vld [vmem:[#allocation32_spill] sm:$0xff] }
  0xa7   : > { %8671 = vmatprep.subr.bf16.mxu1 %v10290_v24  ;;  %9086 = vmatmul.mubr.msk.bf16.gmra.mrb[16].mxu0 %vm538_vm1, %v11217_v41 }
  0xa8   : > { %9089 = vmatprep.mubr.msk.bf16.mxu0 %vm538_vm1, %v11228_v33 }
  0xaa   : > { %8672 = vmatpush3.bf16.msra.mxu1 %v10290_v24  ;;  %v4113_v24 = vsel %vm1743_vm4, %v4111_v46, %v4112_v21  ;;  %v10293_v46 = vld [vmem:[%s13560_s1 + $0x108] sm:$0xff]   ;;  %v13846_v21 = vld [vmem:[#allocation49_spill] sm:$0xff] }
  0xab   : > { %8705 = vmatprep.subr.bf16.mxu1 %v11394_v27  ;;  %v11429_v14 = vpack.c.bf16 %v4115_v55, %v4113_v24  ;;  %v1358_v24 = vrot.slane %v11343_v61, 3  ;;  %v1360_v55 = vrot.slane %v11347_v30, 3 }
  0xad   : > { %8642 = vmatmul.mubr.msk.bf16.gmra.mrb[4].mxu1 %vm538_vm1, %v13830_v50  ;;  %13841 = vst [vmem:[#allocation17_spill] sm:$0xff] %v11429_v14 }
  0xae   : > { %8645 = vmatprep.mubr.msk.bf16.mxu1 %vm538_vm1, %v13831_v26 }
  0xaf   : > { %9090 = vmatmul.mubr.msk.bf16.gmra.mrb[20].mxu0 %vm538_vm1, %v11239_v6 }
  0xb0   : > { %9093 = vmatprep.mubr.msk.bf16.mxu0 %vm538_vm1, %v11246_v37 }
  0xb5   : > { %8646 = vmatmul.mubr.msk.bf16.gmra.mrb[8].mxu1 %vm538_vm1, %v13835_v34 }
  0xb6   : > { %8649 = vmatprep.mubr.msk.bf16.mxu1 %vm538_vm1, %v13840_v49 }
  0xb7   : > { %9094 = vmatmul.mubr.msk.bf16.gmra.mrb[24].mxu0 %vm538_vm1, %v11252_v43 }
  0xb8   : > { %9097 = vmatprep.mubr.msk.bf16.mxu0 %vm538_vm1, %v11416_v44  ;;  %v1365_v44 = vrot.slane %v11361_v42, 3 }
  0xbd   : > { %8650 = vmatmul.mubr.msk.bf16.gmra.mrb[12].mxu1 %vm538_vm1, %v13842_v52 }
  0xbe   : > { %8653 = vmatprep.mubr.msk.bf16.mxu1 %vm538_vm1, %v13843_v18 }
  0xbf   : > { %9098 = vmatmul.mubr.msk.bf16.gmra.mrb[28].mxu0 %vm538_vm1, %v11429_v14  ;;  %v1361_v14 = vsel %vm1356_vm3, %v1358_v24, %v1360_v55  ;;  %v10294_v55 = vld [vmem:[%s13560_s1 + $0x48] sm:$0xff]  }
  0xc0   : > { %9105 = vmatprep.mubr.msk.bf16.mxu0 %vm538_vm1, %v13844_v5 }
  0xc5   : > { %8654 = vmatmul.mubr.msk.bf16.gmra.mrb[16].mxu1 %vm538_vm1, %v13845_v4 }
  0xc6   : > { %8657 = vmatprep.mubr.msk.bf16.mxu1 %vm538_vm1, %v11272_v47 }
  0xc7   : > { %9106 = vmatmul.mubr.msk.bf16.vlgmr.msra.gmra.mrb[0].mxu0 %vm538_vm1, %v13846_v21 }
  0xc8   : > { %9138 = vmatpush3.bf16.msra.mxu0 %v11327_v20  ;;  %9109 = vmatprep.mubr.msk.bf16.mxu0 %vm538_vm1, %v10983_v1  ;;  %v1357_v20 = vrot.slane %v11339_v17, 3 }
  0xc9   : > { %9139 = vmatprep.subr.bf16.mxu0 %v10293_v46 }
  0xcc   : > { %9140 = vmatpush3.bf16.msra.mxu0 %v10293_v46  ;;  %v1359_v46 = vsel %vm1356_vm3, %v1357_v20, %v1358_v24  ;;  %v1364_v20 = vsel %vm1356_vm3, %v1362_v35, %v1363_v38  ;;  %v1366_v24 = vsel %vm1356_vm3, %v1363_v38, %v1365_v44  ;;  %v13848_v35 = vld [vmem:[#allocation33_spill] sm:$0xff]  ;;  %v10296_v38 = vld [vmem:[%s13560_s1 + $0x50] sm:$0xff]   ;;  %v11514_v44 = vpack.c.bf16 %v13833_v0, %v13832_v60 }
  0xcd   : > { %8658 = vmatmul.mubr.msk.bf16.gmra.mrb[20].mxu1 %vm538_vm1, %v11277_v53  ;;  %9173 = vmatprep.subr.bf16.mxu0 %v10295_v13  ;;  %v1469_v45 = vpack.c.bf16 %v1361_v14, %v1359_v46  ;;  %v11487_v14 = vpack.c.bf16 %v1366_v24, %v1364_v20  ;;  %v13852_v46 = vld [vmem:[#allocation42_spill] sm:$0xff]  ;;  %v11520_v20 = vpack.c.bf16 %v13838_v29, %v13837_v63  ;;  %v13854_v24 = vld [vmem:[#allocation43_spill] sm:$0xff] }
  0xce   : > { %8661 = vmatprep.mubr.msk.bf16.mxu1 %vm538_vm1, %v11290_v62  ;;  %13851 = vst [vmem:[#allocation14_spill] sm:$0xff] %v11514_v44 }
  0xcf   : > { %9110 = vmatmul.mubr.msk.bf16.gmra.mrb[4].mxu0 %vm538_vm1, %v10997_v22  ;;  %13847 = vst [vmem:[#allocation56_spill] sm:$0xff] %v11487_v14  ;;  %13853 = vst [vmem:[#allocation23_spill] sm:$0xff] %v11520_v20 }
  0xd0   : > { %9113 = vmatprep.mubr.msk.bf16.mxu0 %vm538_vm1, %v11022_v7 }
  0xd5   : > { %8662 = vmatmul.mubr.msk.bf16.gmra.mrb[24].mxu1 %vm538_vm1, %v11301_v19 }
  0xd6   : > { %8665 = vmatprep.mubr.msk.bf16.mxu1 %vm538_vm1, %v11306_v58 }
  0xd7   : > { %9114 = vmatmul.mubr.msk.bf16.gmra.mrb[8].mxu0 %vm538_vm1, %v11031_v12 }
  0xd8   : > { %9117 = vmatprep.mubr.msk.bf16.mxu0 %vm538_vm1, %v11048_v9 }
  0xdd   : > { %8666 = vmatmul.mubr.msk.bf16.gmra.mrb[28].mxu1 %vm538_vm1, %v11310_v3 }
  0xde   : > { %8673 = vmatprep.mubr.msk.bf16.mxu1 %vm538_vm1, %v1469_v45  ;;  %v13849_v45 = vld [vmem:[#allocation37_spill] sm:$0xff] }
  0xdf   : > { %9118 = vmatmul.mubr.msk.bf16.gmra.mrb[12].mxu0 %vm538_vm1, %v11062_v23 }
  0xe0   : > { %9121 = vmatprep.mubr.msk.bf16.mxu0 %vm538_vm1, %v11069_v8 }
  0xe5   : > { %8674 = vmatmul.mubr.msk.bf16.vlgmr.msra.gmra.mrb[0].mxu1 %vm538_vm1, %v11487_v14 }
  0xe6   : > { %8706 = vmatpush3.bf16.msra.mxu1 %v11394_v27  ;;  %8677 = vmatprep.mubr.msk.bf16.mxu1 %vm538_vm1, %v13848_v35  ;;  %v13850_v27 = vld [vmem:[#allocation38_spill] sm:$0xff]  ;;  %v11532_v35 = vld [vmem:[%s10510_s30 + $0x1b8] sm:$0xff] }
  0xe7   : > { %8707 = vmatprep.subr.bf16.mxu1 %v10294_v55  ;;  %9122 = vmatmul.mubr.msk.bf16.gmra.mrb[16].mxu0 %vm538_vm1, %v11088_v54  ;;  %v1747_v54 = vrot.slane %v11347_v30, 4  ;;  %v1749_v30 = vrot.slane %v11365_v25, 4  ;;  %v10298_v25 = vld [vmem:[%s13560_s1 + $0x58] sm:$0xff]  }
  0xe8   : > { %9125 = vmatprep.mubr.msk.bf16.mxu0 %vm538_vm1, %v11104_v36  ;;  %v10297_v36 = vld [vmem:[%s13560_s1 + $0x118] sm:$0xff]  }
  0xea   : > { %8708 = vmatpush3.bf16.msra.mxu1 %v10294_v55  ;;  %v11529_v55 = vld [vmem:[%s10510_s30 + $0x1b0] sm:$0xff] }
  0xeb   : > { %8741 = vmatprep.subr.bf16.mxu1 %v10296_v38  ;;  %v11536_v14 = vpack.c.bf16 %v11532_v35, %v11529_v55 }
  0xed   : > { %8678 = vmatmul.mubr.msk.bf16.gmra.mrb[4].mxu1 %vm538_vm1, %v13849_v45  ;;  %13855 = vst [vmem:[#allocation20_spill] sm:$0xff] %v11536_v14 }
  0xee   : > { %8681 = vmatprep.mubr.msk.bf16.mxu1 %vm538_vm1, %v13850_v27 }
  0xef   : > { %9126 = vmatmul.mubr.msk.bf16.gmra.mrb[20].mxu0 %vm538_vm1, %v11111_v28  ;;  %v13857_v28 = vld [vmem:[#allocation48_spill] sm:$0xff] }
  0xf0   : > { %9129 = vmatprep.mubr.msk.bf16.mxu0 %vm538_vm1, %v11135_v57  ;;  %v13856_v57 = vld [vmem:[#allocation47_spill] sm:$0xff] }
  0xf5   : > { %8682 = vmatmul.mubr.msk.bf16.gmra.mrb[8].mxu1 %vm538_vm1, %v13852_v46  ;;  %v13867_v46 = vld [vmem:[#allocation57_spill] sm:$0xff] }
  0xf6   : > { %8685 = vmatprep.mubr.msk.bf16.mxu1 %vm538_vm1, %v13854_v24  ;;  %v13860_v24 = vld [vmem:[#allocation53_spill] sm:$0xff] }
  0xf7   : > { %9130 = vmatmul.mubr.msk.bf16.gmra.mrb[24].mxu0 %vm538_vm1, %v11514_v44  ;;  %v13858_v44 = vld [vmem:[#allocation18_spill] sm:$0xff] }
  0xf8   : > { %9133 = vmatprep.mubr.msk.bf16.mxu0 %vm538_vm1, %v11520_v20  ;;  %v13859_v20 = vld [vmem:[#allocation51_spill] sm:$0xff] }
  0xfd   : > { %8686 = vmatmul.mubr.msk.bf16.gmra.mrb[12].mxu1 %vm538_vm1, %v13856_v57  ;;  %v13861_v57 = vld [vmem:[#allocation21_spill] sm:$0xff] }
  0xfe   : > { %8689 = vmatprep.mubr.msk.bf16.mxu1 %vm538_vm1, %v13857_v28  ;;  %v13862_v28 = vld [vmem:[#allocation24_spill] sm:$0xff] }
  0xff   : > { %9134 = vmatmul.mubr.msk.bf16.gmra.mrb[28].mxu0 %vm538_vm1, %v11536_v14  ;;  %v11560_v14 = vld [vmem:[%s13560_s1 + $0x120] sm:$0xff]  }
 0x100   : > { %9141 = vmatprep.mubr.msk.bf16.mxu0 %vm538_vm1, %v13858_v44  ;;  %v13863_v44 = vld [vmem:[#allocation54_spill] sm:$0xff] }
 0x105   : > { %8690 = vmatmul.mubr.msk.bf16.gmra.mrb[16].mxu1 %vm538_vm1, %v13859_v20  ;;  %v1745_v20 = vrot.slane %v11343_v61, 4 }
 0x106   : > { %8693 = vmatprep.mubr.msk.bf16.mxu1 %vm538_vm1, %v13860_v24  ;;  %v13864_v24 = vld [vmem:[#allocation55_spill] sm:$0xff] }
 0x107   : > { %9142 = vmatmul.mubr.msk.bf16.vlgmr.msra.gmra.mrb[0].mxu0 %vm538_vm1, %v13861_v57  ;;  %v13865_v57 = vld [vmem:[#allocation28_spill] sm:$0xff] }
 0x108   : > { %9174 = vmatpush3.bf16.msra.mxu0 %v10295_v13  ;;  %9145 = vmatprep.mubr.msk.bf16.mxu0 %vm538_vm1, %v13862_v28  ;;  %v13866_v13 = vld [vmem:[#allocation30_spill] sm:$0xff]  ;;  %v1744_v28 = vrot.slane %v11339_v17, 4  ;;  %v1752_v17 = vrot.slane %v11361_v42, 4 }
 0x109   : > { %9175 = vmatprep.subr.bf16.mxu0 %v10297_v36 }
 0x10c   : > { %9176 = vmatpush3.bf16.msra.mxu0 %v10297_v36  ;;  %v13868_v36 = vld [vmem:[#allocation58_spill] sm:$0xff] }
 0x10d   : > { %8694 = vmatmul.mubr.msk.bf16.gmra.mrb[20].mxu1 %vm538_vm1, %v13863_v44  ;;  %9209 = vmatprep.subr.bf16.mxu0 %v11560_v14  ;;  %v1748_v44 = vsel %vm1743_vm4, %v1745_v20, %v1747_v54 }
 0x10e   : > { %8697 = vmatprep.mubr.msk.bf16.mxu1 %vm538_vm1, %v13864_v24  ;;  %v1746_v24 = vsel %vm1743_vm4, %v1744_v28, %v1745_v20  ;;  %v13871_v20 = vld [vmem:[#allocation36_spill] sm:$0xff] }
 0x10f   : > { %9146 = vmatmul.mubr.msk.bf16.gmra.mrb[4].mxu0 %vm538_vm1, %v13865_v57  ;;  %v13869_v57 = vld [vmem:[#allocation31_spill] sm:$0xff]  ;;  %v1856_v61 = vpack.c.bf16 %v1748_v44, %v1746_v24  ;;  %v13874_v44 = vld [vmem:[#allocation41_spill] sm:$0xff]  ;;  %v2348_v24 = vrot.slane %v13833_v0, 1 }
 0x110   : > { %9149 = vmatprep.mubr.msk.bf16.mxu0 %vm538_vm1, %v13866_v13  ;;  %v13870_v13 = vld [vmem:[#allocation35_spill] sm:$0xff] }
 0x115   : > { %8698 = vmatmul.mubr.msk.bf16.gmra.mrb[24].mxu1 %vm538_vm1, %v13867_v46  ;;  %v1750_v46 = vrot.slane %v11369_v11, 4  ;;  %v10300_v11 = vld [vmem:[%s13560_s1 + $0x60] sm:$0xff]  }
 0x116   : > { %8701 = vmatprep.mubr.msk.bf16.mxu1 %vm538_vm1, %v13868_v36 }
 0x117   : > { %9150 = vmatmul.mubr.msk.bf16.gmra.mrb[8].mxu0 %vm538_vm1, %v13869_v57  ;;  %v1751_v54 = vsel %vm1743_vm4, %v1749_v30, %v1750_v46  ;;  %v1753_v28 = vsel %vm1743_vm4, %v1750_v46, %v1752_v17  ;;  %v13875_v46 = vld [vmem:[#allocation44_spill] sm:$0xff]  ;;  %v2350_v17 = vrot.slane %v13834_v16, 1  ;;  %v3449_v30 = vrot.slane %v13838_v29, 1 }
 0x118   : > { %9153 = vmatprep.mubr.msk.bf16.mxu0 %vm538_vm1, %v13870_v13  ;;  %v13872_v13 = vld [vmem:[#allocation40_spill] sm:$0xff]  ;;  %v11596_v42 = vpack.c.bf16 %v1753_v28, %v1751_v54  ;;  %v3451_v54 = vrot.slane %v13839_v40, 1  ;;  %v13876_v28 = vld [vmem:[#allocation45_spill] sm:$0xff] }
 0x11a   : > { %13873 = vst [vmem:[#allocation59_spill] sm:$0xff] %v11596_v42 }
 0x11d   : > { %8702 = vmatmul.mubr.msk.bf16.gmra.mrb[28].mxu1 %vm538_vm1, %v11237_v10 }
 0x11e   : > { %8709 = vmatprep.mubr.msk.bf16.mxu1 %vm538_vm1, %v1856_v61  ;;  %v3448_v61 = vrot.slane %v13837_v63, 1 }
 0x11f   : > { %9154 = vmatmul.mubr.msk.bf16.gmra.mrb[12].mxu0 %vm538_vm1, %v13871_v20 }
 0x120   : > { %9157 = vmatprep.mubr.msk.bf16.mxu0 %vm538_vm1, %v13872_v13 }
 0x125   : > { %8710 = vmatmul.mubr.msk.bf16.vlgmr.msra.gmra.mrb[0].mxu1 %vm538_vm1, %v11596_v42  ;;  %v2351_v42 = vsel %vm392_vm0, %v2348_v24, %v2350_v17  ;;  %v10302_v17 = vld [vmem:[%s13560_s1 + $0x68] sm:$0xff]  }
 0x126   : > { %8742 = vmatpush3.bf16.msra.mxu1 %v10296_v38  ;;  %8713 = vmatprep.mubr.msk.bf16.mxu1 %vm538_vm1, %v11057_v51  ;;  %v2347_v38 = vrot.slane %v13832_v60, 1 }
 0x127   : > { %8743 = vmatprep.subr.bf16.mxu1 %v10298_v25  ;;  %9158 = vmatmul.mubr.msk.bf16.gmra.mrb[16].mxu0 %vm538_vm1, %v13874_v44  ;;  %v3452_v44 = vsel %vm392_vm0, %v3449_v30, %v3451_v54  ;;  %v2569_v54 = vrot.slane %v13833_v0, 2 }
 0x128   : > { %9161 = vmatprep.mubr.msk.bf16.mxu0 %vm538_vm1, %v13875_v46  ;;  %v2349_v51 = vsel %vm392_vm0, %v2347_v38, %v2348_v24  ;;  %v3450_v46 = vsel %vm392_vm0, %v3448_v61, %v3449_v30  ;;  %v10303_v24 = vld [vmem:[%s13560_s1 + $0x130] sm:$0xff]   ;;  %v13882_v61 = vld [vmem:[#allocation8_spill] sm:$0xff] }
 0x129   : > { %v11633_v13 = vpack.c.bf16 %v2351_v42, %v2349_v51  ;;  %v11637_v20 = vpack.c.bf16 %v3452_v44, %v3450_v46  ;;  %v10301_v46 = vld [vmem:[%s13560_s1 + $0x128] sm:$0xff]   ;;  %v10304_v30 = vld [vmem:[%s13560_s1 + $0x70] sm:$0xff]  }
 0x12a   : > { %8744 = vmatpush3.bf16.msra.mxu1 %v10298_v25  ;;  %v13877_v25 = vld [vmem:[#allocation50_spill] sm:$0xff] }
 0x12b   : > { %8777 = vmatprep.subr.bf16.mxu1 %v10300_v11  ;;  %13878 = vst [vmem:[#allocation61_spill] sm:$0xff] %v11633_v13  ;;  %13879 = vst [vmem:[#allocation62_spill] sm:$0xff] %v11637_v20 }
 0x12d   : > { %8714 = vmatmul.mubr.msk.bf16.gmra.mrb[4].mxu1 %vm538_vm1, %v11082_v2 }
 0x12e   : > { %8717 = vmatprep.mubr.msk.bf16.mxu1 %vm538_vm1, %v11090_v15  ;;  %v11631_v15 = vld [vmem:[%s10510_s30 + $0x1c0] sm:$0xf] }
 0x12f   : > { %9162 = vmatmul.mubr.msk.bf16.gmra.mrb[20].mxu0 %vm538_vm1, %v13876_v28  ;;  %v4549_v28 = vrot.slane %v11529_v55, 1  ;;  %v4552_v38 = vrot.slane %v11631_v15, 1 }
 0x130   : > { %9165 = vmatprep.mubr.msk.bf16.mxu0 %vm538_vm1, %v13877_v25  ;;  %v4550_v25 = vrot.slane %v11532_v35, 1 }
 0x132   : > { %v4551_v51 = vsel %vm392_vm0, %v4549_v28, %v4550_v25  ;;  %v4553_v42 = vsel %vm392_vm0, %v4550_v25, %v4552_v38  ;;  %v2571_v28 = vrot.slane %v13834_v16, 2  ;;  %v3669_v25 = vrot.slane %v13837_v63, 2 }
 0x133   : > { %v11650_v44 = vpack.c.bf16 %v4553_v42, %v4551_v51  ;;  %v3670_v38 = vrot.slane %v13838_v29, 2  ;;  %v3672_v51 = vrot.slane %v13839_v40, 2  ;;  %v4770_v29 = vrot.slane %v11529_v55, 2 }
 0x134   : > { %v2572_v0 = vsel %vm969_vm2, %v2569_v54, %v2571_v28  ;;  %v4771_v40 = vrot.slane %v11532_v35, 2  ;;  %v10305_v28 = vld [vmem:[%s13560_s1 + $0x138] sm:$0xff]  }
 0x135   : > { %8718 = vmatmul.mubr.msk.bf16.gmra.mrb[8].mxu1 %vm538_vm1, %v11098_v48  ;;  %13880 = vst [vmem:[#allocation22_spill] sm:$0xff] %v11650_v44  ;;  %v3671_v16 = vsel %vm969_vm2, %v3669_v25, %v3670_v38  ;;  %v3673_v42 = vsel %vm969_vm2, %v3670_v38, %v3672_v51  ;;  %v13885_v25 = vld [vmem:[#allocation42_spill] sm:$0xff]  ;;  %v10307_v38 = vld [vmem:[%s13560_s1 + $0x140] sm:$0xff]  }
 0x136   : > { %8721 = vmatprep.mubr.msk.bf16.mxu1 %vm538_vm1, %v11125_v39  ;;  %v11735_v63 = vpack.c.bf16 %v3673_v42, %v3671_v16  ;;  %v13886_v51 = vld [vmem:[#allocation6_spill] sm:$0xff]  ;;  %v13890_v16 = vld [vmem:[#allocation9_spill] sm:$0xff] }
 0x137   : > { %9166 = vmatmul.mubr.msk.bf16.gmra.mrb[24].mxu0 %vm538_vm1, %v11633_v13  ;;  %v13891_v42 = vld [vmem:[#allocation25_spill] sm:$0xff] }
 0x138   : > { %9169 = vmatprep.mubr.msk.bf16.mxu0 %vm538_vm1, %v11637_v20  ;;  %13883 = vst [vmem:[#allocation26_spill] sm:$0xff] %v11735_v63  ;;  %v13902_v20 = vld [vmem:[#allocation21_spill] sm:$0xff] }
 0x13d   : > { %8722 = vmatmul.mubr.msk.bf16.gmra.mrb[12].mxu1 %vm538_vm1, %v11130_v31 }
 0x13e   : > { %8725 = vmatprep.mubr.msk.bf16.mxu1 %vm538_vm1, %v11165_v32 }
 0x13f   : > { %9170 = vmatmul.mubr.msk.bf16.gmra.mrb[28].mxu0 %vm538_vm1, %v11650_v44  ;;  %v13901_v44 = vld [vmem:[#allocation57_spill] sm:$0xff] }
 0x140   : > { %9177 = vmatprep.mubr.msk.bf16.mxu0 %vm538_vm1, %v13830_v50 }
 0x145   : > { %8726 = vmatmul.mubr.msk.bf16.gmra.mrb[16].mxu1 %vm538_vm1, %v11189_v59 }
 0x146   : > { %8729 = vmatprep.mubr.msk.bf16.mxu1 %vm538_vm1, %v11200_v56 }
 0x147   : > { %9178 = vmatmul.mubr.msk.bf16.vlgmr.msra.gmra.mrb[0].mxu0 %vm538_vm1, %v13831_v26 }
 0x148   : > { %9210 = vmatpush3.bf16.msra.mxu0 %v11560_v14  ;;  %9181 = vmatprep.mubr.msk.bf16.mxu0 %vm538_vm1, %v13835_v34  ;;  %v13881_v14 = vld [vmem:[#allocation52_spill] sm:$0xff] }
 0x149   : > { %9211 = vmatprep.subr.bf16.mxu0 %v10301_v46 }
 0x14c   : > { %9212 = vmatpush3.bf16.msra.mxu0 %v10301_v46 }
 0x14d   : > { %8730 = vmatmul.mubr.msk.bf16.gmra.mrb[20].mxu1 %vm538_vm1, %v11217_v41  ;;  %9245 = vmatprep.subr.bf16.mxu0 %v10303_v24 }
 0x14e   : > { %8733 = vmatprep.mubr.msk.bf16.mxu1 %vm538_vm1, %v11228_v33 }
 0x14f   : > { %9182 = vmatmul.mubr.msk.bf16.gmra.mrb[4].mxu0 %vm538_vm1, %v13840_v49 }
 0x150   : > { %9185 = vmatprep.mubr.msk.bf16.mxu0 %vm538_vm1, %v13842_v52 }
 0x155   : > { %8734 = vmatmul.mubr.msk.bf16.gmra.mrb[24].mxu1 %vm538_vm1, %v11239_v6 }
 0x156   : > { %8737 = vmatprep.mubr.msk.bf16.mxu1 %vm538_vm1, %v11246_v37 }
 0x157   : > { %9186 = vmatmul.mubr.msk.bf16.gmra.mrb[8].mxu0 %vm538_vm1, %v13843_v18 }
 0x158   : > { %9189 = vmatprep.mubr.msk.bf16.mxu0 %vm538_vm1, %v13845_v4 }
 0x15d   : > { %8738 = vmatmul.mubr.msk.bf16.gmra.mrb[28].mxu1 %vm538_vm1, %v11252_v43 }
 0x15e   : > { %8745 = vmatprep.mubr.msk.bf16.mxu1 %vm538_vm1, %v13881_v14  ;;  %v4773_v14 = vrot.slane %v11631_v15, 2 }
 0x15f   : > { %9190 = vmatmul.mubr.msk.bf16.gmra.mrb[12].mxu0 %vm538_vm1, %v11272_v47 }
 0x160   : > { %9193 = vmatprep.mubr.msk.bf16.mxu0 %vm538_vm1, %v11277_v53 }
 0x165   : > { %8746 = vmatmul.mubr.msk.bf16.vlgmr.msra.gmra.mrb[0].mxu1 %vm538_vm1, %v13882_v61  ;;  %v13900_v61 = vld [vmem:[#allocation55_spill] sm:$0xff] }
 0x166   : > { %8778 = vmatpush3.bf16.msra.mxu1 %v10300_v11  ;;  %8749 = vmatprep.mubr.msk.bf16.mxu1 %vm538_vm1, %v13844_v5  ;;  %v2568_v11 = vrot.slane %v13832_v60, 2  ;;  %v13899_v5 = vld [vmem:[#allocation18_spill] sm:$0xff] }
 0x167   : > { %8779 = vmatprep.subr.bf16.mxu1 %v10302_v17  ;;  %9194 = vmatmul.mubr.msk.bf16.gmra.mrb[16].mxu0 %vm538_vm1, %v11290_v62 }
 0x168   : > { %9197 = vmatprep.mubr.msk.bf16.mxu0 %vm538_vm1, %v11301_v19  ;;  %v2570_v60 = vsel %vm969_vm2, %v2568_v11, %v2569_v54  ;;  %v4774_v11 = vsel %vm969_vm2, %v4771_v40, %v4773_v14  ;;  %v13894_v14 = vld [vmem:[#allocation14_spill] sm:$0xff] }
 0x169   : > { %v11731_v46 = vpack.c.bf16 %v2572_v0, %v2570_v60  ;;  %v13887_v60 = vld [vmem:[#allocation11_spill] sm:$0xff] }
 0x16a   : > { %8780 = vmatpush3.bf16.msra.mxu1 %v10302_v17  ;;  %v4772_v17 = vsel %vm969_vm2, %v4770_v29, %v4771_v40  ;;  %v13888_v0 = vld [vmem:[#allocation43_spill] sm:$0xff]  ;;  %v13892_v29 = vld [vmem:[#allocation48_spill] sm:$0xff] }
 0x16b   : > { %8813 = vmatprep.subr.bf16.mxu1 %v10304_v30  ;;  %v11748_v54 = vpack.c.bf16 %v4774_v11, %v4772_v17  ;;  %v13893_v40 = vld [vmem:[#allocation51_spill] sm:$0xff]  ;;  %v13895_v17 = vld [vmem:[#allocation12_spill] sm:$0xff]  ;;  %v13896_v11 = vld [vmem:[#allocation53_spill] sm:$0xff] }
 0x16d   : > { %8750 = vmatmul.mubr.msk.bf16.gmra.mrb[4].mxu1 %vm538_vm1, %v13846_v21  ;;  %13884 = vst [vmem:[#allocation29_spill] sm:$0xff] %v11748_v54 }
 0x16e   : > { %8753 = vmatprep.mubr.msk.bf16.mxu1 %vm538_vm1, %v10983_v1 }
 0x16f   : > { %9198 = vmatmul.mubr.msk.bf16.gmra.mrb[20].mxu0 %vm538_vm1, %v11306_v58 }
 0x170   : > { %9201 = vmatprep.mubr.msk.bf16.mxu0 %vm538_vm1, %v11310_v3 }
 0x175   : > { %8754 = vmatmul.mubr.msk.bf16.gmra.mrb[8].mxu1 %vm538_vm1, %v10997_v22 }
 0x176   : > { %8757 = vmatprep.mubr.msk.bf16.mxu1 %vm538_vm1, %v11022_v7 }
 0x177   : > { %9202 = vmatmul.mubr.msk.bf16.gmra.mrb[24].mxu0 %vm538_vm1, %v11731_v46 }
 0x178   : > { %9205 = vmatprep.mubr.msk.bf16.mxu0 %vm538_vm1, %v11735_v63  ;;  %v13898_v63 = vld [vmem:[#allocation15_spill] sm:$0xff] }
 0x17d   : > { %8758 = vmatmul.mubr.msk.bf16.gmra.mrb[12].mxu1 %vm538_vm1, %v11031_v12 }
 0x17e   : > { %8761 = vmatprep.mubr.msk.bf16.mxu1 %vm538_vm1, %v11048_v9 }
 0x17f   : > { %9206 = vmatmul.mubr.msk.bf16.gmra.mrb[28].mxu0 %vm538_vm1, %v11748_v54  ;;  %v10306_v54 = vld [vmem:[%s13560_s1 + $0x78] sm:$0xff]  }
 0x180   : > { %9213 = vmatprep.mubr.msk.bf16.mxu0 %vm538_vm1, %v13849_v45 }
 0x185   : > { %8762 = vmatmul.mubr.msk.bf16.gmra.mrb[16].mxu1 %vm538_vm1, %v11062_v23 }
 0x186   : > { %8765 = vmatprep.mubr.msk.bf16.mxu1 %vm538_vm1, %v11069_v8 }
 0x187   : > { %9214 = vmatmul.mubr.msk.bf16.vlgmr.msra.gmra.mrb[0].mxu0 %vm538_vm1, %v13850_v27 }
 0x188   : > { %9246 = vmatpush3.bf16.msra.mxu0 %v10303_v24  ;;  %9217 = vmatprep.mubr.msk.bf16.mxu0 %vm538_vm1, %v13885_v25  ;;  %v13889_v24 = vld [vmem:[#allocation47_spill] sm:$0xff] }
 0x189   : > { %9247 = vmatprep.subr.bf16.mxu0 %v10305_v28 }
 0x18c   : > { %9248 = vmatpush3.bf16.msra.mxu0 %v10305_v28  ;;  %v13897_v28 = vld [vmem:[#allocation54_spill] sm:$0xff] }
 0x18d   : > { %8766 = vmatmul.mubr.msk.bf16.gmra.mrb[20].mxu1 %vm538_vm1, %v13886_v51  ;;  %9281 = vmatprep.subr.bf16.mxu0 %v10307_v38 }
 0x18e   : > { %8769 = vmatprep.mubr.msk.bf16.mxu1 %vm538_vm1, %v13887_v60 }
 0x18f   : > { %9218 = vmatmul.mubr.msk.bf16.gmra.mrb[4].mxu0 %vm538_vm1, %v13888_v0 }
 0x190   : > { %9221 = vmatprep.mubr.msk.bf16.mxu0 %vm538_vm1, %v13889_v24 }
 0x195   : > { %8770 = vmatmul.mubr.msk.bf16.gmra.mrb[24].mxu1 %vm538_vm1, %v13890_v16 }
 0x196   : > { %8773 = vmatprep.mubr.msk.bf16.mxu1 %vm538_vm1, %v13891_v42 }
 0x197   : > { %9222 = vmatmul.mubr.msk.bf16.gmra.mrb[8].mxu0 %vm538_vm1, %v13892_v29 }
 0x198   : > { %9225 = vmatprep.mubr.msk.bf16.mxu0 %vm538_vm1, %v13893_v40 }
 0x19d   : > { %8774 = vmatmul.mubr.msk.bf16.gmra.mrb[28].mxu1 %vm538_vm1, %v13894_v14 }
 0x19e   : > { %8781 = vmatprep.mubr.msk.bf16.mxu1 %vm538_vm1, %v13895_v17  ;;  %v10308_v17 = vld [vmem:[%s13560_s1 + $0x80] sm:$0xff]  }
 0x19f   : > { %9226 = vmatmul.mubr.msk.bf16.gmra.mrb[12].mxu0 %vm538_vm1, %v13896_v11  ;;  %v13909_v11 = vld [vmem:[#allocation35_spill] sm:$0xff] }
 0x1a0   : > { %9229 = vmatprep.mubr.msk.bf16.mxu0 %vm538_vm1, %v13897_v28  ;;  %v13906_v28 = vld [vmem:[#allocation65_spill] sm:$0xff] }
 0x1a5   : > { %8782 = vmatmul.mubr.msk.bf16.vlgmr.msra.gmra.mrb[0].mxu1 %vm538_vm1, %v13898_v63  ;;  %v4991_v63 = vrot.slane %v11529_v55, 3 }
 0x1a6   : > { %8814 = vmatpush3.bf16.msra.mxu1 %v10304_v30  ;;  %8785 = vmatprep.mubr.msk.bf16.mxu1 %vm538_vm1, %v13899_v5  ;;  %v13903_v30 = vld [vmem:[#allocation24_spill] sm:$0xff] }
 0x1a7   : > { %8815 = vmatprep.subr.bf16.mxu1 %v10306_v54  ;;  %9230 = vmatmul.mubr.msk.bf16.gmra.mrb[16].mxu0 %vm538_vm1, %v13900_v61  ;;  %v13904_v5 = vld [vmem:[#allocation28_spill] sm:$0xff]  ;;  %v13905_v61 = vld [vmem:[#allocation30_spill] sm:$0xff] }
 0x1a8   : > { %9233 = vmatprep.mubr.msk.bf16.mxu0 %vm538_vm1, %v13901_v44  ;;  %v4994_v44 = vrot.slane %v11631_v15, 3 }
 0x1aa   : > { %8816 = vmatpush3.bf16.msra.mxu1 %v10306_v54  ;;  %v4992_v54 = vrot.slane %v11532_v35, 3 }
 0x1ab   : > { %8849 = vmatprep.subr.bf16.mxu1 %v10308_v17 }
 0x1ad   : > { %8786 = vmatmul.mubr.msk.bf16.gmra.mrb[4].mxu1 %vm538_vm1, %v13902_v20 }
 0x1ae   : > { %8789 = vmatprep.mubr.msk.bf16.mxu1 %vm538_vm1, %v13903_v30  ;;  %v13907_v30 = vld [vmem:[#allocation68_spill] sm:$0xff] }
 0x1af   : > { %9234 = vmatmul.mubr.msk.bf16.gmra.mrb[20].mxu0 %vm538_vm1, %v13868_v36  ;;  %v4995_v36 = vsel %vm1356_vm3, %v4992_v54, %v4994_v44  ;;  %v10311_v44 = vld [vmem:[%s13560_s1 + $0x150] sm:$0xff]  }
 0x1b0   : > { %9237 = vmatprep.mubr.msk.bf16.mxu0 %vm538_vm1, %v11237_v10  ;;  %v4993_v10 = vsel %vm1356_vm3, %v4991_v63, %v4992_v54  ;;  %v13911_v63 = vld [vmem:[#allocation40_spill] sm:$0xff]  ;;  %v13913_v54 = vld [vmem:[#allocation41_spill] sm:$0xff] }
 0x1b5   : > { %8790 = vmatmul.mubr.msk.bf16.gmra.mrb[8].mxu1 %vm538_vm1, %v13904_v5  ;;  %v11831_v5 = vpack.c.bf16 %v4995_v36, %v4993_v10  ;;  %v10309_v10 = vld [vmem:[%s13560_s1 + $0x148] sm:$0xff]   ;;  %v13912_v36 = vld [vmem:[#allocation7_spill] sm:$0xff] }
 0x1b6   : > { %8793 = vmatprep.mubr.msk.bf16.mxu1 %vm538_vm1, %v13905_v61 }
 0x1b7   : > { %9238 = vmatmul.mubr.msk.bf16.gmra.mrb[24].mxu0 %vm538_vm1, %v13906_v28  ;;  %13908 = vst [vmem:[#allocation32_spill] sm:$0xff] %v11831_v5  ;;  %v13910_v28 = vld [vmem:[#allocation36_spill] sm:$0xff] }
 0x1b8   : > { %9241 = vmatprep.mubr.msk.bf16.mxu0 %vm538_vm1, %v13907_v30  ;;  %v13916_v30 = vld [vmem:[#allocation50_spill] sm:$0xff] }
 0x1bd   : > { %8794 = vmatmul.mubr.msk.bf16.gmra.mrb[12].mxu1 %vm538_vm1, %v13869_v57 }
 0x1be   : > { %8797 = vmatprep.mubr.msk.bf16.mxu1 %vm538_vm1, %v13909_v11 }
 0x1bf   : > { %9242 = vmatmul.mubr.msk.bf16.gmra.mrb[28].mxu0 %vm538_vm1, %v11831_v5  ;;  %v13914_v5 = vld [vmem:[#allocation44_spill] sm:$0xff] }
 0x1c0   : > { %9249 = vmatprep.mubr.msk.bf16.mxu0 %vm538_vm1, %v11082_v2 }
 0x1c5   : > { %8798 = vmatmul.mubr.msk.bf16.gmra.mrb[16].mxu1 %vm538_vm1, %v13910_v28 }
 0x1c6   : > { %8801 = vmatprep.mubr.msk.bf16.mxu1 %vm538_vm1, %v13911_v63 }
 0x1c7   : > { %9250 = vmatmul.mubr.msk.bf16.vlgmr.msra.gmra.mrb[0].mxu0 %vm538_vm1, %v13912_v36 }
 0x1c8   : > { %9282 = vmatpush3.bf16.msra.mxu0 %v10307_v38  ;;  %9253 = vmatprep.mubr.msk.bf16.mxu0 %vm538_vm1, %v11098_v48  ;;  %v13915_v38 = vld [vmem:[#allocation45_spill] sm:$0xff] }
 0x1c9   : > { %9283 = vmatprep.subr.bf16.mxu0 %v10309_v10 }
 0x1cc   : > { %9284 = vmatpush3.bf16.msra.mxu0 %v10309_v10  ;;  %v13917_v10 = vld [vmem:[#allocation39_spill] sm:$0xff] }
 0x1cd   : > { %8802 = vmatmul.mubr.msk.bf16.gmra.mrb[20].mxu1 %vm538_vm1, %v13913_v54  ;;  %9317 = vmatprep.subr.bf16.mxu0 %v10311_v44 }
 0x1ce   : > { %8805 = vmatprep.mubr.msk.bf16.mxu1 %vm538_vm1, %v13914_v5 }
 0x1cf   : > { %9254 = vmatmul.mubr.msk.bf16.gmra.mrb[4].mxu0 %vm538_vm1, %v11125_v39 }
 0x1d0   : > { %9257 = vmatprep.mubr.msk.bf16.mxu0 %vm538_vm1, %v11130_v31  ;;  %v10310_v31 = vld [vmem:[%s13560_s1 + $0x88] sm:$0xff]  }
 0x1d5   : > { %8806 = vmatmul.mubr.msk.bf16.gmra.mrb[24].mxu1 %vm538_vm1, %v13915_v38 }
 0x1d6   : > { %8809 = vmatprep.mubr.msk.bf16.mxu1 %vm538_vm1, %v13916_v30 }
 0x1d7   : > { %9258 = vmatmul.mubr.msk.bf16.gmra.mrb[8].mxu0 %vm538_vm1, %v11165_v32  ;;  %v13918_v32 = vld [vmem:[#allocation10_spill] sm:$0xff] }
 0x1d8   : > { %9261 = vmatprep.mubr.msk.bf16.mxu0 %vm538_vm1, %v11189_v59 }
 0x1dd   : > { %8810 = vmatmul.mubr.msk.bf16.gmra.mrb[28].mxu1 %vm538_vm1, %v11633_v13 }
 0x1de   : > { %8817 = vmatprep.mubr.msk.bf16.mxu1 %vm538_vm1, %v13917_v10  ;;  %v10312_v10 = vld [vmem:[%s13560_s1 + $0x90] sm:$0xff]  }
 0x1df   : > { %9262 = vmatmul.mubr.msk.bf16.gmra.mrb[12].mxu0 %vm538_vm1, %v11200_v56 }
 0x1e0   : > { %9265 = vmatprep.mubr.msk.bf16.mxu0 %vm538_vm1, %v11217_v41 }
 0x1e5   : > { %8818 = vmatmul.mubr.msk.bf16.vlgmr.msra.gmra.mrb[0].mxu1 %vm538_vm1, %v13918_v32  ;;  %v5212_v32 = vrot.slane %v11529_v55, 4  ;;  %v13923_v55 = vld [vmem:[#allocation33_spill] sm:$0xff] }
 0x1e6   : > { %8850 = vmatpush3.bf16.msra.mxu1 %v10308_v17  ;;  %8821 = vmatprep.mubr.msk.bf16.mxu1 %vm538_vm1, %v13830_v50  ;;  %v5215_v50 = vrot.slane %v11631_v15, 4  ;;  %v13919_v17 = vld [vmem:[#allocation13_spill] sm:$0xff]  ;;  %v10313_v15 = vld [vmem:[%s13560_s1 + $0x158] sm:$0xff]  }
 0x1e7   : > { %8851 = vmatprep.subr.bf16.mxu1 %v10310_v31  ;;  %9266 = vmatmul.mubr.msk.bf16.gmra.mrb[16].mxu0 %vm538_vm1, %v11228_v33 }
 0x1e8   : > { %9269 = vmatprep.mubr.msk.bf16.mxu0 %vm538_vm1, %v11239_v6  ;;  %v13920_v6 = vld [vmem:[#allocation17_spill] sm:$0xff] }
 0x1ea   : > { %8852 = vmatpush3.bf16.msra.mxu1 %v10310_v31  ;;  %v5213_v31 = vrot.slane %v11532_v35, 4  ;;  %v10314_v35 = vld [vmem:[%s13560_s1 + $0x98] sm:$0xff]  }
 0x1eb   : > { %8885 = vmatprep.subr.bf16.mxu1 %v10312_v10 }
 0x1ed   : > { %8822 = vmatmul.mubr.msk.bf16.gmra.mrb[4].mxu1 %vm538_vm1, %v13831_v26 }
 0x1ee   : > { %8825 = vmatprep.mubr.msk.bf16.mxu1 %vm538_vm1, %v13835_v34 }
 0x1ef   : > { %9270 = vmatmul.mubr.msk.bf16.gmra.mrb[20].mxu0 %vm538_vm1, %v11246_v37  ;;  %v5216_v37 = vsel %vm1743_vm4, %v5213_v31, %v5215_v50 }
 0x1f0   : > { %9273 = vmatprep.mubr.msk.bf16.mxu0 %vm538_vm1, %v11252_v43  ;;  %v5214_v43 = vsel %vm1743_vm4, %v5212_v32, %v5213_v31  ;;  %v11993_v32 = vld [vmem:[%s10510_s30 + $0x1c8] sm:$0xff]  ;;  %v11996_v31 = vld [vmem:[%s10510_s30 + $0x1d0] sm:$0xff] }
 0x1f1   : > { %v11914_v33 = vpack.c.bf16 %v5216_v37, %v5214_v43  ;;  %v10315_v37 = vld [vmem:[%s13560_s1 + $0x160] sm:$0xff]   ;;  %v13922_v43 = vld [vmem:[#allocation56_spill] sm:$0xff]  ;;  %v5433_v50 = vpack.c.bf16 %v11996_v31, %v11993_v32 }
 0x1f3   : > { %13921 = vst [vmem:[#allocation49_spill] sm:$0xff] %v11914_v33 }
 0x1f5   : > { %8826 = vmatmul.mubr.msk.bf16.gmra.mrb[8].mxu1 %vm538_vm1, %v13840_v49 }
 0x1f6   : > { %8829 = vmatprep.mubr.msk.bf16.mxu1 %vm538_vm1, %v13842_v52 }
 0x1f7   : > { %9274 = vmatmul.mubr.msk.bf16.gmra.mrb[24].mxu0 %vm538_vm1, %v13919_v17 }
 0x1f8   : > { %9277 = vmatprep.mubr.msk.bf16.mxu0 %vm538_vm1, %v13920_v6  ;;  %v13931_v6 = vld [vmem:[#allocation57_spill] sm:$0xff] }
 0x1fd   : > { %8830 = vmatmul.mubr.msk.bf16.gmra.mrb[12].mxu1 %vm538_vm1, %v13843_v18 }
 0x1fe   : > { %8833 = vmatprep.mubr.msk.bf16.mxu1 %vm538_vm1, %v13845_v4 }
 0x1ff   : > { %9278 = vmatmul.mubr.msk.bf16.gmra.mrb[28].mxu0 %vm538_vm1, %v11914_v33  ;;  %v13930_v33 = vld [vmem:[#allocation55_spill] sm:$0xff] }
 0x200   : > { %9285 = vmatprep.mubr.msk.bf16.mxu0 %vm538_vm1, %v13846_v21 }
 0x205   : > { %8834 = vmatmul.mubr.msk.bf16.gmra.mrb[16].mxu1 %vm538_vm1, %v11272_v47 }
 0x206   : > { %8837 = vmatprep.mubr.msk.bf16.mxu1 %vm538_vm1, %v11277_v53 }
 0x207   : > { %9286 = vmatmul.mubr.msk.bf16.vlgmr.msra.gmra.mrb[0].mxu0 %vm538_vm1, %v10983_v1 }
 0x208   : > { %9318 = vmatpush3.bf16.msra.mxu0 %v10311_v44  ;;  %9289 = vmatprep.mubr.msk.bf16.mxu0 %vm538_vm1, %v10997_v22  ;;  %v10316_v44 = vld [vmem:[%s13560_s1 + $0xa0] sm:$0xff]  }
 0x209   : > { %9319 = vmatprep.subr.bf16.mxu0 %v10313_v15 }
 0x20c   : > { %9320 = vmatpush3.bf16.msra.mxu0 %v10313_v15  ;;  %v13926_v15 = vld [vmem:[#allocation53_spill] sm:$0xff] }
 0x20d   : > { %8838 = vmatmul.mubr.msk.bf16.gmra.mrb[20].mxu1 %vm538_vm1, %v11290_v62  ;;  %9353 = vmatprep.subr.bf16.mxu0 %v10315_v37 }
 0x20e   : > { %8841 = vmatprep.mubr.msk.bf16.mxu1 %vm538_vm1, %v11301_v19 }
 0x20f   : > { %9290 = vmatmul.mubr.msk.bf16.gmra.mrb[4].mxu0 %vm538_vm1, %v11022_v7 }
 0x210   : > { %9293 = vmatprep.mubr.msk.bf16.mxu0 %vm538_vm1, %v11031_v12 }
 0x215   : > { %8842 = vmatmul.mubr.msk.bf16.gmra.mrb[24].mxu1 %vm538_vm1, %v11306_v58 }
 0x216   : > { %8845 = vmatprep.mubr.msk.bf16.mxu1 %vm538_vm1, %v11310_v3 }
 0x217   : > { %9294 = vmatmul.mubr.msk.bf16.gmra.mrb[8].mxu0 %vm538_vm1, %v11048_v9 }
 0x218   : > { %9297 = vmatprep.mubr.msk.bf16.mxu0 %vm538_vm1, %v11062_v23 }
 0x21d   : > { %8846 = vmatmul.mubr.msk.bf16.gmra.mrb[28].mxu1 %vm538_vm1, %v11731_v46 }
 0x21e   : > { %8853 = vmatprep.mubr.msk.bf16.mxu1 %vm538_vm1, %v13922_v43  ;;  %v13927_v43 = vld [vmem:[#allocation54_spill] sm:$0xff] }
 0x21f   : > { %9298 = vmatmul.mubr.msk.bf16.gmra.mrb[12].mxu0 %vm538_vm1, %v11069_v8 }
 0x220   : > { %9301 = vmatprep.mubr.msk.bf16.mxu0 %vm538_vm1, %v13886_v51 }
 0x225   : > { %8854 = vmatmul.mubr.msk.bf16.vlgmr.msra.gmra.mrb[0].mxu1 %vm538_vm1, %v13923_v55  ;;  %v13928_v55 = vld [vmem:[#allocation24_spill] sm:$0xff] }
 0x226   : > { %8886 = vmatpush3.bf16.msra.mxu1 %v10312_v10  ;;  %8857 = vmatprep.mubr.msk.bf16.mxu1 %vm538_vm1, %v13849_v45  ;;  %v13924_v45 = vld [vmem:[#allocation23_spill] sm:$0xff]  ;;  %v13925_v10 = vld [vmem:[#allocation20_spill] sm:$0xff] }
 0x227   : > { %8887 = vmatprep.subr.bf16.mxu1 %v10314_v35  ;;  %9302 = vmatmul.mubr.msk.bf16.gmra.mrb[16].mxu0 %vm538_vm1, %v13887_v60 }
 0x228   : > { %9305 = vmatprep.mubr.msk.bf16.mxu0 %vm538_vm1, %v13890_v16 }
 0x22a   : > { %8888 = vmatpush3.bf16.msra.mxu1 %v10314_v35  ;;  %v10317_v35 = vld [vmem:[%s13560_s1 + $0x168] sm:$0xff]  }
 0x22b   : > { %8921 = vmatprep.subr.bf16.mxu1 %v10316_v44 }
 0x22d   : > { %8858 = vmatmul.mubr.msk.bf16.gmra.mrb[4].mxu1 %vm538_vm1, %v13850_v27 }
 0x22e   : > { %8861 = vmatprep.mubr.msk.bf16.mxu1 %vm538_vm1, %v13885_v25 }
 0x22f   : > { %9306 = vmatmul.mubr.msk.bf16.gmra.mrb[20].mxu0 %vm538_vm1, %v13891_v42 }
 0x230   : > { %9309 = vmatprep.mubr.msk.bf16.mxu0 %vm538_vm1, %v13894_v14 }
 0x235   : > { %8862 = vmatmul.mubr.msk.bf16.gmra.mrb[8].mxu1 %vm538_vm1, %v13888_v0 }
 0x236   : > { %8865 = vmatprep.mubr.msk.bf16.mxu1 %vm538_vm1, %v13889_v24 }
 0x237   : > { %9310 = vmatmul.mubr.msk.bf16.gmra.mrb[24].mxu0 %vm538_vm1, %v13924_v45 }
 0x238   : > { %9313 = vmatprep.mubr.msk.bf16.mxu0 %vm538_vm1, %v13925_v10  ;;  %v13929_v10 = vld [vmem:[#allocation28_spill] sm:$0xff] }
 0x23d   : > { %8866 = vmatmul.mubr.msk.bf16.gmra.mrb[12].mxu1 %vm538_vm1, %v13892_v29 }
 0x23e   : > { %8869 = vmatprep.mubr.msk.bf16.mxu1 %vm538_vm1, %v13893_v40 }
 0x23f   : > { %9314 = vmatmul.mubr.msk.bf16.gmra.mrb[28].mxu0 %vm538_vm1, %v5433_v50  ;;  %v10319_v50 = vld [vmem:[%s13560_s1 + $0x170] sm:$0xff]  }
 0x240   : > { %9321 = vmatprep.mubr.msk.bf16.mxu0 %vm538_vm1, %v13902_v20 }
 0x245   : > { %8870 = vmatmul.mubr.msk.bf16.gmra.mrb[16].mxu1 %vm538_vm1, %v13926_v15 }
 0x246   : > { %8873 = vmatprep.mubr.msk.bf16.mxu1 %vm538_vm1, %v13927_v43 }
 0x247   : > { %9322 = vmatmul.mubr.msk.bf16.vlgmr.msra.gmra.mrb[0].mxu0 %vm538_vm1, %v13928_v55  ;;  %v13935_v55 = vld [vmem:[#allocation59_spill] sm:$0xff] }
 0x248   : > { %9354 = vmatpush3.bf16.msra.mxu0 %v10315_v37  ;;  %9325 = vmatprep.mubr.msk.bf16.mxu0 %vm538_vm1, %v13929_v10  ;;  %v13932_v37 = vld [vmem:[#allocation58_spill] sm:$0xff]  ;;  %v13933_v10 = vld [vmem:[#allocation63_spill] sm:$0xff] }
 0x249   : > { %9355 = vmatprep.subr.bf16.mxu0 %v10317_v35 }
 0x24c   : > { %9356 = vmatpush3.bf16.msra.mxu0 %v10317_v35  ;;  %v13934_v35 = vld [vmem:[#allocation65_spill] sm:$0xff] }
 0x24d   : > { %8874 = vmatmul.mubr.msk.bf16.gmra.mrb[20].mxu1 %vm538_vm1, %v13930_v33  ;;  %9389 = vmatprep.subr.bf16.mxu0 %v10319_v50 }
 0x24e   : > { %8877 = vmatprep.mubr.msk.bf16.mxu1 %vm538_vm1, %v13931_v6 }
 0x24f   : > { %9326 = vmatmul.mubr.msk.bf16.gmra.mrb[4].mxu0 %vm538_vm1, %v13905_v61 }
 0x250   : > { %9329 = vmatprep.mubr.msk.bf16.mxu0 %vm538_vm1, %v13869_v57  ;;  %v13936_v57 = vld [vmem:[#allocation5_spill] sm:$0xff] }
 0x255   : > { %8878 = vmatmul.mubr.msk.bf16.gmra.mrb[24].mxu1 %vm538_vm1, %v13932_v37 }
 0x256   : > { %8881 = vmatprep.mubr.msk.bf16.mxu1 %vm538_vm1, %v13933_v10 }
 0x257   : > { %9330 = vmatmul.mubr.msk.bf16.gmra.mrb[8].mxu0 %vm538_vm1, %v13909_v11  ;;  %v10318_v11 = vld [vmem:[%s13560_s1 + $0xa8] sm:$0xff]  }
 0x258   : > { %9333 = vmatprep.mubr.msk.bf16.mxu0 %vm538_vm1, %v13910_v28 }
 0x25d   : > { %8882 = vmatmul.mubr.msk.bf16.gmra.mrb[28].mxu1 %vm538_vm1, %v13934_v35 }
 0x25e   : > { %8889 = vmatprep.mubr.msk.bf16.mxu1 %vm538_vm1, %v13935_v55  ;;  %v10320_v55 = vld [vmem:[%s13560_s1 + $0xb0] sm:$0xff]  }
 0x25f   : > { %9334 = vmatmul.mubr.msk.bf16.gmra.mrb[12].mxu0 %vm538_vm1, %v13911_v63 }
 0x260   : > { %9337 = vmatprep.mubr.msk.bf16.mxu0 %vm538_vm1, %v13913_v54  ;;  %v13940_v54 = vld [vmem:[#allocation60_spill] sm:$0xff] }
 0x265   : > { %8890 = vmatmul.mubr.msk.bf16.vlgmr.msra.gmra.mrb[0].mxu1 %vm538_vm1, %v13936_v57  ;;  %v5650_v57 = vrot.slane %v11993_v32, 1 }
 0x266   : > { %8922 = vmatpush3.bf16.msra.mxu1 %v10316_v44  ;;  %8893 = vmatprep.mubr.msk.bf16.mxu1 %vm538_vm1, %v11082_v2  ;;  %v12068_v2 = vld [vmem:[%s10510_s30 + $0x1d8] sm:$0xf]  ;;  %s10341_s30 = sshll.u32 %s10401_s16, 4  ;;  %s10342_s30 = int_to_ptr.vmem [resolvable:$false] %s10341_s30 }
 0x267   : > { %8923 = vmatprep.subr.bf16.mxu1 %v10318_v11  ;;  %9338 = vmatmul.mubr.msk.bf16.gmra.mrb[16].mxu0 %vm538_vm1, %v13914_v5  ;;  %v5653_v44 = vrot.slane %v12068_v2, 1  ;;  %v13938_v5 = vld [vmem:[#allocation62_spill] sm:$0xff]  ;;  %s10343_s17 = scalar_lea.vmem %s10342_s30, 8192  ;;  %p10344_p0 = scmp.lt.s32.totalorder %s13486_s10, %s10342_s30 }
 0x268   : > { %9341 = vmatprep.mubr.msk.bf16.mxu0 %vm538_vm1, %v13915_v38  ;;  %v13937_v38 = vld [vmem:[#allocation19_spill] sm:$0xff]  ;;  %p10345_p1 = scmp.lt.s32.totalorder %s10343_s17, %s10337_s15 }
 0x26a   : > { %8924 = vmatpush3.bf16.msra.mxu1 %v10318_v11  ;;  %v5651_v11 = vrot.slane %v11996_v31, 1  ;;  %p10346_p2 = por %p10345_p1, %p10344_p0 }
 0x26b   : > { %8957 = vmatprep.subr.bf16.mxu1 %v10320_v55 }
 0x26c   : > { %p10347_p3 = pnand %p10346_p2, %p10340_p13 }
 0x26d   : > { %8894 = vmatmul.mubr.msk.bf16.gmra.mrb[4].mxu1 %vm538_vm1, %v13912_v36 }
 0x26e   : > { %8897 = vmatprep.mubr.msk.bf16.mxu1 %vm538_vm1, %v11098_v48  ;;  %v5654_v48 = vsel %vm392_vm0, %v5651_v11, %v5653_v44 }
 0x26f   : > { %9342 = vmatmul.mubr.msk.bf16.gmra.mrb[20].mxu0 %vm538_vm1, %v13916_v30  ;;  %v13939_v30 = vld [vmem:[#allocation22_spill] sm:$0xff] }
 0x270   : > { %9345 = vmatprep.mubr.msk.bf16.mxu0 %vm538_vm1, %v11633_v13  ;;  %v5652_v13 = vsel %vm392_vm0, %v5650_v57, %v5651_v11 }
 0x275   : > { %8898 = vmatmul.mubr.msk.bf16.gmra.mrb[8].mxu1 %vm538_vm1, %v11125_v39  ;;  %v5657_v39 = vpack.c.bf16 %v5654_v48, %v5652_v13  ;;  %v10321_v48 = vld [vmem:[%s13560_s1 + $0x178] sm:$0xff]  }
 0x276   : > { %8901 = vmatprep.mubr.msk.bf16.mxu1 %vm538_vm1, %v13937_v38  ;;  %v13942_v13 = vld [vmem:[#allocation64_spill] sm:$0xff] }
 0x277   : > { %9346 = vmatmul.mubr.msk.bf16.gmra.mrb[24].mxu0 %vm538_vm1, %v13938_v5 }
 0x278   : > { %9349 = vmatprep.mubr.msk.bf16.mxu0 %vm538_vm1, %v13939_v30  ;;  %v13945_v30 = vld [vmem:[#allocation8_spill] sm:$0xff] }
 0x27d   : > { %8902 = vmatmul.mubr.msk.bf16.gmra.mrb[12].mxu1 %vm538_vm1, %v13940_v54 }
 0x27e   : > { %8905 = vmatprep.mubr.msk.bf16.mxu1 %vm538_vm1, %v11189_v59 }
 0x27f   : > { %9350 = vmatmul.mubr.msk.bf16.gmra.mrb[28].mxu0 %vm538_vm1, %v5657_v39  ;;  %v10323_v39 = vld [vmem:[%s13560_s1 + $0x180] sm:$0xff]  }
 0x280   : > { %9357 = vmatprep.mubr.msk.bf16.mxu0 %vm538_vm1, %v13831_v26  ;;  %v13941_v26 = vld [vmem:[#allocation34_spill] sm:$0xff] }
 0x285   : > { %8906 = vmatmul.mubr.msk.bf16.gmra.mrb[16].mxu1 %vm538_vm1, %v11200_v56 }
 0x286   : > { %8909 = vmatprep.mubr.msk.bf16.mxu1 %vm538_vm1, %v11217_v41 }
 0x287   : > { %9358 = vmatmul.mubr.msk.bf16.vlgmr.msra.gmra.mrb[0].mxu0 %vm538_vm1, %v13835_v34  ;;  %v13943_v34 = vld [vmem:[#allocation66_spill] sm:$0xff] }
 0x288   : > { %9390 = vmatpush3.bf16.msra.mxu0 %v10319_v50  ;;  %9361 = vmatprep.mubr.msk.bf16.mxu0 %vm538_vm1, %v13840_v49  ;;  %v13944_v49 = vld [vmem:[#allocation67_spill] sm:$0xff]  ;;  %v5872_v50 = vrot.slane %v11996_v31, 2 }
 0x289   : > { %9391 = vmatprep.subr.bf16.mxu0 %v10321_v48 }
 0x28c   : > { %9392 = vmatpush3.bf16.msra.mxu0 %v10321_v48 }
 0x28d   : > { %8910 = vmatmul.mubr.msk.bf16.gmra.mrb[20].mxu1 %vm538_vm1, %v13941_v26  ;;  %9425 = vmatprep.subr.bf16.mxu0 %v10323_v39 }
 0x28e   : > { %8913 = vmatprep.mubr.msk.bf16.mxu1 %vm538_vm1, %v13942_v13 }
 0x28f   : > { %9362 = vmatmul.mubr.msk.bf16.gmra.mrb[4].mxu0 %vm538_vm1, %v13842_v52  ;;  %v10322_v52 = vld [vmem:[%s13560_s1 + $0xb8] sm:$0xff]  }
 0x290   : > { %9365 = vmatprep.mubr.msk.bf16.mxu0 %vm538_vm1, %v13843_v18  ;;  %v10335_v18 = vld [vmem:[%s13560_s1 + $0xc0] sm:$0xff]  }
 0x295   : > { %8914 = vmatmul.mubr.msk.bf16.gmra.mrb[24].mxu1 %vm538_vm1, %v13943_v34 }
 0x296   : > { %8917 = vmatprep.mubr.msk.bf16.mxu1 %vm538_vm1, %v13944_v49 }
 0x297   : > { %9366 = vmatmul.mubr.msk.bf16.gmra.mrb[8].mxu0 %vm538_vm1, %v13845_v4  ;;  %v13946_v4 = vld [vmem:[#allocation46_spill] sm:$0xff] }
 0x298   : > { %9369 = vmatprep.mubr.msk.bf16.mxu0 %vm538_vm1, %v11272_v47 }
 0x29d   : > { %8918 = vmatmul.mubr.msk.bf16.gmra.mrb[28].mxu1 %vm538_vm1, %v13919_v17 }
 0x29e   : > { %8925 = vmatprep.mubr.msk.bf16.mxu1 %vm538_vm1, %v13945_v30 }
 0x29f   : > { %9370 = vmatmul.mubr.msk.bf16.gmra.mrb[12].mxu0 %vm538_vm1, %v11277_v53 }
 0x2a0   : > { %9373 = vmatprep.mubr.msk.bf16.mxu0 %vm538_vm1, %v11290_v62 }
 0x2a5   : > { %8926 = vmatmul.mubr.msk.bf16.vlgmr.msra.gmra.mrb[0].mxu1 %vm538_vm1, %v13946_v4 }
 0x2a6   : > { %8958 = vmatpush3.bf16.msra.mxu1 %v10320_v55  ;;  %8929 = vmatprep.mubr.msk.bf16.mxu1 %vm538_vm1, %v13846_v21  ;;  %v5871_v21 = vrot.slane %v11993_v32, 2  ;;  %v5874_v55 = vrot.slane %v12068_v2, 2 }
 0x2a7   : > { %8959 = vmatprep.subr.bf16.mxu1 %v10322_v52  ;;  %9374 = vmatmul.mubr.msk.bf16.gmra.mrb[16].mxu0 %vm538_vm1, %v11301_v19 }
 0x2a8   : > { %9377 = vmatprep.mubr.msk.bf16.mxu0 %vm538_vm1, %v11306_v58  ;;  %v5873_v57 = vsel %vm969_vm2, %v5871_v21, %v5872_v50  ;;  %v5875_v11 = vsel %vm969_vm2, %v5872_v50, %v5874_v55 }
 0x2aa   : > { %8960 = vmatpush3.bf16.msra.mxu1 %v10322_v52 }
 0x2ab   : > { %9461 = vmatprep.subr.bf16.mxu1 %v10335_v18 }
 0x2ad   : > { %8930 = vmatmul.mubr.msk.bf16.gmra.mrb[4].mxu1 %vm538_vm1, %v10983_v1  ;;  %v13947_v1 = vld [vmem:[#allocation26_spill] sm:$0xff] }
 0x2ae   : > { %8933 = vmatprep.mubr.msk.bf16.mxu1 %vm538_vm1, %v10997_v22  ;;  %v13948_v22 = vld [vmem:[#allocation29_spill] sm:$0xff] }
 0x2af   : > { %9378 = vmatmul.mubr.msk.bf16.gmra.mrb[20].mxu0 %vm538_vm1, %v11310_v3 }
 0x2b0   : > { %9381 = vmatprep.mubr.msk.bf16.mxu0 %vm538_vm1, %v11731_v46 }
 0x2b5   : > { %8934 = vmatmul.mubr.msk.bf16.gmra.mrb[8].mxu1 %vm538_vm1, %v11022_v7  ;;  %v5878_v7 = vpack.c.bf16 %v5875_v11, %v5873_v57 }
 0x2b6   : > { %8937 = vmatprep.mubr.msk.bf16.mxu1 %vm538_vm1, %v11031_v12  ;;  %v10324_v12 = vld [vmem:[%s13560_s1 + $0x188] sm:$0xff]  }
 0x2b7   : > { %9382 = vmatmul.mubr.msk.bf16.gmra.mrb[24].mxu0 %vm538_vm1, %v13947_v1 }
 0x2b8   : > { %9385 = vmatprep.mubr.msk.bf16.mxu0 %vm538_vm1, %v13948_v22 }
 0x2bd   : > { %8938 = vmatmul.mubr.msk.bf16.gmra.mrb[12].mxu1 %vm538_vm1, %v11048_v9  ;;  %v13949_v9 = vld [vmem:[#allocation15_spill] sm:$0xff] }
 0x2be   : > { %8941 = vmatprep.mubr.msk.bf16.mxu1 %vm538_vm1, %v11062_v23  ;;  %v13950_v23 = vld [vmem:[#allocation18_spill] sm:$0xff] }
 0x2bf   : > { %9386 = vmatmul.mubr.msk.bf16.gmra.mrb[28].mxu0 %vm538_vm1, %v5878_v7 }
 0x2c0   : > { %9393 = vmatprep.mubr.msk.bf16.mxu0 %vm538_vm1, %v13850_v27  ;;  %v13952_v27 = vld [vmem:[#allocation28_spill] sm:$0xff] }
 0x2c5   : > { %8942 = vmatmul.mubr.msk.bf16.gmra.mrb[16].mxu1 %vm538_vm1, %v11069_v8  ;;  %v10336_v8 = vld [vmem:[%s13560_s1 + $0xc8] sm:$0xff]  }
 0x2c6   : > { %8945 = vmatprep.mubr.msk.bf16.mxu1 %vm538_vm1, %v13886_v51  ;;  %v13953_v51 = vld [vmem:[#allocation31_spill] sm:$0xff] }
 0x2c7   : > { %9394 = vmatmul.mubr.msk.bf16.vlgmr.msra.gmra.mrb[0].mxu0 %vm538_vm1, %v13885_v25  ;;  %v6095_v25 = vrot.slane %v12068_v2, 3 }
 0x2c8   : > { %9426 = vmatpush3.bf16.msra.mxu0 %v10323_v39  ;;  %9397 = vmatprep.mubr.msk.bf16.mxu0 %vm538_vm1, %v13888_v0  ;;  %v13955_v0 = vld [vmem:[#allocation32_spill] sm:$0xff] }
 0x2c9   : > { %9427 = vmatprep.subr.bf16.mxu0 %v10324_v12 }
 0x2cc   : > { %9428 = vmatpush3.bf16.msra.mxu0 %v10324_v12 }
 0x2cd   : > { %8946 = vmatmul.mubr.msk.bf16.gmra.mrb[20].mxu1 %vm538_vm1, %v13887_v60  ;;  %v13954_v60 = vld [vmem:[#allocation68_spill] sm:$0xff] }
 0x2ce   : > { %8949 = vmatprep.mubr.msk.bf16.mxu1 %vm538_vm1, %v13890_v16 }
 0x2cf   : > { %9398 = vmatmul.mubr.msk.bf16.gmra.mrb[4].mxu0 %vm538_vm1, %v13889_v24 }
 0x2d0   : > { %9401 = vmatprep.mubr.msk.bf16.mxu0 %vm538_vm1, %v13892_v29  ;;  %v13957_v29 = vld [vmem:[#allocation41_spill] sm:$0xff] }
 0x2d5   : > { %8950 = vmatmul.mubr.msk.bf16.gmra.mrb[24].mxu1 %vm538_vm1, %v13891_v42  ;;  %v13956_v42 = vld [vmem:[#allocation35_spill] sm:$0xff] }
 0x2d6   : > { %8953 = vmatprep.mubr.msk.bf16.mxu1 %vm538_vm1, %v13894_v14  ;;  %v13959_v14 = vld [vmem:[#allocation16_spill] sm:$0xff] }
 0x2d7   : > { %9402 = vmatmul.mubr.msk.bf16.gmra.mrb[8].mxu0 %vm538_vm1, %v13893_v40  ;;  %v13958_v40 = vld [vmem:[#allocation27_spill] sm:$0xff] }
 0x2d8   : > { %9405 = vmatprep.mubr.msk.bf16.mxu0 %vm538_vm1, %v13926_v15 }
 0x2dd   : > { %8954 = vmatmul.mubr.msk.bf16.gmra.mrb[28].mxu1 %vm538_vm1, %v13924_v45  ;;  %v13960_v45 = vld [vmem:[#allocation44_spill] sm:$0xff] }
 0x2de   : > { %8961 = vmatprep.mubr.msk.bf16.mxu1 %vm538_vm1, %v13949_v9 }
 0x2df   : > { %9406 = vmatmul.mubr.msk.bf16.gmra.mrb[12].mxu0 %vm538_vm1, %v13927_v43 }
 0x2e0   : > { %9409 = vmatprep.mubr.msk.bf16.mxu0 %vm538_vm1, %v13930_v33  ;;  %v13951_v33 = vld [vmem:[#allocation24_spill] sm:$0xff] }
 0x2e5   : > { %8962 = vmatmul.mubr.msk.bf16.vlgmr.msra.gmra.mrb[0].mxu1 %vm538_vm1, %v13950_v23 }
 0x2e6   : > { %9463 = vmatpush3.bf16.msra.mxu1 %v10335_v18  ;;  %8965 = vmatprep.mubr.msk.bf16.mxu1 %vm538_vm1, %v13902_v20  ;;  %v6093_v20 = vrot.slane %v11996_v31, 3 }
 0x2e7   : > { %9462 = vmatprep.subr.bf16.mxu1 %v10336_v8  ;;  %9410 = vmatmul.mubr.msk.bf16.gmra.mrb[16].mxu0 %vm538_vm1, %v13931_v6  ;;  %v6092_v6 = vrot.slane %v11993_v32, 3 }
 0x2e8   : > { %9413 = vmatprep.mubr.msk.bf16.mxu0 %vm538_vm1, %v13932_v37  ;;  %v6096_v16 = vsel %vm1356_vm3, %v6093_v20, %v6095_v25 }
 0x2e9   : > { %v6094_v24 = vsel %vm1356_vm3, %v6092_v6, %v6093_v20 }
 0x2ea   : > { %9464 = vmatpush3.bf16.msra.mxu1 %v10336_v8 }
 0x2ed   : > { %8966 = vmatmul.mubr.msk.bf16.gmra.mrb[4].mxu1 %vm538_vm1, %v13951_v33 }
 0x2ee   : > { %8969 = vmatprep.mubr.msk.bf16.mxu1 %vm538_vm1, %v13952_v27 }
 0x2ef   : > { %9414 = vmatmul.mubr.msk.bf16.gmra.mrb[20].mxu0 %vm538_vm1, %v13933_v10 }
 0x2f0   : > { %9417 = vmatprep.mubr.msk.bf16.mxu0 %vm538_vm1, %v13934_v35 }
 0x2f5   : > { %8970 = vmatmul.mubr.msk.bf16.gmra.mrb[8].mxu1 %vm538_vm1, %v13905_v61  ;;  %v6099_v61 = vpack.c.bf16 %v6096_v16, %v6094_v24 }
 0x2f6   : > { %8973 = vmatprep.mubr.msk.bf16.mxu1 %vm538_vm1, %v13953_v51 }
 0x2f7   : > { %9418 = vmatmul.mubr.msk.bf16.gmra.mrb[24].mxu0 %vm538_vm1, %v13954_v60 }
 0x2f8   : > { %9421 = vmatprep.mubr.msk.bf16.mxu0 %vm538_vm1, %v13955_v0 }
 0x2fd   : > { %8974 = vmatmul.mubr.msk.bf16.gmra.mrb[12].mxu1 %vm538_vm1, %v13956_v42 }
 0x2fe   : > { %8977 = vmatprep.mubr.msk.bf16.mxu1 %vm538_vm1, %v13910_v28  ;;  %v13961_v28 = vld [vmem:[#allocation45_spill] sm:$0xff] }
 0x2ff   : > { %9422 = vmatmul.mubr.msk.bf16.gmra.mrb[28].mxu0 %vm538_vm1, %v6099_v61 }
 0x300   : > { %9429 = vmatprep.mubr.msk.bf16.mxu0 %vm538_vm1, %v13912_v36  ;;  %v13963_v36 = vld [vmem:[#allocation61_spill] sm:$0xff] }
 0x305   : > { %8978 = vmatmul.mubr.msk.bf16.gmra.mrb[16].mxu1 %vm538_vm1, %v13911_v63  ;;  %v13962_v63 = vld [vmem:[#allocation50_spill] sm:$0xff] }
 0x306   : > { %8981 = vmatprep.mubr.msk.bf16.mxu1 %vm538_vm1, %v13957_v29 }
 0x307   : > { %9430 = vmatmul.mubr.msk.bf16.vlgmr.msra.gmra.mrb[0].mxu0 %vm538_vm1, %v13958_v40 }
 0x308   : > { %9433 = vmatprep.mubr.msk.bf16.mxu0 %vm538_vm1, %v13959_v14 }
 0x30d   : > { %8982 = vmatmul.mubr.msk.bf16.gmra.mrb[20].mxu1 %vm538_vm1, %v13960_v45 }
 0x30e   : > { %8985 = vmatprep.mubr.msk.bf16.mxu1 %vm538_vm1, %v13961_v28 }
 0x30f   : > { %9434 = vmatmul.mubr.msk.bf16.gmra.mrb[4].mxu0 %vm538_vm1, %v13937_v38 }
 0x310   : > { %9437 = vmatprep.mubr.msk.bf16.mxu0 %vm538_vm1, %v13940_v54 }
 0x315   : > { %8986 = vmatmul.mubr.msk.bf16.gmra.mrb[24].mxu1 %vm538_vm1, %v13962_v63 }
 0x316   : > { %8989 = vmatprep.mubr.msk.bf16.mxu1 %vm538_vm1, %v13963_v36 }
 0x317   : > { %9438 = vmatmul.mubr.msk.bf16.gmra.mrb[8].mxu0 %vm538_vm1, %v11189_v59  ;;  %v6314_v59 = vrot.slane %v11996_v31, 4 }
 0x318   : > { %9441 = vmatprep.mubr.msk.bf16.mxu0 %vm538_vm1, %v11200_v56  ;;  %v6316_v56 = vrot.slane %v12068_v2, 4 }
 0x31d   : > { %8990 = vmatmul.mubr.msk.bf16.gmra.mrb[28].mxu1 %vm538_vm1, %v13938_v5 }
 0x31e   : > { %9013 = vmatprep.mubr.msk.bf16.mxu1 %vm538_vm1, %v11272_v47  ;;  %v13964_v47 = vld [vmem:[#allocation17_spill] sm:$0xff] }
 0x31f   : > { %9442 = vmatmul.mubr.msk.bf16.gmra.mrb[12].mxu0 %vm538_vm1, %v11217_v41  ;;  %v6313_v41 = vrot.slane %v11993_v32, 4  ;;  %v6534_v32 = vld [vmem:[%s13561_s2] sm:$0x1f] }
 0x320   : > { %9445 = vmatprep.mubr.msk.bf16.mxu0 %vm538_vm1, %v13941_v26 }
 0x325   : > { %9014 = vmatmul.mubr.msk.bf16.vlgmr.msra.gmra.mrb[16].mxu1 %vm538_vm1, %v11277_v53  ;;  %v13965_v53 = vld [vmem:[#allocation49_spill] sm:$0xff] }
 0x326   : > { %9017 = vmatprep.mubr.msk.bf16.mxu1 %vm538_vm1, %v11290_v62  ;;  %v6315_v62 = vsel %vm1743_vm4, %v6313_v41, %v6314_v59 }
 0x327   : > { %9446 = vmatmul.mubr.msk.bf16.gmra.mrb[16].mxu0 %vm538_vm1, %v13942_v13 }
 0x328   : > { %9449 = vmatprep.mubr.msk.bf16.mxu0 %vm538_vm1, %v13943_v34 }
 0x32d   : > { %9018 = vmatmul.mubr.msk.bf16.gmra.mrb[20].mxu1 %vm538_vm1, %v11301_v19  ;;  %v6317_v19 = vsel %vm1743_vm4, %v6314_v59, %v6316_v56 }
 0x32e   : > { %9021 = vmatprep.mubr.msk.bf16.mxu1 %vm538_vm1, %v11306_v58  ;;  %v6320_v58 = vpack.c.bf16 %v6317_v19, %v6315_v62 }
 0x32f   : > { %9450 = vmatmul.mubr.msk.bf16.gmra.mrb[20].mxu0 %vm538_vm1, %v13944_v49 }
 0x330   : > { %9453 = vmatprep.mubr.msk.bf16.mxu0 %vm538_vm1, %v13919_v17 }
 0x335   : > { %9022 = vmatmul.mubr.msk.bf16.gmra.mrb[24].mxu1 %vm538_vm1, %v11310_v3  ;;  %v6535_v3 = vlaneseq }
 0x336   : > { %9025 = vmatprep.mubr.msk.bf16.mxu1 %vm538_vm1, %v11731_v46 }
 0x337   : > { %9454 = vmatmul.mubr.msk.bf16.gmra.mrb[24].mxu0 %vm538_vm1, %v13964_v47  ;;  %v6536_v5 = vshrl.u32 %v6535_v3, 7 }
 0x338   : > { %9457 = vmatprep.mubr.msk.bf16.mxu0 %vm538_vm1, %v13965_v53 }
 0x339   : > { %v6811_v54 = vsub.s32 1, %v6536_v5  ;;  %v6847_v46 = vsub.s32 2, %v6536_v5  ;;  %v7345_v38 = vsub.s32 3, %v6536_v5  ;;  %v7381_v17 = vsub.s32 4, %v6536_v5 }
 0x33a   : > { %v6537_v55 = vsub.s32 0, %v6536_v5 }
 0x33b   : > { %v12311_v31 = vrot.slane %v6534_v32, %v6811_v54  ;;  %v12313_v15 = vrot.slane %v6534_v32, %v6847_v46  ;;  %v12315_v43 = vrot.slane %v6534_v32, %v7345_v38  ;;  %v12317_v10 = vrot.slane %v6534_v32, %v7381_v17 }
 0x33c   : > { %v12325_v22 = vrot.slane %v6534_v32, %v6537_v55 }
 0x33d   : > { %9026 = vmatmul.mubr.msk.bf16.gmra.mrb[28].mxu1 %vm538_vm1, %v13947_v1 }
 0x33f   : > { %9458 = vmatmul.mubr.msk.bf16.gmra.mrb[28].mxu0 %vm538_vm1, %v6320_v58 }
 0x3b8   : > { %v8963_v37 = vpop.f32.mrb[0].mxu1 }
 0x3b9   : > { %v3510_v35 = vpop.f32.mrb[1].mxu1 }
 0x3ba   : > { %v8964_v2 = vpop.f32.mrb[2].mxu1 }
 0x3bb   : > { %v3513_v44 = vpop.f32.mrb[3].mxu1 }
 0x3c0   : > { %v8967_v48 = vpop.f32.mrb[4].mxu1 }
 0x3c1   : > { %v3526_v39 = vpop.f32.mrb[5].mxu1 }
 0x3c2   : > { %v8968_v26 = vpop.f32.mrb[6].mxu1 }
 0x3c3   : > { %v3529_v13 = vpop.f32.mrb[7].mxu1 }
 0x3c8   : > { %v8971_v34 = vpop.f32.mrb[8].mxu1 }
 0x3c9   : > { %v3542_v49 = vpop.f32.mrb[9].mxu1 }
 0x3ca   : > { %v8972_v30 = vpop.f32.mrb[10].mxu1 }
 0x3cb   : > { %v3545_v52 = vpop.f32.mrb[11].mxu1 }
 0x3d0   : > { %v8975_v4 = vpop.f32.mrb[12].mxu1 }
 0x3d1   : > { %v12319_v18 = vpop.f32.mrb[13].mxu1 }
 0x3d2   : > { %v12321_v21 = vpop.f32.mrb[14].mxu1 }
 0x3d3   : > { %v12323_v50 = vpop.f32.mrb[15].mxu1 }
 0x3da   : > { %v9431_v1 = vpop.f32.mrb[0].mxu0 }
 0x3db   : > { %v9465_v57 = vadd.f32 %v9431_v1, %v8963_v37  ;;  %v6375_v11 = vpop.f32.mrb[1].mxu0 }
 0x3dc   : > { %v9466_v7 = vadd.f32 %v6375_v11, %v3510_v35  ;;  %v9432_v12 = vpop.f32.mrb[2].mxu0 }
 0x3dd   : > { %v9467_v9 = vadd.f32 %v9432_v12, %v8964_v2  ;;  %v6378_v23 = vpop.f32.mrb[3].mxu0  ;;  %v12331_v27 = vadd.f32 %v9465_v57, %v12325_v22 }
 0x3de   : > { %v12328_v8 = vadd.f32 %v9466_v7, %v12325_v22  ;;  %v9468_v33 = vadd.f32 %v6378_v23, %v3513_v44 }
 0x3df   : > { %v12339_v25 = vadd.f32 %v9467_v9, %v12325_v22  ;;  %v6574_v61 = vsel %vm538_vm1, %v12331_v27, 0.0 }
 0x3e0   : > { %v12334_v6 = vadd.f32 %v9468_v33, %v12325_v22  ;;  %v6571_v20 = vsel %vm538_vm1, %v12328_v8, 0.0 }
 0x3e1   : > { %v6576_v28 = vsel %vm538_vm1, %v12339_v25, 0.0 }
 0x3e2   : > { %v6572_v51 = vsel %vm538_vm1, %v12334_v6, 0.0  ;;  %v9435_v60 = vpop.f32.mrb[4].mxu0 }
 0x3e3   : > { %v6573_v0 = vadd.f32 %v6572_v51, %v6571_v20  ;;  %v9469_v24 = vadd.f32 %v9435_v60, %v8967_v48  ;;  %v6391_v16 = vpop.f32.mrb[5].mxu0 }
 0x3e4   : > { %v9470_v42 = vadd.f32 %v6391_v16, %v3526_v39  ;;  %v9436_v29 = vpop.f32.mrb[6].mxu0 }
 0x3e5   : > { %v6575_v40 = vadd.f32 %v6574_v61, %v6573_v0  ;;  %v9471_v14 = vadd.f32 %v9436_v29, %v8968_v26  ;;  %v6394_v45 = vpop.f32.mrb[7].mxu0  ;;  %v12351_v59 = vadd.f32 %v9469_v24, %v12325_v22 }
 0x3e6   : > { %v12348_v63 = vadd.f32 %v9470_v42, %v12325_v22  ;;  %v9472_v36 = vadd.f32 %v6394_v45, %v3529_v13 }
 0x3e7   : > { %v6577_v41 = vadd.f32 %v6576_v28, %v6575_v40  ;;  %v12359_v62 = vadd.f32 %v9471_v14, %v12325_v22  ;;  %v6582_v46 = vsel %vm538_vm1, %v12351_v59, 0.0 }
 0x3e8   : > { %v6578_v56 = vsel %vm538_vm1, %v12348_v63, 0.0  ;;  %v12356_v47 = vadd.f32 %v9472_v36, %v12325_v22 }
 0x3e9   : > { %v6579_v53 = vadd.f32 %v6578_v56, %v6577_v41  ;;  %v6584_v2 = vsel %vm538_vm1, %v12359_v62, 0.0 }
 0x3ea   : > { %v6580_v19 = vsel %vm538_vm1, %v12356_v47, 0.0  ;;  %v9439_v58 = vpop.f32.mrb[8].mxu0 }
 0x3eb   : > { %v6581_v3 = vadd.f32 %v6580_v19, %v6579_v53  ;;  %v9473_v5 = vadd.f32 %v9439_v58, %v8971_v34  ;;  %v6407_v54 = vpop.f32.mrb[9].mxu0 }
 0x3ec   : > { %v9474_v38 = vadd.f32 %v6407_v54, %v3542_v49  ;;  %v9440_v17 = vpop.f32.mrb[10].mxu0 }
 0x3ed   : > { %v6583_v32 = vadd.f32 %v6582_v46, %v6581_v3  ;;  %v9475_v37 = vadd.f32 %v9440_v17, %v8972_v30  ;;  %v6410_v35 = vpop.f32.mrb[11].mxu0  ;;  %v12371_v26 = vadd.f32 %v9473_v5, %v12325_v22 }
 0x3ee   : > { %v12368_v44 = vadd.f32 %v9474_v38, %v12325_v22  ;;  %v9476_v48 = vadd.f32 %v6410_v35, %v3545_v52 }
 0x3ef   : > { %v6585_v39 = vadd.f32 %v6584_v2, %v6583_v32  ;;  %v12379_v30 = vadd.f32 %v9475_v37, %v12325_v22  ;;  %v6590_v7 = vsel %vm538_vm1, %v12371_v26, 0.0 }
 0x3f0   : > { %v6586_v13 = vsel %vm538_vm1, %v12368_v44, 0.0  ;;  %v12376_v34 = vadd.f32 %v9476_v48, %v12325_v22 }
 0x3f1   : > { %v6587_v49 = vadd.f32 %v6586_v13, %v6585_v39  ;;  %v6592_v51 = vsel %vm538_vm1, %v12379_v30, 0.0 }
 0x3f2   : > { %v6588_v55 = vsel %vm538_vm1, %v12376_v34, 0.0  ;;  %v9443_v1 = vpop.f32.mrb[12].mxu0 }
 0x3f3   : > { %v6589_v57 = vadd.f32 %v6588_v55, %v6587_v49  ;;  %v9477_v52 = vadd.f32 %v9443_v1, %v8975_v4  ;;  %v6423_v11 = vpop.f32.mrb[13].mxu0 }
 0x3f4   : > { %v9478_v12 = vadd.f32 %v6423_v11, %v12319_v18  ;;  %v9444_v9 = vpop.f32.mrb[14].mxu0 }
 0x3f5   : > { %v6591_v23 = vadd.f32 %v6590_v7, %v6589_v57  ;;  %v9479_v33 = vadd.f32 %v9444_v9, %v12321_v21  ;;  %v6426_v20 = vpop.f32.mrb[15].mxu0  ;;  %v12394_v16 = vadd.f32 %v9477_v52, %v12325_v22 }
 0x3f6   : > { %v12390_v60 = vadd.f32 %v9478_v12, %v12325_v22  ;;  %v9480_v0 = vadd.f32 %v6426_v20, %v12323_v50 }
 0x3f7   : > { %v6593_v4 = vadd.f32 %v6592_v51, %v6591_v23  ;;  %v12402_v40 = vadd.f32 %v9479_v33, %v12325_v22  ;;  %v6598_v56 = vsel %vm538_vm1, %v12394_v16, 0.0 }
 0x3f8   : > { %v9015_v24 = vpop.f32.mrb[16].mxu1  ;;  %v6594_v18 = vsel %vm538_vm1, %v12390_v60, 0.0  ;;  %v12399_v61 = vadd.f32 %v9480_v0, %v12325_v22 }
 0x3f9   : > { %v3795_v21 = vpop.f32.mrb[17].mxu1  ;;  %v6595_v42 = vadd.f32 %v6594_v18, %v6593_v4  ;;  %v6600_v54 = vsel %vm538_vm1, %v12402_v40, 0.0 }
 0x3fa   : > { %v9016_v29 = vpop.f32.mrb[18].mxu1  ;;  %v6596_v50 = vsel %vm538_vm1, %v12399_v61, 0.0  ;;  %v9447_v14 = vpop.f32.mrb[16].mxu0 }
 0x3fb   : > { %v3798_v45 = vpop.f32.mrb[19].mxu1  ;;  %v6597_v28 = vadd.f32 %v6596_v50, %v6595_v42  ;;  %v9481_v36 = vadd.f32 %v9447_v14, %v9015_v24  ;;  %v6439_v41 = vpop.f32.mrb[17].mxu0 }
 0x3fc   : > { %v9482_v53 = vadd.f32 %v6439_v41, %v3795_v21  ;;  %v9448_v19 = vpop.f32.mrb[18].mxu0 }
 0x3fd   : > { %v6599_v58 = vadd.f32 %v6598_v56, %v6597_v28  ;;  %v9483_v3 = vadd.f32 %v9448_v19, %v9016_v29  ;;  %v6442_v5 = vpop.f32.mrb[19].mxu0  ;;  %v12414_v37 = vadd.f32 %v9481_v36, %v12325_v22 }
 0x3fe   : > { %v12411_v46 = vadd.f32 %v9482_v53, %v12325_v22  ;;  %v9484_v38 = vadd.f32 %v6442_v5, %v3798_v45 }
 0x3ff   : > { %v6601_v17 = vadd.f32 %v6600_v54, %v6599_v58  ;;  %v12422_v49 = vadd.f32 %v9483_v3, %v12325_v22  ;;  %v6606_v12 = vsel %vm538_vm1, %v12414_v37, 0.0 }
 0x400   : > { %v9019_v32 = vpop.f32.mrb[20].mxu1  ;;  %v6602_v35 = vsel %vm538_vm1, %v12411_v46, 0.0  ;;  %v12419_v2 = vadd.f32 %v9484_v38, %v12325_v22 }
 0x401   : > { %v3811_v48 = vpop.f32.mrb[21].mxu1  ;;  %v6603_v39 = vadd.f32 %v6602_v35, %v6601_v17  ;;  %v6608_v0 = vsel %vm538_vm1, %v12422_v49, 0.0 }
 0x402   : > { %v9020_v13 = vpop.f32.mrb[22].mxu1  ;;  %v6604_v55 = vsel %vm538_vm1, %v12419_v2, 0.0  ;;  %v9451_v1 = vpop.f32.mrb[20].mxu0 }
 0x403   : > { %v3814_v57 = vpop.f32.mrb[23].mxu1  ;;  %v6605_v52 = vadd.f32 %v6604_v55, %v6603_v39  ;;  %v9485_v11 = vadd.f32 %v9451_v1, %v9019_v32  ;;  %v6455_v7 = vpop.f32.mrb[21].mxu0 }
 0x404   : > { %v9486_v9 = vadd.f32 %v6455_v7, %v3811_v48  ;;  %v9452_v23 = vpop.f32.mrb[22].mxu0 }
 0x405   : > { %v6607_v33 = vadd.f32 %v6606_v12, %v6605_v52  ;;  %v9487_v20 = vadd.f32 %v9452_v23, %v9020_v13  ;;  %v6458_v51 = vpop.f32.mrb[23].mxu0  ;;  %v12434_v42 = vadd.f32 %v9485_v11, %v12325_v22 }
 0x406   : > { %v12431_v4 = vadd.f32 %v9486_v9, %v12325_v22  ;;  %v9488_v24 = vadd.f32 %v6458_v51, %v3814_v57 }
 0x407   : > { %v6609_v18 = vadd.f32 %v6608_v0, %v6607_v33  ;;  %v12442_v36 = vadd.f32 %v9487_v20, %v12325_v22  ;;  %v6614_v5 = vsel %vm538_vm1, %v12434_v42, 0.0 }
 0x408   : > { %v9023_v21 = vpop.f32.mrb[24].mxu1  ;;  %v6610_v29 = vsel %vm538_vm1, %v12431_v4, 0.0  ;;  %v12439_v50 = vadd.f32 %v9488_v24, %v12325_v22 }
 0x409   : > { %v3827_v14 = vpop.f32.mrb[25].mxu1  ;;  %v6611_v45 = vadd.f32 %v6610_v29, %v6609_v18  ;;  %v6616_v48 = vsel %vm538_vm1, %v12442_v36, 0.0 }
 0x40a   : > { %v9024_v28 = vpop.f32.mrb[26].mxu1  ;;  %v6612_v41 = vsel %vm538_vm1, %v12439_v50, 0.0  ;;  %v9455_v56 = vpop.f32.mrb[24].mxu0 }
 0x40b   : > { %v3830_v53 = vpop.f32.mrb[27].mxu1  ;;  %v6613_v19 = vadd.f32 %v6612_v41, %v6611_v45  ;;  %v9489_v58 = vadd.f32 %v9455_v56, %v9023_v21  ;;  %v6471_v3 = vpop.f32.mrb[25].mxu0 }
 0x40c   : > { %v9490_v54 = vadd.f32 %v6471_v3, %v3827_v14  ;;  %v9456_v38 = vpop.f32.mrb[26].mxu0 }
 0x40d   : > { %v6615_v17 = vadd.f32 %v6614_v5, %v6613_v19  ;;  %v9491_v32 = vadd.f32 %v9456_v38, %v9024_v28  ;;  %v6474_v35 = vpop.f32.mrb[27].mxu0  ;;  %v6565_v57 = vadd.f32 %v9489_v58, %v12325_v22 }
 0x40e   : > { %v6563_v39 = vadd.f32 %v9490_v54, %v12325_v22  ;;  %v9492_v13 = vadd.f32 %v6474_v35, %v3830_v53 }
 0x40f   : > { %v6617_v55 = vadd.f32 %v6616_v48, %v6615_v17  ;;  %v6566_v23 = vadd.f32 %v9491_v32, %v12325_v22  ;;  %v6622_v21 = vsel %vm538_vm1, %v6565_v57, 0.0 }
 0x410   : > { %v9027_v1 = vpop.f32.mrb[28].mxu1  ;;  %v6618_v52 = vsel %vm538_vm1, %v6563_v39, 0.0  ;;  %v6564_v11 = vadd.f32 %v9492_v13, %v12325_v22 }
 0x411   : > { %v3843_v7 = vpop.f32.mrb[29].mxu1  ;;  %v6619_v12 = vadd.f32 %v6618_v52, %v6617_v55  ;;  %v6624_v56 = vsel %vm538_vm1, %v6566_v23, 0.0 }
 0x412   : > { %v9028_v9 = vpop.f32.mrb[30].mxu1  ;;  %v6620_v33 = vsel %vm538_vm1, %v6564_v11, 0.0  ;;  %v9459_v20 = vpop.f32.mrb[28].mxu0 }
 0x413   : > { %v3846_v51 = vpop.f32.mrb[31].mxu1  ;;  %v6621_v0 = vadd.f32 %v6620_v33, %v6619_v12  ;;  %v9493_v24 = vadd.f32 %v9459_v20, %v9027_v1  ;;  %v6487_v18 = vpop.f32.mrb[29].mxu0 }
 0x414   : > { %v9494_v29 = vadd.f32 %v6487_v18, %v3843_v7  ;;  %v9460_v14 = vpop.f32.mrb[30].mxu0 }
 0x415   : > { %v6623_v45 = vadd.f32 %v6622_v21, %v6621_v0  ;;  %v9495_v28 = vadd.f32 %v9460_v14, %v9028_v9  ;;  %v6490_v41 = vpop.f32.mrb[31].mxu0  ;;  %v6569_v3 = vadd.f32 %v9493_v24, %v12325_v22 }
 0x416   : > { %v6567_v53 = vadd.f32 %v9494_v29, %v12325_v22  ;;  %v9496_v19 = vadd.f32 %v6490_v41, %v3846_v51 }
 0x417   : > { %v6625_v58 = vadd.f32 %v6624_v56, %v6623_v45  ;;  %v6570_v17 = vadd.f32 %v9495_v28, %v12325_v22  ;;  %v6630_v48 = vsel %vm538_vm1, %v6569_v3, 0.0 }
 0x418   : > { %v6626_v5 = vsel %vm538_vm1, %v6567_v53, 0.0  ;;  %v6568_v54 = vadd.f32 %v9496_v19, %v12325_v22 }
 0x419   : > { %v6627_v38 = vadd.f32 %v6626_v5, %v6625_v58  ;;  %v6632_v55 = vsel %vm538_vm1, %v6570_v17, 0.0 }
 0x41a   : > { %v6628_v32 = vsel %vm538_vm1, %v6568_v54, 0.0 }
 0x41b   : > { %v6629_v35 = vadd.f32 %v6628_v32, %v6627_v38 }
 0x41d   : > { %v6631_v13 = vadd.f32 %v6630_v48, %v6629_v35 }
 0x41f   : > { %v6633_v1 = vadd.f32 %v6632_v55, %v6631_v13 }
 0x421   : > { %v6634_v52 = vrot.slane %v6633_v1, 4 }
 0x423   : > { %v6635_v7 = vadd.f32 %v6634_v52, %v6633_v1 }
 0x425   : > { %v6636_v12 = vrot.slane %v6635_v7, 2 }
 0x427   : > { %v6637_v9 = vadd.f32 %v6636_v12, %v6635_v7 }
 0x429   : > { %v6638_v33 = vrot.slane %v6637_v9, 1 }
 0x42b   : > { %v6639_v20 = vadd.f32 %v6638_v33, %v6637_v9 }
 0x42d   : > { %v6640_v51 = vmul.f32 0.00390625, %v6639_v20 }
 0x42f   : > { %v12467_v0 = vsub.f32 %v12376_v34, %v6640_v51  ;;  %v12470_v22 = vsub.f32 %v12379_v30, %v6640_v51  ;;  %v12473_v24 = vsub.f32 %v12390_v60, %v6640_v51  ;;  %v12476_v18 = vsub.f32 %v12399_v61, %v6640_v51 }
 0x430   : > { %v12479_v21 = vsub.f32 %v12394_v16, %v6640_v51  ;;  %v12482_v29 = vsub.f32 %v12402_v40, %v6640_v51  ;;  %v12485_v14 = vsub.f32 %v12411_v46, %v6640_v51  ;;  %v12488_v34 = vsub.f32 %v12419_v2, %v6640_v51 }
 0x431   : > { %v12491_v30 = vsub.f32 %v12414_v37, %v6640_v51  ;;  %v12494_v60 = vsub.f32 %v12422_v49, %v6640_v51  ;;  %v12497_v61 = vsub.f32 %v12431_v4, %v6640_v51  ;;  %v12500_v16 = vsub.f32 %v12439_v50, %v6640_v51 }
 0x432   : > { %v12503_v40 = vsub.f32 %v12434_v42, %v6640_v51  ;;  %v12506_v46 = vsub.f32 %v12442_v36, %v6640_v51  ;;  %v12508_v2 = vsub.f32 %v6563_v39, %v6640_v51  ;;  %v12510_v45 = vsub.f32 %v6564_v11, %v6640_v51 }
 0x433   : > { %v12512_v37 = vsub.f32 %v6565_v57, %v6640_v51  ;;  %v12514_v49 = vsub.f32 %v6566_v23, %v6640_v51  ;;  %v12516_v28 = vsub.f32 %v6567_v53, %v6640_v51  ;;  %v12518_v4 = vsub.f32 %v6568_v54, %v6640_v51 }
 0x434   : > { %v12520_v50 = vsub.f32 %v6569_v3, %v6640_v51  ;;  %v12522_v41 = vsub.f32 %v6570_v17, %v6640_v51  ;;  %v12525_v42 = vsub.f32 %v12328_v8, %v6640_v51  ;;  %v12528_v36 = vsub.f32 %v12334_v6, %v6640_v51 }
 0x435   : > { %v12531_v39 = vsub.f32 %v12331_v27, %v6640_v51  ;;  %v12534_v57 = vsub.f32 %v12339_v25, %v6640_v51  ;;  %v12541_v56 = vsub.f32 %v12348_v63, %v6640_v51  ;;  %v12546_v6 = vsub.f32 %v12356_v47, %v6640_v51 }
 0x436   : > { %v6673_v11 = vmul.f32 %v12525_v42, %v12525_v42  ;;  %v6674_v23 = vmul.f32 %v12528_v36, %v12528_v36  ;;  %v12553_v58 = vsub.f32 %v12351_v59, %v6640_v51  ;;  %v12559_v47 = vsub.f32 %v12359_v62, %v6640_v51 }
 0x437   : > { %v6675_v8 = vmul.f32 %v12531_v39, %v12531_v39  ;;  %v6676_v27 = vmul.f32 %v12534_v57, %v12534_v57  ;;  %v6677_v63 = vmul.f32 %v12541_v56, %v12541_v56  ;;  %v6678_v54 = vmul.f32 %v12546_v6, %v12546_v6 }
 0x438   : > { %v6705_v25 = vsel %vm538_vm1, %v6673_v11, 0.0  ;;  %v6706_v53 = vsel %vm538_vm1, %v6674_v23, 0.0  ;;  %v12565_v32 = vsub.f32 %v12368_v44, %v6640_v51  ;;  %v6679_v59 = vmul.f32 %v12553_v58, %v12553_v58 }
 0x439   : > { %v6707_v19 = vadd.f32 %v6706_v53, %v6705_v25  ;;  %v6708_v3 = vsel %vm538_vm1, %v6675_v8, 0.0  ;;  %v6710_v38 = vsel %vm538_vm1, %v6676_v27, 0.0  ;;  %v6712_v35 = vsel %vm538_vm1, %v6677_v63, 0.0 }
 0x43a   : > { %v6680_v13 = vmul.f32 %v12559_v47, %v12559_v47  ;;  %v6714_v62 = vsel %vm538_vm1, %v6678_v54, 0.0  ;;  %v12574_v1 = vsub.f32 %v12371_v26, %v6640_v51  ;;  %v6681_v52 = vmul.f32 %v12565_v32, %v12565_v32 }
 0x43b   : > { %v6709_v5 = vadd.f32 %v6708_v3, %v6707_v19  ;;  %v6716_v44 = vsel %vm538_vm1, %v6679_v59, 0.0  ;;  %v6682_v12 = vmul.f32 %v12467_v0, %v12467_v0  ;;  %v6684_v26 = vmul.f32 %v12470_v22, %v12470_v22 }
 0x43c   : > { %v6718_v9 = vsel %vm538_vm1, %v6680_v13, 0.0  ;;  %v6683_v20 = vmul.f32 %v12574_v1, %v12574_v1  ;;  %v6720_v11 = vsel %vm538_vm1, %v6681_v52, 0.0  ;;  %v6685_v27 = vmul.f32 %v12473_v24, %v12473_v24 }
 0x43d   : > { %v6711_v17 = vadd.f32 %v6710_v38, %v6709_v5  ;;  %v6722_v51 = vsel %vm538_vm1, %v6682_v12, 0.0  ;;  %v6686_v19 = vmul.f32 %v12476_v18, %v12476_v18  ;;  %v6726_v63 = vsel %vm538_vm1, %v6684_v26, 0.0 }
 0x43e   : > { %v6724_v25 = vsel %vm538_vm1, %v6683_v20, 0.0  ;;  %v6687_v5 = vmul.f32 %v12479_v21, %v12479_v21  ;;  %v6728_v54 = vsel %vm538_vm1, %v6685_v27, 0.0 }
 0x43f   : > { %v6713_v48 = vadd.f32 %v6712_v35, %v6711_v17  ;;  %v6688_v17 = vmul.f32 %v12482_v29, %v12482_v29  ;;  %v6730_v59 = vsel %vm538_vm1, %v6686_v19, 0.0 }
 0x440   : > { %v6732_v13 = vsel %vm538_vm1, %v6687_v5, 0.0 }
 0x441   : > { %v6715_v55 = vadd.f32 %v6714_v62, %v6713_v48  ;;  %v6689_v48 = vmul.f32 %v12485_v14, %v12485_v14  ;;  %v6734_v52 = vsel %vm538_vm1, %v6688_v17, 0.0 }
 0x443   : > { %v6717_v7 = vadd.f32 %v6716_v44, %v6715_v55  ;;  %v6690_v55 = vmul.f32 %v12488_v34, %v12488_v34  ;;  %v6736_v12 = vsel %vm538_vm1, %v6689_v48, 0.0 }
 0x445   : > { %v6719_v33 = vadd.f32 %v6718_v9, %v6717_v7  ;;  %v6691_v7 = vmul.f32 %v12491_v30, %v12491_v30  ;;  %v6738_v20 = vsel %vm538_vm1, %v6690_v55, 0.0 }
 0x447   : > { %v6721_v23 = vadd.f32 %v6720_v11, %v6719_v33  ;;  %v6692_v33 = vmul.f32 %v12494_v60, %v12494_v60  ;;  %v6740_v26 = vsel %vm538_vm1, %v6691_v7, 0.0 }
 0x449   : > { %v6723_v8 = vadd.f32 %v6722_v51, %v6721_v23  ;;  %v6693_v23 = vmul.f32 %v12497_v61, %v12497_v61  ;;  %v6742_v27 = vsel %vm538_vm1, %v6692_v33, 0.0 }
 0x44b   : > { %v6725_v53 = vadd.f32 %v6724_v25, %v6723_v8  ;;  %v6694_v8 = vmul.f32 %v12500_v16, %v12500_v16  ;;  %v6744_v19 = vsel %vm538_vm1, %v6693_v23, 0.0 }
 0x44d   : > { %v6727_v3 = vadd.f32 %v6726_v63, %v6725_v53  ;;  %v6695_v53 = vmul.f32 %v12503_v40, %v12503_v40  ;;  %v6746_v5 = vsel %vm538_vm1, %v6694_v8, 0.0 }
 0x44f   : > { %v6729_v38 = vadd.f32 %v6728_v54, %v6727_v3  ;;  %v6696_v3 = vmul.f32 %v12506_v46, %v12506_v46  ;;  %v6748_v17 = vsel %vm538_vm1, %v6695_v53, 0.0 }
 0x451   : > { %v6731_v35 = vadd.f32 %v6730_v59, %v6729_v38  ;;  %v6697_v38 = vmul.f32 %v12508_v2, %v12508_v2  ;;  %v6750_v48 = vsel %vm538_vm1, %v6696_v3, 0.0 }
 0x453   : > { %v6733_v62 = vadd.f32 %v6732_v13, %v6731_v35  ;;  %v6698_v35 = vmul.f32 %v12510_v45, %v12510_v45  ;;  %v6752_v55 = vsel %vm538_vm1, %v6697_v38, 0.0 }
 0x455   : > { %v6735_v44 = vadd.f32 %v6734_v52, %v6733_v62  ;;  %v6699_v62 = vmul.f32 %v12512_v37, %v12512_v37  ;;  %v6754_v7 = vsel %vm538_vm1, %v6698_v35, 0.0 }
 0x457   : > { %v6737_v9 = vadd.f32 %v6736_v12, %v6735_v44  ;;  %v6700_v44 = vmul.f32 %v12514_v49, %v12514_v49  ;;  %v6756_v33 = vsel %vm538_vm1, %v6699_v62, 0.0 }
 0x459   : > { %v6739_v11 = vadd.f32 %v6738_v20, %v6737_v9  ;;  %v6701_v9 = vmul.f32 %v12516_v28, %v12516_v28  ;;  %v6758_v23 = vsel %vm538_vm1, %v6700_v44, 0.0 }
 0x45b   : > { %v6741_v51 = vadd.f32 %v6740_v26, %v6739_v11  ;;  %v6702_v11 = vmul.f32 %v12518_v4, %v12518_v4  ;;  %v6760_v8 = vsel %vm538_vm1, %v6701_v9, 0.0 }
 0x45d   : > { %v6743_v25 = vadd.f32 %v6742_v27, %v6741_v51  ;;  %v6703_v51 = vmul.f32 %v12520_v50, %v12520_v50  ;;  %v6762_v53 = vsel %vm538_vm1, %v6702_v11, 0.0 }
 0x45f   : > { %v6745_v63 = vadd.f32 %v6744_v19, %v6743_v25  ;;  %v6704_v25 = vmul.f32 %v12522_v41, %v12522_v41 }
 0x461   : > { %v6747_v54 = vadd.f32 %v6746_v5, %v6745_v63  ;;  %v6764_v63 = vsel %vm538_vm1, %v6703_v51, 0.0  ;;  %v6766_v5 = vsel %vm538_vm1, %v6704_v25, 0.0 }
 0x463   : > { %v6749_v59 = vadd.f32 %v6748_v17, %v6747_v54 }
 0x465   : > { %v6751_v13 = vadd.f32 %v6750_v48, %v6749_v59 }
 0x467   : > { %v6753_v52 = vadd.f32 %v6752_v55, %v6751_v13 }
 0x469   : > { %v6755_v12 = vadd.f32 %v6754_v7, %v6753_v52 }
 0x46b   : > { %v6757_v20 = vadd.f32 %v6756_v33, %v6755_v12 }
 0x46d   : > { %v6759_v26 = vadd.f32 %v6758_v23, %v6757_v20 }
 0x46f   : > { %v6761_v27 = vadd.f32 %v6760_v8, %v6759_v26 }
 0x471   : > { %v6763_v19 = vadd.f32 %v6762_v53, %v6761_v27 }
 0x473   : > { %v6765_v3 = vadd.f32 %v6764_v63, %v6763_v19 }
 0x475   : > { %v6767_v54 = vadd.f32 %v6766_v5, %v6765_v3 }
 0x477   : > { %v6768_v38 = vrot.slane %v6767_v54, 4 }
 0x479   : > { %v6769_v17 = vadd.f32 %v6768_v38, %v6767_v54 }
 0x47b   : > { %v6770_v59 = vrot.slane %v6769_v17, 2 }
 0x47d   : > { %v6771_v35 = vadd.f32 %v6770_v59, %v6769_v17 }
 0x47f   : > { %v6772_v48 = vrot.slane %v6771_v35, 1 }
 0x481   : > { %v6773_v13 = vadd.f32 %v6772_v48, %v6771_v35 }
 0x483   : > { %v6774_v62 = vmul.f32 0.00390625, %v6773_v13 }
 0x485   : > { %v6775_v55 = vadd.f32 1e-05, %v6774_v62 }
 0x487   : > { %10325 = vrsqrt.f32 %v6775_v55 }
 0x491   : > { %v10326_v52 = vpop.eup %10325 }
 0x492   : > { %v6777_v44 = vmul.f32 %v10326_v52, %v12525_v42  ;;  %v6778_v7 = vmul.f32 %v10326_v52, %v12528_v36  ;;  %v6779_v12 = vmul.f32 %v10326_v52, %v12531_v39  ;;  %v6780_v9 = vmul.f32 %v10326_v52, %v12534_v57 }
 0x493   : > { %v6781_v33 = vmul.f32 %v10326_v52, %v12541_v56  ;;  %v6782_v20 = vmul.f32 %v10326_v52, %v12546_v6  ;;  %v6783_v11 = vmul.f32 %v10326_v52, %v12553_v58  ;;  %v6784_v23 = vmul.f32 %v10326_v52, %v12559_v47 }
 0x494   : > { %v6785_v26 = vmul.f32 %v10326_v52, %v12565_v32  ;;  %v6786_v51 = vmul.f32 %v10326_v52, %v12467_v0  ;;  %v6787_v42 = vmul.f32 %v10326_v52, %v12574_v1  ;;  %v6788_v36 = vmul.f32 %v10326_v52, %v12470_v22 }
 0x495   : > { %v6789_v39 = vmul.f32 %v10326_v52, %v12473_v24  ;;  %v6790_v57 = vmul.f32 %v10326_v52, %v12476_v18  ;;  %v6791_v56 = vmul.f32 %v10326_v52, %v12479_v21  ;;  %v6792_v6 = vmul.f32 %v10326_v52, %v12482_v29 }
 0x496   : > { %v6793_v58 = vmul.f32 %v10326_v52, %v12485_v14  ;;  %v6794_v47 = vmul.f32 %v10326_v52, %v12488_v34  ;;  %v6795_v32 = vmul.f32 %v10326_v52, %v12491_v30  ;;  %v6796_v0 = vmul.f32 %v10326_v52, %v12494_v60 }
 0x497   : > { %v6797_v1 = vmul.f32 %v10326_v52, %v12497_v61  ;;  %v6798_v22 = vmul.f32 %v10326_v52, %v12500_v16  ;;  %v6799_v24 = vmul.f32 %v10326_v52, %v12503_v40  ;;  %v6800_v18 = vmul.f32 %v10326_v52, %v12506_v46 }
 0x498   : > { %v6801_v21 = vmul.f32 %v10326_v52, %v12508_v2  ;;  %v6802_v29 = vmul.f32 %v10326_v52, %v12510_v45  ;;  %v6803_v14 = vmul.f32 %v10326_v52, %v12512_v37  ;;  %v6804_v34 = vmul.f32 %v10326_v52, %v12514_v49 }
 0x499   : > { %v6805_v30 = vmul.f32 %v10326_v52, %v12516_v28  ;;  %v6806_v60 = vmul.f32 %v10326_v52, %v12518_v4  ;;  %v6807_v61 = vmul.f32 %v10326_v52, %v12520_v50  ;;  %v6808_v16 = vmul.f32 %v10326_v52, %v12522_v41 }
 0x49a   : > { %v6813_v40 = vmul.f32 %v12311_v31, %v6777_v44  ;;  %v6814_v46 = vmul.f32 %v12311_v31, %v6778_v7  ;;  %v6815_v2 = vmul.f32 %v12311_v31, %v6779_v12  ;;  %v6816_v45 = vmul.f32 %v12311_v31, %v6780_v9 }
 0x49b   : > { %v6817_v37 = vmul.f32 %v12311_v31, %v6781_v33  ;;  %v6818_v49 = vmul.f32 %v12311_v31, %v6782_v20  ;;  %v6819_v28 = vmul.f32 %v12311_v31, %v6783_v11  ;;  %v6820_v4 = vmul.f32 %v12311_v31, %v6784_v23 }
 0x49c   : > { %v6821_v50 = vmul.f32 %v12311_v31, %v6785_v26  ;;  %v6822_v41 = vmul.f32 %v12311_v31, %v6786_v51  ;;  %v6823_v8 = vmul.f32 %v12311_v31, %v6787_v42  ;;  %v6824_v27 = vmul.f32 %v12311_v31, %v6788_v36 }
 0x49d   : > { %v6825_v25 = vmul.f32 %v12311_v31, %v6789_v39  ;;  %v6826_v53 = vmul.f32 %v12311_v31, %v6790_v57  ;;  %v6827_v19 = vmul.f32 %v12311_v31, %v6791_v56  ;;  %v6828_v63 = vmul.f32 %v12311_v31, %v6792_v6 }
 0x49e   : > { %v6829_v3 = vmul.f32 %v12311_v31, %v6793_v58  ;;  %v6830_v5 = vmul.f32 %v12311_v31, %v6794_v47  ;;  %v6831_v54 = vmul.f32 %v12311_v31, %v6795_v32  ;;  %v6832_v38 = vmul.f32 %v12311_v31, %v6796_v0 }
 0x49f   : > { %v6833_v17 = vmul.f32 %v12311_v31, %v6797_v1  ;;  %v6834_v59 = vmul.f32 %v12311_v31, %v6798_v22  ;;  %v6835_v35 = vmul.f32 %v12311_v31, %v6799_v24  ;;  %v6836_v48 = vmul.f32 %v12311_v31, %v6800_v18 }
 0x4a0   : > { %v6837_v13 = vmul.f32 %v12311_v31, %v6801_v21  ;;  %v6838_v62 = vmul.f32 %v12311_v31, %v6802_v29  ;;  %v6839_v55 = vmul.f32 %v12311_v31, %v6803_v14  ;;  %v6840_v52 = vmul.f32 %v12311_v31, %v6804_v34 }
 0x4a1   : > { %v6841_v44 = vmul.f32 %v12311_v31, %v6805_v30  ;;  %v6842_v7 = vmul.f32 %v12311_v31, %v6806_v60  ;;  %v6843_v12 = vmul.f32 %v12311_v31, %v6807_v61  ;;  %v6844_v9 = vmul.f32 %v12311_v31, %v6808_v16 }
 0x4a2   : > { %v6849_v33 = vadd.f32 %v12313_v15, %v6813_v40  ;;  %v6850_v20 = vadd.f32 %v12313_v15, %v6814_v46  ;;  %v6851_v11 = vadd.f32 %v12313_v15, %v6815_v2  ;;  %v6852_v23 = vadd.f32 %v12313_v15, %v6816_v45 }
 0x4a3   : > { %v6853_v26 = vadd.f32 %v12313_v15, %v6817_v37  ;;  %v12720_v51 = vadd.f32 %v12313_v15, %v6818_v49  ;;  %v12723_v42 = vadd.f32 %v12313_v15, %v6819_v28  ;;  %v12726_v36 = vadd.f32 %v12313_v15, %v6820_v4  ;;  %v6977_v28 = vld [vmem:[%s12804_s23] sm:$0xff]  ;;  %v6978_v4 = vld [vmem:[%s12804_s23 + $0x8] sm:$0xff] }
 0x4a4   : > { %v12729_v31 = vadd.f32 %v12313_v15, %v6821_v50  ;;  %v12732_v39 = vadd.f32 %v12313_v15, %v6822_v41  ;;  %v12735_v57 = vadd.f32 %v12313_v15, %v6823_v8  ;;  %v12738_v56 = vadd.f32 %v12313_v15, %v6824_v27  ;;  %v6979_v8 = vld [vmem:[%s12804_s23 + $0x10] sm:$0xff] }
 0x4a5   : > { %v12741_v6 = vadd.f32 %v12313_v15, %v6825_v25  ;;  %v12744_v58 = vadd.f32 %v12313_v15, %v6826_v53  ;;  %v12747_v47 = vadd.f32 %v12313_v15, %v6827_v19  ;;  %v12750_v32 = vadd.f32 %v12313_v15, %v6828_v63  ;;  %v7041_v63 = vld [vmem:[%s12811_s26] sm:$0xff] }
 0x4a6   : > { %v12753_v0 = vadd.f32 %v12313_v15, %v6829_v3  ;;  %v12756_v1 = vadd.f32 %v12313_v15, %v6830_v5  ;;  %v12759_v22 = vadd.f32 %v12313_v15, %v6831_v54  ;;  %v12762_v24 = vadd.f32 %v12313_v15, %v6832_v38  ;;  %v6980_v3 = vld [vmem:[%s12804_s23 + $0x18] sm:$0xff]  ;;  %v7042_v5 = vld [vmem:[%s12811_s26 + $0x8] sm:$0xff] }
 0x4a7   : > { %v12765_v18 = vadd.f32 %v12313_v15, %v6833_v17  ;;  %v12768_v21 = vadd.f32 %v12313_v15, %v6834_v59  ;;  %v12771_v29 = vadd.f32 %v12313_v15, %v6835_v35  ;;  %v12774_v14 = vadd.f32 %v12313_v15, %v6836_v48  ;;  %v7043_v59 = vld [vmem:[%s12811_s26 + $0x10] sm:$0xff]  ;;  %v6981_v35 = vld [vmem:[%s12804_s23 + $0x20] sm:$0xff] }
 0x4a8   : > { %v12777_v34 = vadd.f32 %v12313_v15, %v6837_v13  ;;  %v12780_v30 = vadd.f32 %v12313_v15, %v6838_v62  ;;  %v12783_v60 = vadd.f32 %v12313_v15, %v6839_v55  ;;  %v12786_v61 = vadd.f32 %v12313_v15, %v6840_v52 }
 0x4a9   : > { %v12789_v16 = vadd.f32 %v12313_v15, %v6841_v44  ;;  %v12792_v40 = vadd.f32 %v12313_v15, %v6842_v7  ;;  %v12795_v46 = vadd.f32 %v12313_v15, %v6843_v12  ;;  %v12798_v2 = vadd.f32 %v12313_v15, %v6844_v9  ;;  %v7044_v44 = vld [vmem:[%s12811_s26 + $0x18] sm:$0xff]  ;;  %v6982_v7 = vld [vmem:[%s12804_s23 + $0x28] sm:$0xff] }
 0x4aa   : > { %v6913_v45 = vmul.f32 0.2, %v6849_v33  ;;  %v6914_v37 = vmul.f32 0.2, %v6850_v20  ;;  %vm6881_vm5 = vcmp.ge.f32.partialorder %v6849_v33, 0.0  ;;  %vm6882_vm6 = vcmp.ge.f32.partialorder %v6850_v20, 0.0 }
 0x4ab   : > { %v6915_v49 = vmul.f32 0.2, %v6851_v11  ;;  %vm6883_vm7 = vcmp.ge.f32.partialorder %v6851_v11, 0.0  ;;  %v6916_v15 = vmul.f32 0.2, %v6852_v23  ;;  %vm6884_vm8 = vcmp.ge.f32.partialorder %v6852_v23, 0.0 }
 0x4ac   : > { %v6945_v50 = vsel %vm6881_vm5, %v6849_v33, %v6913_v45  ;;  %v6946_v41 = vsel %vm6882_vm6, %v6850_v20, %v6914_v37  ;;  %v6917_v27 = vmul.f32 0.2, %v6853_v26  ;;  %vm6885_vm9 = vcmp.ge.f32.partialorder %v6853_v26, 0.0 }
 0x4ad   : > { %v6947_v25 = vsel %vm6883_vm7, %v6851_v11, %v6915_v49  ;;  %v7009_v53 = vadd.f32 %v6977_v28, %v6945_v50  ;;  %v7010_v19 = vadd.f32 %v6978_v4, %v6946_v41  ;;  %v6918_v54 = vmul.f32 0.2, %v12720_v51  ;;  %v6983_v11 = vld [vmem:[%s12804_s23 + $0x30] sm:$0xff]  ;;  %v6984_v4 = vld [vmem:[%s12804_s23 + $0x38] sm:$0xff] }
 0x4ae   : > { %v6948_v38 = vsel %vm6884_vm8, %v6852_v23, %v6916_v15  ;;  %vm6886_vm10 = vcmp.ge.f32.partialorder %v12720_v51, 0.0  ;;  %v7011_v17 = vadd.f32 %v6979_v8, %v6947_v25  ;;  %v6919_v48 = vmul.f32 0.2, %v12723_v42  ;;  %v7045_v23 = vld [vmem:[%s12811_s26 + $0x20] sm:$0xff]  ;;  %v7046_v15 = vld [vmem:[%s12811_s26 + $0x28] sm:$0xff] }
 0x4af   : > { %v6949_v13 = vsel %vm6885_vm9, %v6853_v26, %v6917_v27  ;;  %vm6887_vm11 = vcmp.ge.f32.partialorder %v12723_v42, 0.0  ;;  %v7012_v62 = vadd.f32 %v6980_v3, %v6948_v38  ;;  %v12823_v55 = vadd.f32 %v7041_v63, %v7009_v53  ;;  %v7047_v53 = vld [vmem:[%s12811_s26 + $0x30] sm:$0xff] }
 0x4b0   : > { %v12825_v52 = vadd.f32 %v7042_v5, %v7010_v19  ;;  %v6920_v12 = vmul.f32 0.2, %v12726_v36  ;;  %v6950_v9 = vsel %vm6886_vm10, %v12720_v51, %v6918_v54  ;;  %vm6888_vm12 = vcmp.ge.f32.partialorder %v12726_v36, 0.0  ;;  %v6985_v19 = vld [vmem:[%s12804_s23 + $0x40] sm:$0xff] }
 0x4b1   : > { %v7013_v33 = vadd.f32 %v6981_v35, %v6949_v13  ;;  %v12832_v20 = vadd.f32 %v7043_v59, %v7011_v17  ;;  %vm6889_vm13 = vcmp.ge.f32.partialorder %v12729_v31, 0.0  ;;  %v6921_v26 = vmul.f32 0.2, %v12729_v31  ;;  %v7048_v17 = vld [vmem:[%s12811_s26 + $0x38] sm:$0xff]  ;;  %v6986_v59 = vld [vmem:[%s12804_s23 + $0x48] sm:$0xff] }
 0x4b2   : > { %v6951_v45 = vsel %vm6887_vm11, %v12723_v42, %v6919_v48  ;;  %v7014_v37 = vadd.f32 %v6982_v7, %v6950_v9  ;;  %v12839_v49 = vadd.f32 %v7044_v44, %v7012_v62  ;;  %v7105_v51 = vsel %vm538_vm1, %v12823_v55, 0.0  ;;  %v6987_v7 = vld [vmem:[%s12804_s23 + $0x50] sm:$0xff] }
 0x4b3   : > { %v7106_v28 = vsel %vm538_vm1, %v12825_v52, 0.0  ;;  %v6922_v50 = vmul.f32 0.2, %v12732_v39  ;;  %v6952_v41 = vsel %vm6888_vm12, %v12726_v36, %v6920_v12  ;;  %vm6890_vm14 = vcmp.ge.f32.partialorder %v12732_v39, 0.0  ;;  %v7049_v12 = vld [vmem:[%s12811_s26 + $0x40] sm:$0xff] }
 0x4b4   : > { %v7107_v8 = vadd.f32 %v7106_v28, %v7105_v51  ;;  %v7015_v42 = vadd.f32 %v6983_v11, %v6951_v45  ;;  %v12850_v27 = vadd.f32 %v7045_v23, %v7013_v33  ;;  %v7108_v25 = vsel %vm538_vm1, %v12832_v20, 0.0  ;;  %v6988_v45 = vld [vmem:[%s12804_s23 + $0x58] sm:$0xff] }
 0x4b5   : > { %v6923_v63 = vmul.f32 0.2, %v12735_v57  ;;  %v6953_v3 = vsel %vm6889_vm13, %v12729_v31, %v6921_v26  ;;  %vm6891_vm15 = vcmp.ge.f32.partialorder %v12735_v57, 0.0  ;;  %v7016_v5 = vadd.f32 %v6984_v4, %v6952_v41  ;;  %v7051_v41 = vld [vmem:[%s12811_s26 + $0x50] sm:$0xff] }
 0x4b6   : > { %v7109_v36 = vadd.f32 %v7108_v25, %v7107_v8  ;;  %v12861_v54 = vadd.f32 %v7046_v15, %v7014_v37  ;;  %v7110_v38 = vsel %vm538_vm1, %v12839_v49, 0.0  ;;  %v6924_v35 = vmul.f32 0.2, %v12738_v56  ;;  %v7050_v37 = vld [vmem:[%s12811_s26 + $0x48] sm:$0xff]  ;;  %v6989_v8 = vld [vmem:[%s12804_s23 + $0x60] sm:$0xff] }
 0x4b7   : > { %v6954_v48 = vsel %vm6890_vm14, %v12732_v39, %v6922_v50  ;;  %vm6892_vm0 = vcmp.ge.f32.partialorder %v12738_v56, 0.0  ;;  %v7017_v13 = vadd.f32 %v6985_v19, %v6953_v3  ;;  %v12872_v62 = vadd.f32 %v7047_v53, %v7015_v42  ;;  %v7052_v3 = vld [vmem:[%s12811_s26 + $0x58] sm:$0xff] }
 0x4b8   : > { %v7111_v31 = vadd.f32 %v7110_v38, %v7109_v36  ;;  %v7112_v44 = vsel %vm538_vm1, %v12850_v27, 0.0  ;;  %v6925_v9 = vmul.f32 0.2, %v12741_v6  ;;  %v6955_v33 = vsel %vm6891_vm15, %v12735_v57, %v6923_v63  ;;  %v6990_v36 = vld [vmem:[%s12804_s23 + $0x68] sm:$0xff] }
 0x4b9   : > { %vm6893_vm2 = vcmp.ge.f32.partialorder %v12741_v6, 0.0  ;;  %v7018_v11 = vadd.f32 %v6986_v59, %v6954_v48  ;;  %v12883_v23 = vadd.f32 %v7048_v17, %v7016_v5  ;;  %v7114_v26 = vsel %vm538_vm1, %v12861_v54, 0.0  ;;  %v6991_v48 = vld [vmem:[%s12804_s23 + $0x70] sm:$0xff] }
 0x4ba   : > { %v7113_v39 = vadd.f32 %v7112_v44, %v7111_v31  ;;  %v6926_v51 = vmul.f32 0.2, %v12744_v58  ;;  %v6956_v28 = vsel %vm6892_vm0, %v12738_v56, %v6924_v35  ;;  %vm6894_vm3 = vcmp.ge.f32.partialorder %v12744_v58, 0.0  ;;  %v7053_v31 = vld [vmem:[%s12811_s26 + $0x60] sm:$0xff] }
 0x4bb   : > { %v7019_v4 = vadd.f32 %v6987_v7, %v6955_v33  ;;  %v12894_v15 = vadd.f32 %v7049_v12, %v7017_v13  ;;  %v7116_v50 = vsel %vm538_vm1, %v12872_v62, 0.0  ;;  %v6927_v42 = vmul.f32 0.2, %v12747_v47  ;;  %v6992_v33 = vld [vmem:[%s12804_s23 + $0x78] sm:$0xff] }
 0x4bc   : > { %v7115_v57 = vadd.f32 %v7114_v26, %v7113_v39  ;;  %v6957_v25 = vsel %vm6893_vm2, %v12741_v6, %v6925_v9  ;;  %vm6895_vm4 = vcmp.ge.f32.partialorder %v12747_v47, 0.0  ;;  %v7020_v53 = vadd.f32 %v6988_v45, %v6956_v28  ;;  %v7054_v39 = vld [vmem:[%s12811_s26 + $0x68] sm:$0xff]  ;;  %v7055_v28 = vld [vmem:[%s12811_s26 + $0x70] sm:$0xff] }
 0x4bd   : > { %v12905_v19 = vadd.f32 %v7050_v37, %v7018_v11  ;;  %v7118_v63 = vsel %vm538_vm1, %v12883_v23, 0.0  ;;  %v6928_v5 = vmul.f32 0.2, %v12750_v32  ;;  %v6958_v38 = vsel %vm6894_vm3, %v12744_v58, %v6926_v51 }
 0x4be   : > { %v7117_v56 = vadd.f32 %v7116_v50, %v7115_v57  ;;  %vm6896_vm5 = vcmp.ge.f32.partialorder %v12750_v32, 0.0  ;;  %v7021_v17 = vadd.f32 %v6989_v8, %v6957_v25  ;;  %v12916_v59 = vadd.f32 %v7051_v41, %v7019_v4  ;;  %v6993_v57 = vld [vmem:[%s12804_s23 + $0x80] sm:$0xff]  ;;  %v7056_v25 = vld [vmem:[%s12811_s26 + $0x78] sm:$0xff] }
 0x4bf   : > { %v7120_v35 = vsel %vm538_vm1, %v12894_v15, 0.0  ;;  %v6929_v13 = vmul.f32 0.2, %v12753_v0  ;;  %v6959_v44 = vsel %vm6895_vm4, %v12747_v47, %v6927_v42  ;;  %vm6897_vm6 = vcmp.ge.f32.partialorder %v12753_v0, 0.0 }
 0x4c0   : > { %v7119_v6 = vadd.f32 %v7118_v63, %v7117_v56  ;;  %v7022_v7 = vadd.f32 %v6990_v36, %v6958_v38  ;;  %v12927_v12 = vadd.f32 %v7052_v3, %v7020_v53  ;;  %v7122_v9 = vsel %vm538_vm1, %v12905_v19, 0.0  ;;  %v6994_v56 = vld [vmem:[%s12804_s23 + $0x88] sm:$0xff]  ;;  %v6995_v38 = vld [vmem:[%s12804_s23 + $0x90] sm:$0xff] }
 0x4c1   : > { %v6930_v11 = vmul.f32 0.2, %v12756_v1  ;;  %v6960_v26 = vsel %vm6896_vm5, %v12750_v32, %v6928_v5  ;;  %vm6898_vm7 = vcmp.ge.f32.partialorder %v12756_v1, 0.0  ;;  %v7023_v45 = vadd.f32 %v6991_v48, %v6959_v44  ;;  %v6996_v44 = vld [vmem:[%s12804_s23 + $0x98] sm:$0xff] }
 0x4c2   : > { %v7121_v58 = vadd.f32 %v7120_v35, %v7119_v6  ;;  %v12938_v37 = vadd.f32 %v7053_v31, %v7021_v17  ;;  %v7124_v51 = vsel %vm538_vm1, %v12916_v59, 0.0  ;;  %v6931_v4 = vmul.f32 0.2, %v12759_v22  ;;  %v7057_v6 = vld [vmem:[%s12811_s26 + $0x80] sm:$0xff] }
 0x4c3   : > { %v6961_v50 = vsel %vm6897_vm6, %v12753_v0, %v6929_v13  ;;  %vm6899_vm8 = vcmp.ge.f32.partialorder %v12759_v22, 0.0  ;;  %v7024_v41 = vadd.f32 %v6992_v33, %v6960_v26  ;;  %v12949_v8 = vadd.f32 %v7054_v39, %v7022_v7  ;;  %v7059_v26 = vld [vmem:[%s12811_s26 + $0x90] sm:$0xff] }
 0x4c4   : > { %v7123_v47 = vadd.f32 %v7122_v9, %v7121_v58  ;;  %v7126_v42 = vsel %vm538_vm1, %v12927_v12, 0.0  ;;  %v6932_v53 = vmul.f32 0.2, %v12762_v24  ;;  %v6962_v63 = vsel %vm6898_vm7, %v12756_v1, %v6930_v11  ;;  %v7058_v58 = vld [vmem:[%s12811_s26 + $0x88] sm:$0xff] }
 0x4c5   : > { %vm6900_vm9 = vcmp.ge.f32.partialorder %v12762_v24, 0.0  ;;  %v7025_v3 = vadd.f32 %v6993_v57, %v6961_v50  ;;  %v12960_v36 = vadd.f32 %v7055_v28, %v7023_v45  ;;  %v7128_v5 = vsel %vm538_vm1, %v12938_v37, 0.0  ;;  %v7060_v50 = vld [vmem:[%s12811_s26 + $0x98] sm:$0xff] }
 0x4c6   : > { %v7125_v32 = vadd.f32 %v7124_v51, %v7123_v47  ;;  %v6933_v17 = vmul.f32 0.2, %v12765_v18  ;;  %v6963_v35 = vsel %vm6899_vm8, %v12759_v22, %v6931_v4  ;;  %vm6901_vm10 = vcmp.ge.f32.partialorder %v12765_v18, 0.0  ;;  %v6997_v47 = vld [vmem:[%s12804_s23 + $0xa0] sm:$0xff] }
 0x4c7   : > { %v7026_v48 = vadd.f32 %v6994_v56, %v6962_v63  ;;  %v12971_v31 = vadd.f32 %v7056_v25, %v7024_v41  ;;  %v7130_v13 = vsel %vm538_vm1, %v12949_v8, 0.0  ;;  %v6934_v7 = vmul.f32 0.2, %v12768_v21  ;;  %v6999_v63 = vld [vmem:[%s12804_s23 + $0xb0] sm:$0xff] }
 0x4c8   : > { %v7127_v0 = vadd.f32 %v7126_v42, %v7125_v32  ;;  %v6964_v9 = vsel %vm6900_vm9, %v12762_v24, %v6932_v53  ;;  %vm6902_vm11 = vcmp.ge.f32.partialorder %v12768_v21, 0.0  ;;  %v7027_v33 = vadd.f32 %v6995_v38, %v6963_v35  ;;  %v6998_v32 = vld [vmem:[%s12804_s23 + $0xa8] sm:$0xff]  ;;  %v7000_v35 = vld [vmem:[%s12804_s23 + $0xb8] sm:$0xff] }
 0x4c9   : > { %v12982_v39 = vadd.f32 %v7057_v6, %v7025_v3  ;;  %v7132_v11 = vsel %vm538_vm1, %v12960_v36, 0.0  ;;  %v6935_v45 = vmul.f32 0.2, %v12771_v29  ;;  %v6965_v51 = vsel %vm6901_vm10, %v12765_v18, %v6933_v17 }
 0x4ca   : > { %v7129_v1 = vadd.f32 %v7128_v5, %v7127_v0  ;;  %vm6903_vm12 = vcmp.ge.f32.partialorder %v12771_v29, 0.0  ;;  %v7028_v28 = vadd.f32 %v6996_v44, %v6964_v9  ;;  %v12993_v57 = vadd.f32 %v7058_v58, %v7026_v48  ;;  %v7061_v0 = vld [vmem:[%s12811_s26 + $0xa0] sm:$0xff]  ;;  %v7063_v9 = vld [vmem:[%s12811_s26 + $0xb0] sm:$0xff] }
 0x4cb   : > { %v7134_v4 = vsel %vm538_vm1, %v12971_v31, 0.0  ;;  %v6936_v41 = vmul.f32 0.2, %v12774_v14  ;;  %v6966_v42 = vsel %vm6902_vm11, %v12768_v21, %v6934_v7  ;;  %vm6904_vm13 = vcmp.ge.f32.partialorder %v12774_v14, 0.0 }
 0x4cc   : > { %v7131_v22 = vadd.f32 %v7130_v13, %v7129_v1  ;;  %v7029_v25 = vadd.f32 %v6997_v47, %v6965_v51  ;;  %v13004_v56 = vadd.f32 %v7059_v26, %v7027_v33  ;;  %v7136_v53 = vsel %vm538_vm1, %v12982_v39, 0.0  ;;  %v7062_v1 = vld [vmem:[%s12811_s26 + $0xa8] sm:$0xff]  ;;  %v7064_v51 = vld [vmem:[%s12811_s26 + $0xb8] sm:$0xff] }
 0x4cd   : > { %v6937_v3 = vmul.f32 0.2, %v12777_v34  ;;  %v6967_v5 = vsel %vm6903_vm12, %v12771_v29, %v6935_v45  ;;  %vm6905_vm14 = vcmp.ge.f32.partialorder %v12777_v34, 0.0  ;;  %v7030_v38 = vadd.f32 %v6998_v32, %v6966_v42  ;;  %v7003_v42 = vld [vmem:[%s12804_s23 + $0xd0] sm:$0xff] }
 0x4ce   : > { %v7133_v24 = vadd.f32 %v7132_v11, %v7131_v22  ;;  %v13015_v6 = vadd.f32 %v7060_v50, %v7028_v28  ;;  %v7138_v17 = vsel %vm538_vm1, %v12993_v57, 0.0  ;;  %v6938_v48 = vmul.f32 0.2, %v12780_v30  ;;  %v7001_v22 = vld [vmem:[%s12804_s23 + $0xc0] sm:$0xff] }
 0x4cf   : > { %v6968_v13 = vsel %vm6904_vm13, %v12774_v14, %v6936_v41  ;;  %vm6906_vm15 = vcmp.ge.f32.partialorder %v12780_v30, 0.0  ;;  %v7031_v44 = vadd.f32 %v6999_v63, %v6967_v5  ;;  %v13026_v58 = vadd.f32 %v7061_v0, %v7029_v25  ;;  %v7004_v5 = vld [vmem:[%s12804_s23 + $0xd8] sm:$0xff] }
 0x4d0   : > { %v7135_v18 = vadd.f32 %v7134_v4, %v7133_v24  ;;  %v7140_v7 = vsel %vm538_vm1, %v13004_v56, 0.0  ;;  %v6939_v33 = vmul.f32 0.2, %v12783_v60  ;;  %v6969_v11 = vsel %vm6905_vm14, %v12777_v34, %v6937_v3  ;;  %v7002_v24 = vld [vmem:[%s12804_s23 + $0xc8] sm:$0xff] }
 0x4d1   : > { %vm6907_vm0 = vcmp.ge.f32.partialorder %v12783_v60, 0.0  ;;  %v7032_v26 = vadd.f32 %v7000_v35, %v6968_v13  ;;  %v13037_v47 = vadd.f32 %v7062_v1, %v7030_v38  ;;  %v7142_v45 = vsel %vm538_vm1, %v13015_v6, 0.0  ;;  %v7067_v13 = vld [vmem:[%s12811_s26 + $0xd0] sm:$0xff] }
 0x4d2   : > { %v7137_v21 = vadd.f32 %v7136_v53, %v7135_v18  ;;  %v6940_v28 = vmul.f32 0.2, %v12786_v61  ;;  %v6970_v4 = vsel %vm6906_vm15, %v12780_v30, %v6938_v48  ;;  %vm6908_vm2 = vcmp.ge.f32.partialorder %v12786_v61, 0.0  ;;  %v7065_v18 = vld [vmem:[%s12811_s26 + $0xc0] sm:$0xff] }
 0x4d3   : > { %v7033_v50 = vadd.f32 %v7001_v22, %v6969_v11  ;;  %v13048_v32 = vadd.f32 %v7063_v9, %v7031_v44  ;;  %v7144_v41 = vsel %vm538_vm1, %v13026_v58, 0.0  ;;  %v6941_v25 = vmul.f32 0.2, %v12789_v16  ;;  %v7068_v11 = vld [vmem:[%s12811_s26 + $0xd8] sm:$0xff] }
 0x4d4   : > { %v7139_v29 = vadd.f32 %v7138_v17, %v7137_v21  ;;  %v6971_v53 = vsel %vm6907_vm0, %v12783_v60, %v6939_v33  ;;  %vm6909_vm3 = vcmp.ge.f32.partialorder %v12789_v16, 0.0  ;;  %v7034_v63 = vadd.f32 %v7002_v24, %v6970_v4  ;;  %v7066_v21 = vld [vmem:[%s12811_s26 + $0xc8] sm:$0xff]  ;;  %v7007_v4 = vld [vmem:[%s12804_s23 + $0xf0] sm:$0xff] }
 0x4d5   : > { %v13059_v0 = vadd.f32 %v7064_v51, %v7032_v26  ;;  %v7146_v3 = vsel %vm538_vm1, %v13037_v47, 0.0  ;;  %v6942_v38 = vmul.f32 0.2, %v12792_v40  ;;  %v6972_v17 = vsel %vm6908_vm2, %v12786_v61, %v6940_v28 }
 0x4d6   : > { %v7141_v14 = vadd.f32 %v7140_v7, %v7139_v29  ;;  %vm6910_vm4 = vcmp.ge.f32.partialorder %v12792_v40, 0.0  ;;  %v7035_v35 = vadd.f32 %v7003_v42, %v6971_v53  ;;  %v13070_v1 = vadd.f32 %v7065_v18, %v7033_v50  ;;  %v7005_v29 = vld [vmem:[%s12804_s23 + $0xe0] sm:$0xff] }
 0x4d7   : > { %v7148_v48 = vsel %vm538_vm1, %v13048_v32, 0.0  ;;  %v6943_v44 = vmul.f32 0.2, %v12795_v46  ;;  %v6973_v7 = vsel %vm6909_vm3, %v12789_v16, %v6941_v25  ;;  %vm6911_vm5 = vcmp.ge.f32.partialorder %v12795_v46, 0.0  ;;  %v7008_v25 = vld [vmem:[%s12804_s23 + $0xf8] sm:$0xff] }
 0x4d8   : > { %v7143_v34 = vadd.f32 %v7142_v45, %v7141_v14  ;;  %v7036_v9 = vadd.f32 %v7004_v5, %v6972_v17  ;;  %v13081_v22 = vadd.f32 %v7066_v21, %v7034_v63  ;;  %v7150_v33 = vsel %vm538_vm1, %v13059_v0, 0.0  ;;  %v7006_v45 = vld [vmem:[%s12804_s23 + $0xe8] sm:$0xff] }
 0x4d9   : > { %v6944_v14 = vmul.f32 0.2, %v12798_v2  ;;  %v6974_v26 = vsel %vm6910_vm4, %v12792_v40, %v6942_v38  ;;  %vm6912_vm6 = vcmp.ge.f32.partialorder %v12798_v2, 0.0  ;;  %v7037_v16 = vadd.f32 %v7005_v29, %v6973_v7 }
 0x4da   : > { %v7145_v30 = vadd.f32 %v7144_v41, %v7143_v34  ;;  %v13090_v24 = vadd.f32 %v7067_v13, %v7035_v35  ;;  %v7152_v28 = vsel %vm538_vm1, %v13070_v1, 0.0  ;;  %v7069_v34 = vld [vmem:[%s12811_s26 + $0xe0] sm:$0xff]  ;;  %v6975_v50 = vsel %vm6911_vm5, %v12795_v46, %v6943_v44  ;;  %v7071_v46 = vld [vmem:[%s12811_s26 + $0xf0] sm:$0xff] }
 0x4db   : > { %v7038_v42 = vadd.f32 %v7006_v45, %v6974_v26  ;;  %v13097_v40 = vadd.f32 %v7068_v11, %v7036_v9  ;;  %v7154_v18 = vsel %vm538_vm1, %v13081_v22, 0.0  ;;  %v6976_v53 = vsel %vm6912_vm6, %v12798_v2, %v6944_v14 }
 0x4dc   : > { %v7147_v60 = vadd.f32 %v7146_v3, %v7145_v30  ;;  %v7070_v30 = vld [vmem:[%s12811_s26 + $0xe8] sm:$0xff]  ;;  %v7039_v3 = vadd.f32 %v7007_v4, %v6975_v50  ;;  %v13104_v5 = vadd.f32 %v7069_v34, %v7037_v16  ;;  %v7156_v21 = vsel %vm538_vm1, %v13090_v24, 0.0 }
 0x4dd   : > { %v7040_v17 = vadd.f32 %v7008_v25, %v6976_v53  ;;  %v7158_v35 = vsel %vm538_vm1, %v13097_v40, 0.0 }
 0x4de   : > { %v7149_v61 = vadd.f32 %v7148_v48, %v7147_v60  ;;  %v13109_v60 = vadd.f32 %v7070_v30, %v7038_v42  ;;  %v7072_v48 = vld [vmem:[%s12811_s26 + $0xf8] sm:$0xff]  ;;  %v13114_v29 = vadd.f32 %v7071_v46, %v7039_v3  ;;  %v7160_v2 = vsel %vm538_vm1, %v13104_v5, 0.0 }
 0x4df   : > { %v13118_v7 = vadd.f32 %v7072_v48, %v7040_v17 }
 0x4e0   : > { %v7151_v51 = vadd.f32 %v7150_v33, %v7149_v61  ;;  %v7162_v61 = vsel %vm538_vm1, %v13109_v60, 0.0  ;;  %v7164_v33 = vsel %vm538_vm1, %v13114_v29, 0.0 }
 0x4e1   : > { %v7166_v14 = vsel %vm538_vm1, %v13118_v7, 0.0 }
 0x4e2   : > { %v7153_v41 = vadd.f32 %v7152_v28, %v7151_v51 }
 0x4e4   : > { %v7155_v63 = vadd.f32 %v7154_v18, %v7153_v41 }
 0x4e6   : > { %v7157_v38 = vadd.f32 %v7156_v21, %v7155_v63 }
 0x4e8   : > { %v7159_v13 = vadd.f32 %v7158_v35, %v7157_v38 }
 0x4ea   : > { %v7161_v44 = vadd.f32 %v7160_v2, %v7159_v13 }
 0x4ec   : > { %v7163_v9 = vadd.f32 %v7162_v61, %v7161_v44 }
 0x4ee   : > { %v7165_v11 = vadd.f32 %v7164_v33, %v7163_v9 }
 0x4f0   : > { %v7167_v26 = vadd.f32 %v7166_v14, %v7165_v11 }
 0x4f2   : > { %v7168_v45 = vrot.slane %v7167_v26, 4 }
 0x4f4   : > { %v7169_v51 = vadd.f32 %v7168_v45, %v7167_v26 }
 0x4f6   : > { %v7170_v16 = vrot.slane %v7169_v51, 2 }
 0x4f8   : > { %v7171_v28 = vadd.f32 %v7170_v16, %v7169_v51 }
 0x4fa   : > { %v7172_v4 = vrot.slane %v7171_v28, 1 }
 0x4fc   : > { %v7173_v34 = vadd.f32 %v7172_v4, %v7171_v28 }
 0x4fe   : > { %v13126_v50 = vmul.f32 0.00390625, %v7173_v34 }
 0x500   : > { %v13130_v41 = vsub.f32 %v12823_v55, %v13126_v50  ;;  %v13134_v42 = vsub.f32 %v12825_v52, %v13126_v50  ;;  %v13138_v18 = vsub.f32 %v12832_v20, %v13126_v50  ;;  %v13142_v25 = vsub.f32 %v12839_v49, %v13126_v50 }
 0x501   : > { %v13150_v55 = vsub.f32 %v12850_v27, %v13126_v50  ;;  %v13156_v20 = vsub.f32 %v12861_v54, %v13126_v50  ;;  %v13164_v46 = vsub.f32 %v12872_v62, %v13126_v50  ;;  %v13171_v54 = vsub.f32 %v12883_v23, %v13126_v50 }
 0x502   : > { %v7207_v53 = vmul.f32 %v13130_v41, %v13130_v41  ;;  %v7208_v30 = vmul.f32 %v13134_v42, %v13134_v42  ;;  %v7209_v52 = vmul.f32 %v13138_v18, %v13138_v18  ;;  %v7210_v49 = vmul.f32 %v13142_v25, %v13142_v25 }
 0x503   : > { %v7211_v27 = vmul.f32 %v13150_v55, %v13150_v55  ;;  %v7212_v35 = vmul.f32 %v13156_v20, %v13156_v20  ;;  %v13178_v62 = vsub.f32 %v12894_v15, %v13126_v50  ;;  %v7213_v2 = vmul.f32 %v13164_v46, %v13164_v46 }
 0x504   : > { %v7239_v63 = vsel %vm538_vm1, %v7207_v53, 0.0  ;;  %v7240_v3 = vsel %vm538_vm1, %v7208_v30, 0.0  ;;  %v7242_v38 = vsel %vm538_vm1, %v7209_v52, 0.0  ;;  %v7244_v48 = vsel %vm538_vm1, %v7210_v49, 0.0 }
 0x505   : > { %v7241_v21 = vadd.f32 %v7240_v3, %v7239_v63  ;;  %v7246_v44 = vsel %vm538_vm1, %v7211_v27, 0.0  ;;  %v13185_v23 = vsub.f32 %v12905_v19, %v13126_v50  ;;  %v7214_v9 = vmul.f32 %v13171_v54, %v13171_v54 }
 0x506   : > { %v7248_v33 = vsel %vm538_vm1, %v7212_v35, 0.0  ;;  %v13192_v15 = vsub.f32 %v12916_v59, %v13126_v50  ;;  %v7215_v14 = vmul.f32 %v13178_v62, %v13178_v62  ;;  %v7250_v26 = vsel %vm538_vm1, %v7213_v2, 0.0 }
 0x507   : > { %v7243_v17 = vadd.f32 %v7242_v38, %v7241_v21  ;;  %v13199_v19 = vsub.f32 %v12927_v12, %v13126_v50  ;;  %v7216_v51 = vmul.f32 %v13185_v23, %v13185_v23  ;;  %v7252_v16 = vsel %vm538_vm1, %v7214_v9, 0.0 }
 0x508   : > { %v13206_v59 = vsub.f32 %v12938_v37, %v13126_v50  ;;  %v7217_v4 = vmul.f32 %v13192_v15, %v13192_v15  ;;  %v7254_v34 = vsel %vm538_vm1, %v7215_v14, 0.0  ;;  %v13213_v12 = vsub.f32 %v12949_v8, %v13126_v50 }
 0x509   : > { %v7245_v13 = vadd.f32 %v7244_v48, %v7243_v17  ;;  %v7218_v30 = vmul.f32 %v13199_v19, %v13199_v19  ;;  %v7256_v52 = vsel %vm538_vm1, %v7216_v51, 0.0  ;;  %v13220_v37 = vsub.f32 %v12960_v36, %v13126_v50 }
 0x50a   : > { %v7219_v63 = vmul.f32 %v13206_v59, %v13206_v59  ;;  %v7258_v3 = vsel %vm538_vm1, %v7217_v4, 0.0  ;;  %v13227_v8 = vsub.f32 %v12971_v31, %v13126_v50  ;;  %v7220_v27 = vmul.f32 %v13213_v12, %v13213_v12 }
 0x50b   : > { %v7247_v61 = vadd.f32 %v7246_v44, %v7245_v13  ;;  %v7260_v38 = vsel %vm538_vm1, %v7218_v30, 0.0  ;;  %v13234_v36 = vsub.f32 %v12982_v39, %v13126_v50  ;;  %v7221_v35 = vmul.f32 %v13220_v37, %v13220_v37 }
 0x50c   : > { %v7262_v48 = vsel %vm538_vm1, %v7219_v63, 0.0  ;;  %v13241_v31 = vsub.f32 %v12993_v57, %v13126_v50  ;;  %v7222_v2 = vmul.f32 %v13227_v8, %v13227_v8  ;;  %v7264_v44 = vsel %vm538_vm1, %v7220_v27, 0.0 }
 0x50d   : > { %v7249_v11 = vadd.f32 %v7248_v33, %v7247_v61  ;;  %v13248_v39 = vsub.f32 %v13004_v56, %v13126_v50  ;;  %v7223_v9 = vmul.f32 %v13234_v36, %v13234_v36  ;;  %v7266_v33 = vsel %vm538_vm1, %v7221_v35, 0.0 }
 0x50e   : > { %v13255_v57 = vsub.f32 %v13015_v6, %v13126_v50  ;;  %v7224_v14 = vmul.f32 %v13241_v31, %v13241_v31  ;;  %v13262_v56 = vsub.f32 %v13026_v58, %v13126_v50  ;;  %v13269_v6 = vsub.f32 %v13037_v47, %v13126_v50 }
 0x50f   : > { %v7251_v45 = vadd.f32 %v7250_v26, %v7249_v11  ;;  %v7268_v26 = vsel %vm538_vm1, %v7222_v2, 0.0  ;;  %v7225_v51 = vmul.f32 %v13248_v39, %v13248_v39  ;;  %v13276_v58 = vsub.f32 %v13048_v32, %v13126_v50 }
 0x510   : > { %v7226_v4 = vmul.f32 %v13255_v57, %v13255_v57  ;;  %v7227_v30 = vmul.f32 %v13262_v56, %v13262_v56  ;;  %v13283_v47 = vsub.f32 %v13059_v0, %v13126_v50  ;;  %v7228_v63 = vmul.f32 %v13269_v6, %v13269_v6 }
 0x511   : > { %v7253_v28 = vadd.f32 %v7252_v16, %v7251_v45  ;;  %v7270_v16 = vsel %vm538_vm1, %v7223_v9, 0.0  ;;  %v13290_v32 = vsub.f32 %v13070_v1, %v13126_v50  ;;  %v7229_v27 = vmul.f32 %v13276_v58, %v13276_v58 }
 0x512   : > { %v13297_v0 = vsub.f32 %v13081_v22, %v13126_v50  ;;  %v7230_v35 = vmul.f32 %v13283_v47, %v13283_v47  ;;  %v13304_v1 = vsub.f32 %v13090_v24, %v13126_v50  ;;  %v13311_v22 = vsub.f32 %v13097_v40, %v13126_v50 }
 0x513   : > { %v7255_v53 = vadd.f32 %v7254_v34, %v7253_v28  ;;  %v7272_v34 = vsel %vm538_vm1, %v7224_v14, 0.0  ;;  %v7231_v2 = vmul.f32 %v13290_v32, %v13290_v32  ;;  %v13318_v24 = vsub.f32 %v13104_v5, %v13126_v50 }
 0x514   : > { %v7232_v9 = vmul.f32 %v13297_v0, %v13297_v0  ;;  %v7233_v14 = vmul.f32 %v13304_v1, %v13304_v1  ;;  %v7204_v40 = vsub.f32 %v13109_v60, %v13126_v50 }
 0x515   : > { %v7257_v49 = vadd.f32 %v7256_v52, %v7255_v53  ;;  %v7274_v52 = vsel %vm538_vm1, %v7225_v51, 0.0  ;;  %v7234_v51 = vmul.f32 %v13311_v22, %v13311_v22  ;;  %v7235_v5 = vmul.f32 %v13318_v24, %v13318_v24 }
 0x516   : > { %v7236_v60 = vmul.f32 %v7204_v40, %v7204_v40 }
 0x517   : > { %v7259_v21 = vadd.f32 %v7258_v3, %v7257_v49  ;;  %v7276_v3 = vsel %vm538_vm1, %v7226_v4, 0.0  ;;  %v13330_v4 = vsub.f32 %v13114_v29, %v13126_v50 }
 0x519   : > { %v7261_v17 = vadd.f32 %v7260_v38, %v7259_v21  ;;  %v7278_v38 = vsel %vm538_vm1, %v7227_v30, 0.0  ;;  %v7206_v30 = vsub.f32 %v13118_v7, %v13126_v50 }
 0x51b   : > { %v7263_v13 = vadd.f32 %v7262_v48, %v7261_v17  ;;  %v7280_v48 = vsel %vm538_vm1, %v7228_v63, 0.0  ;;  %v7237_v63 = vmul.f32 %v13330_v4, %v13330_v4 }
 0x51d   : > { %v7265_v61 = vadd.f32 %v7264_v44, %v7263_v13  ;;  %v7282_v44 = vsel %vm538_vm1, %v7229_v27, 0.0  ;;  %v7296_v27 = vsel %vm538_vm1, %v7236_v60, 0.0 }
 0x51f   : > { %v7267_v11 = vadd.f32 %v7266_v33, %v7265_v61  ;;  %v7284_v33 = vsel %vm538_vm1, %v7230_v35, 0.0 }
 0x521   : > { %v7269_v45 = vadd.f32 %v7268_v26, %v7267_v11  ;;  %v7286_v26 = vsel %vm538_vm1, %v7231_v2, 0.0 }
 0x523   : > { %v7271_v28 = vadd.f32 %v7270_v16, %v7269_v45  ;;  %v7288_v16 = vsel %vm538_vm1, %v7232_v9, 0.0 }
 0x525   : > { %v7273_v53 = vadd.f32 %v7272_v34, %v7271_v28  ;;  %v7290_v34 = vsel %vm538_vm1, %v7233_v14, 0.0 }
 0x527   : > { %v7275_v49 = vadd.f32 %v7274_v52, %v7273_v53  ;;  %v7292_v52 = vsel %vm538_vm1, %v7234_v51, 0.0 }
 0x529   : > { %v7277_v21 = vadd.f32 %v7276_v3, %v7275_v49  ;;  %v7294_v3 = vsel %vm538_vm1, %v7235_v5, 0.0 }
 0x52b   : > { %v7279_v17 = vadd.f32 %v7278_v38, %v7277_v21  ;;  %v7238_v21 = vmul.f32 %v7206_v30, %v7206_v30 }
 0x52d   : > { %v7281_v13 = vadd.f32 %v7280_v48, %v7279_v17  ;;  %v7298_v17 = vsel %vm538_vm1, %v7237_v63, 0.0  ;;  %v7300_v7 = vsel %vm538_vm1, %v7238_v21, 0.0 }
 0x52f   : > { %v7283_v61 = vadd.f32 %v7282_v44, %v7281_v13 }
 0x531   : > { %v7285_v11 = vadd.f32 %v7284_v33, %v7283_v61 }
 0x533   : > { %v7287_v45 = vadd.f32 %v7286_v26, %v7285_v11 }
 0x535   : > { %v7289_v28 = vadd.f32 %v7288_v16, %v7287_v45 }
 0x537   : > { %v7291_v53 = vadd.f32 %v7290_v34, %v7289_v28 }
 0x539   : > { %v7293_v49 = vadd.f32 %v7292_v52, %v7291_v53 }
 0x53b   : > { %v7295_v29 = vadd.f32 %v7294_v3, %v7293_v49 }
 0x53d   : > { %v7297_v38 = vadd.f32 %v7296_v27, %v7295_v29 }
 0x53f   : > { %v7299_v35 = vadd.f32 %v7298_v17, %v7297_v38 }
 0x541   : > { %v7301_v50 = vadd.f32 %v7300_v7, %v7299_v35 }
 0x543   : > { %v7302_v48 = vrot.slane %v7301_v50, 4 }
 0x545   : > { %v7303_v13 = vadd.f32 %v7302_v48, %v7301_v50 }
 0x547   : > { %v7304_v2 = vrot.slane %v7303_v13, 2 }
 0x549   : > { %v7305_v44 = vadd.f32 %v7304_v2, %v7303_v13 }
 0x54b   : > { %v7306_v61 = vrot.slane %v7305_v44, 1 }
 0x54d   : > { %v7307_v9 = vadd.f32 %v7306_v61, %v7305_v44 }
 0x54f   : > { %v7308_v33 = vmul.f32 0.00390625, %v7307_v9 }
 0x551   : > { %v7309_v11 = vadd.f32 1e-05, %v7308_v33 }
 0x553   : > { %10327 = vrsqrt.f32 %v7309_v11 }
 0x55d   : > { %v10328_v14 = vpop.eup %10327 }
 0x55e   : > { %v7340_v26 = vmul.f32 %v10328_v14, %v7204_v40  ;;  %v7311_v45 = vmul.f32 %v10328_v14, %v13130_v41  ;;  %v7312_v51 = vmul.f32 %v10328_v14, %v13134_v42  ;;  %v7313_v16 = vmul.f32 %v10328_v14, %v13138_v18 }
 0x55f   : > { %v7314_v28 = vmul.f32 %v10328_v14, %v13142_v25  ;;  %v7315_v5 = vmul.f32 %v10328_v14, %v13150_v55  ;;  %v7316_v34 = vmul.f32 %v10328_v14, %v13156_v20  ;;  %v7317_v53 = vmul.f32 %v10328_v14, %v13164_v46 }
 0x560   : > { %v7376_v60 = vmul.f32 %v12315_v43, %v7340_v26  ;;  %v7318_v52 = vmul.f32 %v10328_v14, %v13171_v54  ;;  %v7319_v40 = vmul.f32 %v10328_v14, %v13178_v62  ;;  %v7320_v41 = vmul.f32 %v10328_v14, %v13185_v23 }
 0x561   : > { %v7321_v42 = vmul.f32 %v10328_v14, %v13192_v15  ;;  %v7322_v18 = vmul.f32 %v10328_v14, %v13199_v19  ;;  %v7323_v25 = vmul.f32 %v10328_v14, %v13206_v59  ;;  %v7324_v55 = vmul.f32 %v10328_v14, %v13213_v12 }
 0x562   : > { %v7412_v20 = vadd.f32 %v12317_v10, %v7376_v60  ;;  %v7325_v46 = vmul.f32 %v10328_v14, %v13220_v37  ;;  %v7326_v49 = vmul.f32 %v10328_v14, %v13227_v8  ;;  %v7327_v54 = vmul.f32 %v10328_v14, %v13234_v36 }
 0x563   : > { %v7328_v62 = vmul.f32 %v10328_v14, %v13241_v31  ;;  %v7329_v23 = vmul.f32 %v10328_v14, %v13248_v39  ;;  %v7330_v15 = vmul.f32 %v10328_v14, %v13255_v57  ;;  %v7331_v19 = vmul.f32 %v10328_v14, %v13262_v56 }
 0x564   : > { %7444 = vst.msk [vmem:[%s13370_s8 + $0xe8] sm:$0xff] %vm538_vm1, %v7412_v20  ;;  %v7332_v59 = vmul.f32 %v10328_v14, %v13269_v6  ;;  %v7333_v12 = vmul.f32 %v10328_v14, %v13276_v58  ;;  %v7334_v37 = vmul.f32 %v10328_v14, %v13283_v47  ;;  %v7335_v8 = vmul.f32 %v10328_v14, %v13290_v32 }
 0x565   : > { %v7336_v36 = vmul.f32 %v10328_v14, %v13297_v0  ;;  %v7337_v31 = vmul.f32 %v10328_v14, %v13304_v1  ;;  %v7338_v39 = vmul.f32 %v10328_v14, %v13311_v22  ;;  %v7339_v57 = vmul.f32 %v10328_v14, %v13318_v24 }
 0x566   : > { %v7341_v56 = vmul.f32 %v10328_v14, %v13330_v4  ;;  %v7342_v63 = vmul.f32 %v10328_v14, %v7206_v30  ;;  %v7347_v3 = vmul.f32 %v12315_v43, %v7311_v45  ;;  %v7348_v6 = vmul.f32 %v12315_v43, %v7312_v51 }
 0x567   : > { %v7349_v58 = vmul.f32 %v12315_v43, %v7313_v16  ;;  %v7350_v47 = vmul.f32 %v12315_v43, %v7314_v28  ;;  %v7351_v32 = vmul.f32 %v12315_v43, %v7315_v5  ;;  %v7352_v0 = vmul.f32 %v12315_v43, %v7316_v34 }
 0x568   : > { %v7353_v1 = vmul.f32 %v12315_v43, %v7317_v53  ;;  %v7354_v22 = vmul.f32 %v12315_v43, %v7318_v52  ;;  %v7355_v24 = vmul.f32 %v12315_v43, %v7319_v40  ;;  %v7356_v4 = vmul.f32 %v12315_v43, %v7320_v41 }
 0x569   : > { %v7357_v30 = vmul.f32 %v12315_v43, %v7321_v42  ;;  %v7358_v29 = vmul.f32 %v12315_v43, %v7322_v18  ;;  %v7359_v21 = vmul.f32 %v12315_v43, %v7323_v25  ;;  %v7360_v27 = vmul.f32 %v12315_v43, %v7324_v55 }
 0x56a   : > { %v7361_v38 = vmul.f32 %v12315_v43, %v7325_v46  ;;  %v7362_v17 = vmul.f32 %v12315_v43, %v7326_v49  ;;  %v7363_v35 = vmul.f32 %v12315_v43, %v7327_v54  ;;  %v7364_v7 = vmul.f32 %v12315_v43, %v7328_v62 }
 0x56b   : > { %v7365_v50 = vmul.f32 %v12315_v43, %v7329_v23  ;;  %v7366_v48 = vmul.f32 %v12315_v43, %v7330_v15  ;;  %v7367_v13 = vmul.f32 %v12315_v43, %v7331_v19  ;;  %v7368_v2 = vmul.f32 %v12315_v43, %v7332_v59 }
 0x56c   : > { %v7369_v44 = vmul.f32 %v12315_v43, %v7333_v12  ;;  %v7370_v61 = vmul.f32 %v12315_v43, %v7334_v37  ;;  %v7371_v9 = vmul.f32 %v12315_v43, %v7335_v8  ;;  %v7372_v33 = vmul.f32 %v12315_v43, %v7336_v36 }
 0x56d   : > { %v7373_v11 = vmul.f32 %v12315_v43, %v7337_v31  ;;  %v7374_v14 = vmul.f32 %v12315_v43, %v7338_v39  ;;  %v7375_v26 = vmul.f32 %v12315_v43, %v7339_v57  ;;  %v7377_v45 = vmul.f32 %v12315_v43, %v7341_v56 }
 0x56e   : > { %v7378_v51 = vmul.f32 %v12315_v43, %v7342_v63  ;;  %v7383_v16 = vadd.f32 %v12317_v10, %v7347_v3  ;;  %v7384_v28 = vadd.f32 %v12317_v10, %v7348_v6  ;;  %v7385_v5 = vadd.f32 %v12317_v10, %v7349_v58 }
 0x56f   : > { %v7386_v34 = vadd.f32 %v12317_v10, %v7350_v47  ;;  %v7387_v53 = vadd.f32 %v12317_v10, %v7351_v32  ;;  %v7388_v60 = vadd.f32 %v12317_v10, %v7352_v0  ;;  %v7389_v52 = vadd.f32 %v12317_v10, %v7353_v1 }
 0x570   : > { %v7390_v43 = vadd.f32 %v12317_v10, %v7354_v22  ;;  %v7391_v40 = vadd.f32 %v12317_v10, %v7355_v24  ;;  %v7392_v41 = vadd.f32 %v12317_v10, %v7356_v4  ;;  %v7393_v42 = vadd.f32 %v12317_v10, %v7357_v30  ;;  %7415 = vst.msk [vmem:[%s13370_s8] sm:$0xff] %vm538_vm1, %v7383_v16 }
 0x571   : > { %7416 = vst.msk [vmem:[%s13370_s8 + $0x8] sm:$0xff] %vm538_vm1, %v7384_v28  ;;  %7417 = vst.msk [vmem:[%s13370_s8 + $0x10] sm:$0xff] %vm538_vm1, %v7385_v5  ;;  %v7394_v18 = vadd.f32 %v12317_v10, %v7358_v29  ;;  %v7395_v25 = vadd.f32 %v12317_v10, %v7359_v21  ;;  %v7396_v55 = vadd.f32 %v12317_v10, %v7360_v27 }
 0x572   : > { %v7397_v20 = vadd.f32 %v12317_v10, %v7361_v38  ;;  %7418 = vst.msk [vmem:[%s13370_s8 + $0x18] sm:$0xff] %vm538_vm1, %v7386_v34  ;;  %7419 = vst.msk [vmem:[%s13370_s8 + $0x20] sm:$0xff] %vm538_vm1, %v7387_v53  ;;  %v7398_v46 = vadd.f32 %v12317_v10, %v7362_v17  ;;  %v7399_v49 = vadd.f32 %v12317_v10, %v7363_v35 }
 0x573   : > { %7420 = vst.msk [vmem:[%s13370_s8 + $0x28] sm:$0xff] %vm538_vm1, %v7388_v60  ;;  %7421 = vst.msk [vmem:[%s13370_s8 + $0x30] sm:$0xff] %vm538_vm1, %v7389_v52  ;;  %v7400_v54 = vadd.f32 %v12317_v10, %v7364_v7  ;;  %v7401_v62 = vadd.f32 %v12317_v10, %v7365_v50  ;;  %v7402_v23 = vadd.f32 %v12317_v10, %v7366_v48 }
 0x574   : > { %7422 = vst.msk [vmem:[%s13370_s8 + $0x38] sm:$0xff] %vm538_vm1, %v7390_v43  ;;  %7423 = vst.msk [vmem:[%s13370_s8 + $0x40] sm:$0xff] %vm538_vm1, %v7391_v40  ;;  %v7403_v15 = vadd.f32 %v12317_v10, %v7367_v13  ;;  %v7404_v19 = vadd.f32 %v12317_v10, %v7368_v2  ;;  %v7405_v59 = vadd.f32 %v12317_v10, %v7369_v44 }
 0x575   : > { %7424 = vst.msk [vmem:[%s13370_s8 + $0x48] sm:$0xff] %vm538_vm1, %v7392_v41  ;;  %7425 = vst.msk [vmem:[%s13370_s8 + $0x50] sm:$0xff] %vm538_vm1, %v7393_v42  ;;  %v7406_v12 = vadd.f32 %v12317_v10, %v7370_v61  ;;  %v7407_v37 = vadd.f32 %v12317_v10, %v7371_v9  ;;  %v7408_v8 = vadd.f32 %v12317_v10, %v7372_v33 }
 0x576   : > { %7426 = vst.msk [vmem:[%s13370_s8 + $0x58] sm:$0xff] %vm538_vm1, %v7394_v18  ;;  %7427 = vst.msk [vmem:[%s13370_s8 + $0x60] sm:$0xff] %vm538_vm1, %v7395_v25  ;;  %v7409_v36 = vadd.f32 %v12317_v10, %v7373_v11  ;;  %v7410_v31 = vadd.f32 %v12317_v10, %v7374_v14  ;;  %v7411_v39 = vadd.f32 %v12317_v10, %v7375_v26 }
 0x577   : > { %7428 = vst.msk [vmem:[%s13370_s8 + $0x68] sm:$0xff] %vm538_vm1, %v7396_v55  ;;  %7429 = vst.msk [vmem:[%s13370_s8 + $0x70] sm:$0xff] %vm538_vm1, %v7397_v20  ;;  %v7413_v57 = vadd.f32 %v12317_v10, %v7377_v45  ;;  %v7414_v56 = vadd.f32 %v12317_v10, %v7378_v51 }
 0x578   : > { %7430 = vst.msk [vmem:[%s13370_s8 + $0x78] sm:$0xff] %vm538_vm1, %v7398_v46  ;;  %7431 = vst.msk [vmem:[%s13370_s8 + $0x80] sm:$0xff] %vm538_vm1, %v7399_v49 }
 0x579   : > { %7432 = vst.msk [vmem:[%s13370_s8 + $0x88] sm:$0xff] %vm538_vm1, %v7400_v54  ;;  %7433 = vst.msk [vmem:[%s13370_s8 + $0x90] sm:$0xff] %vm538_vm1, %v7401_v62 }
 0x57a   : > { %7434 = vst.msk [vmem:[%s13370_s8 + $0x98] sm:$0xff] %vm538_vm1, %v7402_v23  ;;  %7435 = vst.msk [vmem:[%s13370_s8 + $0xa0] sm:$0xff] %vm538_vm1, %v7403_v15 }
 0x57b   : > { %7436 = vst.msk [vmem:[%s13370_s8 + $0xa8] sm:$0xff] %vm538_vm1, %v7404_v19  ;;  %7437 = vst.msk [vmem:[%s13370_s8 + $0xb0] sm:$0xff] %vm538_vm1, %v7405_v59 }
 0x57c   : > { %7438 = vst.msk [vmem:[%s13370_s8 + $0xb8] sm:$0xff] %vm538_vm1, %v7406_v12  ;;  %7439 = vst.msk [vmem:[%s13370_s8 + $0xc0] sm:$0xff] %vm538_vm1, %v7407_v37 }
 0x57d   : > { %7440 = vst.msk [vmem:[%s13370_s8 + $0xc8] sm:$0xff] %vm538_vm1, %v7408_v8  ;;  %7441 = vst.msk [vmem:[%s13370_s8 + $0xd0] sm:$0xff] %vm538_vm1, %v7409_v36 }
 0x57e   : > { %7442 = vst.msk [vmem:[%s13370_s8 + $0xd8] sm:$0xff] %vm538_vm1, %v7410_v31  ;;  %7443 = vst.msk [vmem:[%s13370_s8 + $0xe0] sm:$0xff] %vm538_vm1, %v7411_v39 }
 0x57f   : > { %7445 = vst.msk [vmem:[%s13370_s8 + $0xf0] sm:$0xff] %vm538_vm1, %v7413_v57  ;;  %7446 = vst.msk [vmem:[%s13370_s8 + $0xf8] sm:$0xff] %vm538_vm1, %v7414_v56 }
 0x580   : > { %10350 = shalt.err (!%p10347_p3)
}
 0x581   : > { %s10351_s23 = scalar_lea.hbm %s13484_s13, 4096  ;;  %s10355_s26 = scalar_lea.hbm %s13564_s5, 8192 }
 0x582   : > { %p10352_p4 = scmp.ne.s32.totalorder %s13484_s13, %s10351_s23  ;;  %p10356_p9 = scmp.lt.u32.totalorder %s13484_s13, %s13564_s5 }
 0x583   : > { %p10357_p10 = scmp.lt.u32.totalorder %s10355_s26, %s10351_s23  ;;  %p10359_p12 = scmp.lt.u32.totalorder %s10351_s23, %s13484_s13 }
 0x584   : > { %p10353_p7 = pnand %p10352_p4, %p10472_p5 }
 0x585   : > { %p10358_p11 = por %p10357_p10, %p10356_p9 }
 0x586   : > { %p10354_p8 = pneg %p10353_p7 }
 0x587   : > { %p10360_p13 = por %p10359_p12, %p10358_p11 }
 0x589   : > { %p10361_p0 = pnand %p10360_p13, %p10354_p8 }
 0x58b   : > { %10364 = shalt.err (!%p10361_p0)
}
 0x58c   : > { %s10402_s8 = smov 128   ;;  %s10403_s9 = smov 8  }
 0x58d   : > { %10234 = dma.vmem_to_hbm [thread:$0]  (%p10472_p5), %s13486_s10, 4096, %s13484_s13, %s13518_s14, %s10402_s8, %s10402_s8, %s10403_s9  }
 0x58e PF: > { %p10240_p1 = scmp.ge.s32.totalorder %s10399_s21, 2  ;;  %s7476_s22 = sand.u32 1, %s10387_s18  }
 0x58f   : > { %s7477_s12 = scalar_lea.sflag [#allocation3], %s7476_s22 }
 0x590   : > { %p10237_p2 = pnand %p10240_p1, %p10476_p6 }
 0x592   : > { %10382 = dma.done.wait (!%p10237_p2), %s7477_s12, 4096  }
 0x593   : > { %10384 = vsyncadd (!%p10237_p2), %s7477_s12, 4294963200  ;;  %p15_p3 = scmp.ge.s32.totalorder %s10459_s24, 4   ;;  %s13966_s18 = smov %s10391_s19 }
 0x594   : > { %s13967_s19 = smov %s10395_s20  ;;  %s13968_s20 = smov %s10470_s27 }
 0x595   : > { %s13969_s21 = smov %s10459_s24  ;;  %17 = sbr.rel (!%p15_p3) target bundleno = 3 (0x3), region = 105 }
 0x59c   :  { %7482 = vsyncpa [#allocation3], 1 }
 0x59d   :  { %7484 = vsyncpa [#allocation3 + $0x1], 1 }

</bundles_post_ra>
